<compile_context>
chip_gen: v6e
topology: v6e:2x2x1
jax: 0.10.0
libtpu: 0.0.40
codegen_flags: <defaults>
</compile_context>

<pallas_src>
import functools

import jax
import jax.numpy as jnp
from jax import lax
from jax.experimental import pallas as pl
from jax.experimental.pallas import tpu as pltpu

OUT_LANES = 128  # lane-padded class dimension -> dense final vst


# -----------------------------------------------------------------------------
# Parameter preparation: PyTorch OIHW conv weights -> (kh*kw*Cin, Cout) bf16
# matmul operands (tap-major rows); BN (eval) + conv bias -> f32 scale/shift.
# -----------------------------------------------------------------------------
def conv_w(key, cout, cin, kh, kw, std=0.1):
    w = std * jax.random.normal(key, (cout, cin, kh, kw), jnp.float32)   # OIHW
    w = jnp.transpose(w, (2, 3, 1, 0)).reshape(kh * kw * cin, cout)      # tap-major
    return w.astype(jnp.bfloat16)


def bn_fold(key, c, conv_bias=None):
    k1, k2, k3, k4 = jax.random.split(key, 4)
    gamma = 1.0 + 0.1 * jax.random.normal(k1, (c,), jnp.float32)
    beta = 0.1 * jax.random.normal(k2, (c,), jnp.float32)
    mean = 0.1 * jax.random.normal(k3, (c,), jnp.float32)
    var = 1.0 + 0.1 * jax.random.uniform(k4, (c,), jnp.float32)
    scale = gamma / jnp.sqrt(var + 1e-5)
    shift = beta - mean * scale
    if conv_bias is not None:
        shift = shift + conv_bias * scale
    return scale.reshape(1, c), shift.reshape(1, c)


def init_params(key, cnn_cfg, hidden, nclasses):
    ki = iter(jax.random.split(key, 64))
    p = {}
    w0 = 0.1 * jax.random.normal(next(ki), (32, 1, 7, 7), jnp.float32)
    p["stem_w"] = jnp.transpose(w0, (2, 3, 1, 0)).reshape(49, 32).astype(jnp.bfloat16)
    p["stem_b"] = (0.1 * jax.random.normal(next(ki), (32,), jnp.float32)).reshape(1, 32)

    blocks, in_c = [], 32
    for m in cnn_cfg:
        if m == "M":
            blocks.append(("pool", None))
            continue
        for _ in range(m[0]):
            planes = m[1]
            bp = {"w1": conv_w(next(ki), planes, in_c, 3, 3),
                  "w2": conv_w(next(ki), planes, planes, 3, 3)}
            bp["s1"], bp["sh1"] = bn_fold(next(ki), planes)
            bp["s2"], bp["sh2"] = bn_fold(next(ki), planes)
            if in_c != planes:                     # 1x1 projection shortcut + BN
                bp["wsc"] = conv_w(next(ki), planes, in_c, 1, 1)
                bp["ssc"], bp["shsc"] = bn_fold(next(ki), planes)
            blocks.append(("block", bp))
            in_c = planes
    p["blocks"] = blocks

    b1 = 0.1 * jax.random.normal(next(ki), (hidden,), jnp.float32)
    p["h1_w"] = conv_w(next(ki), hidden, in_c, 1, 5)
    p["h1_s"], p["h1_sh"] = bn_fold(next(ki), hidden, conv_bias=b1)
    b2 = 0.1 * jax.random.normal(next(ki), (hidden,), jnp.float32)
    p["h2_w"] = conv_w(next(ki), hidden, hidden, 1, 5)
    p["h2_s"], p["h2_sh"] = bn_fold(next(ki), hidden, conv_bias=b2)
    w3 = conv_w(next(ki), nclasses, hidden, 1, 5)                  # (5*hidden, 11)
    p["h3_w"] = jnp.pad(w3, ((0, 0), (0, OUT_LANES - nclasses)))   # lane-pad classes
    b3 = 0.1 * jax.random.normal(next(ki), (nclasses,), jnp.float32)
    p["h3_b"] = jnp.pad(b3, (0, OUT_LANES - nclasses)).reshape(1, OUT_LANES)
    return p


# -----------------------------------------------------------------------------
# Fully fused forward: one pallas_call, activations resident in VMEM scratch.
# -----------------------------------------------------------------------------
def pallas_forward(x_nchw, p, nclasses):
    N, _, H, W = x_nchw.shape
    x = x_nchw[:, 0].astype(jnp.float32)                 # (N, H, W), Cin = 1
    Ho = (H + 6 - 7) // 4 + 1
    Wo = (W + 6 - 7) // 2 + 1

    # --- stem im2col (wrapper gather glue over a tiny tensor) ----------------
    # TODO(synk): could be moved in-kernel with strided pl.ds reads.
    xp = jnp.pad(x, ((0, 0), (3, 3), (3, 3)))
    r = 4 * jnp.arange(Ho)[:, None] + jnp.arange(7)[None, :]       # (Ho, 7)
    c = 2 * jnp.arange(Wo)[:, None] + jnp.arange(7)[None, :]       # (Wo, 7)
    pat = xp[:, r][:, :, :, c]                                     # (N, Ho, 7, Wo, 7)
    pat = jnp.transpose(pat, (0, 1, 3, 2, 4)).reshape(N, Ho * Wo, 49)
    pat = pat.astype(jnp.bfloat16)

    hidden = p["h1_w"].shape[1]
    outc = p["h3_w"].shape[1]

    # --- static plan: flat weight list + VMEM scratch layout ------------------
    flat_w = [p["stem_w"], p["stem_b"]]
    scratch = []
    blocks_meta = []
    Hc, Wc, Cc = Ho, Wo, 32
    scratch.append(pltpu.VMEM((Hc + 2, Wc + 2, Cc), jnp.float32))      # padded stem act
    for kind, bp in p["blocks"]:
        if kind == "pool":
            blocks_meta.append(("pool", Hc, Wc, Cc))
            scratch.append(pltpu.VMEM((Hc // 2, Wc, Cc), jnp.float32))     # row-max buf
            Hc, Wc = Hc // 2, Wc // 2
            scratch.append(pltpu.VMEM((Hc + 2, Wc + 2, Cc), jnp.float32))  # padded pool out
        else:
            planes = bp["w1"].shape[1]
            has_sc = "wsc" in bp
            blocks_meta.append(("block", Hc, Wc, Cc, planes, has_sc))
            flat_w += [bp["w1"], bp["s1"], bp["sh1"], bp["w2"], bp["s2"], bp["sh2"]]
            if has_sc:
                flat_w += [bp["wsc"], bp["ssc"], bp["shsc"]]
            scratch.append(pltpu.VMEM((Hc + 2, Wc + 2, planes), jnp.float32))  # conv1 out
            scratch.append(pltpu.VMEM((Hc + 2, Wc + 2, planes), jnp.float32))  # block out
            Cc = planes
    flat_w += [p["h1_w"], p["h1_s"], p["h1_sh"],
               p["h2_w"], p["h2_s"], p["h2_sh"],
               p["h3_w"], p["h3_b"]]
    Hf, Wf, Cf = Hc, Wc, Cc
    scratch.append(pltpu.VMEM((Wf + 4, Cf), jnp.float32))            # reduce out (head1 in)
    scratch.append(pltpu.VMEM((Wf + 4, hidden), jnp.float32))        # head1 out
    scratch.append(pltpu.VMEM((Wf + 4, hidden), jnp.float32))        # head2 out
    n_w = len(flat_w)

    # NOTE(v7x): total VMEM (weights + all resident activations) here is <100 KiB.
    # At real HTR resolutions, tile over output-row bands and set
    # pltpu.CompilerParams(vmem_limit_bytes=...) to stay inside v7x's 64 MiB.

    def kernel(*refs):
        pat_ref = refs[0]
        wi = iter(refs[1:1 + n_w])
        out_ref = refs[1 + n_w]
        si = iter(refs[2 + n_w:])

        def store_padded(pref, val, hx, wx):
            # zero halo once per step + dense interior write (= conv zero-pad)
            pref[...] = jnp.zeros_like(pref)
            pref[pl.ds(1, hx), pl.ds(1, wx), :] = val.reshape(hx, wx, val.shape[-1])

        def conv3x3(pin, hx, wx, cin, w_ref, s_ref, sh_ref, extra=None):
            # im2col in-kernel: fold the 9 taps into K = 9*cin, M = hx*wx,
            # so each conv is a single bf16 MXU matmul with f32 accumulation.
            slabs = [pin[pl.ds(dh, hx), pl.ds(dw, wx), :].reshape(hx * wx, cin)
                     for dh in range(3) for dw in range(3)]
            xc = jnp.concatenate(slabs, axis=-1).astype(jnp.bfloat16)
            y = jnp.dot(xc, w_ref[...], preferred_element_type=jnp.float32)
            y = y * s_ref[...] + sh_ref[...]                 # folded BN (f32)
            if extra is not None:
                y = y + extra                                # residual (f32)
            return jnp.maximum(y, 0.0)

        # ------------------ stem: 7x7 / (4,2) conv + bias + ReLU -------------
        w_stem, b_stem = next(wi), next(wi)
        a = jnp.dot(pat_ref[0], w_stem[...], preferred_element_type=jnp.float32)
        a = jnp.maximum(a + b_stem[...], 0.0)                # (Ho*Wo, 32)
        cur = next(si)
        store_padded(cur, a, Ho, Wo)

        # ------------------ CNN body: BasicBlocks / MaxPool2d(2,2) -----------
        for meta in blocks_meta:
            if meta[0] == "pool":
                _, hx, wx, _cx = meta
                hh, wh = hx // 2, wx // 2
                vbuf = next(si)
                for hrow in range(hh):                       # vertical pair maxes
                    vbuf[hrow] = jnp.maximum(cur[1 + 2 * hrow, pl.ds(1, wx), :],
                                             cur[2 + 2 * hrow, pl.ds(1, wx), :])
                # horizontal pairs via sublane-strided reads + one dense store
                pooled = jnp.maximum(vbuf[:, pl.ds(0, wh, stride=2), :],
                                     vbuf[:, pl.ds(1, wh, stride=2), :])
                nxt = next(si)
                store_padded(nxt, pooled, hh, wh)
                cur = nxt
            else:
                _, hx, wx, cin, cout, has_sc = meta
                w1, s1, sh1 = next(wi), next(wi), next(wi)
                w2, s2, sh2 = next(wi), next(wi), next(wi)
                if has_sc:
                    wsc, ssc, shsc = next(wi), next(wi), next(wi)
                o1 = conv3x3(cur, hx, wx, cin, w1, s1, sh1)
                mid = next(si)
                store_padded(mid, o1, hx, wx)
                xin = cur[pl.ds(1, hx), pl.ds(1, wx), :].reshape(hx * wx, cin)
                if has_sc:                                   # 1x1 projection + BN
                    sc = jnp.dot(xin.astype(jnp.bfloat16), wsc[...],
                                 preferred_element_type=jnp.float32)
                    sc = sc * ssc[...] + shsc[...]
                else:
                    sc = xin                                 # identity shortcut (f32)
                o2 = conv3x3(mid, hx, wx, cout, w2, s2, sh2, extra=sc)
                nxt = next(si)
                store_padded(nxt, o2, hx, wx)
                cur = nxt

        # -------- reduce: full-height max + width-3 sliding max (-inf pad) ---
        m = cur[1, pl.ds(1, Wf), :]
        for hrow in range(1, Hf):
            m = jnp.maximum(m, cur[1 + hrow, pl.ds(1, Wf), :])    # (Wf, Cf)
        neg = jnp.full((1, Cf), -jnp.inf, jnp.float32)
        left = jnp.concatenate([neg, m[:Wf - 1, :]], axis=0)      # m[w-1]
        right = jnp.concatenate([m[1:, :], neg], axis=0)          # m[w+1]
        red = jnp.maximum(m, jnp.maximum(left, right))            # (Wf, Cf)

        # -------- CTCtopC: three 1x5 convs (BN folded, Dropout = identity) ---
        def store_row_padded(pref, val, wlen):
            pref[...] = jnp.zeros_like(pref)
            pref[pl.ds(2, wlen), :] = val

        def conv1x5(pin, w_ref, s_ref, sh_ref, relu):
            cols = [pin[pl.ds(d, Wf), :] for d in range(5)]
            xc = jnp.concatenate(cols, axis=-1).astype(jnp.bfloat16)   # (Wf, 5*Cin)
            y = jnp.dot(xc, w_ref[...], preferred_element_type=jnp.float32)
            if s_ref is not None:
                y = y * s_ref[...] + sh_ref[...]
            else:
                y = y + sh_ref[...]
            return jnp.maximum(y, 0.0) if relu else y

        h1w, h1s, h1sh = next(wi), next(wi), next(wi)
        h2w, h2s, h2sh = next(wi), next(wi), next(wi)
        h3w, h3b = next(wi), next(wi)

        rbuf = next(si)
        store_row_padded(rbuf, red, Wf)
        y1 = conv1x5(rbuf, h1w, h1s, h1sh, relu=True)
        b1buf = next(si)
        store_row_padded(b1buf, y1, Wf)
        y2 = conv1x5(b1buf, h2w, h2s, h2sh, relu=True)
        b2buf = next(si)
        store_row_padded(b2buf, y2, Wf)
        y3 = conv1x5(b2buf, h3w, None, h3b, relu=False)       # (Wf, 128)
        out_ref[0] = y3                                       # dense 128-lane store

    out = pl.pallas_call(
        kernel,
        out_shape=jax.ShapeDtypeStruct((N, Wf, outc), jnp.float32),
        grid=(N,),
        in_specs=[pl.BlockSpec((1, Ho * Wo, 49), lambda n: (n, 0, 0))] +
                 [pl.BlockSpec(w.shape, lambda n: (0, 0)) for w in flat_w],
        out_specs=pl.BlockSpec((1, Wf, outc), lambda n: (n, 0, 0)),
        scratch_shapes=scratch,
        compiler_params=pltpu.CompilerParams(
            dimension_semantics=("parallel",)),   # batch shards across v7x's 2 TCs
    )(pat, *flat_w)

    # .squeeze(2).permute(2, 0, 1) -> (W', N, nclasses); drop class-lane padding
    return jnp.transpose(out, (1, 0, 2))[:, :, :nclasses]


# -----------------------------------------------------------------------------
# Pure-JAX/XLA reference with the same precision policy (bf16 conv operands,
# f32 accumulation / affine / residual / pooling) for a tight correctness check.
# -----------------------------------------------------------------------------
def reference_forward(x_nchw, p, nclasses):
    dn = ("NHWC", "HWIO", "NHWC")

    def conv(z, w2d, kh, kw, stride=(1, 1), pad=None):
        cout = w2d.shape[1]
        cin = w2d.shape[0] // (kh * kw)
        w = w2d.reshape(kh, kw, cin, cout).astype(jnp.bfloat16)
        if pad is None:
            pad = ((kh // 2, kh // 2), (kw // 2, kw // 2))
        return lax.conv_general_dilated(
            z.astype(jnp.bfloat16), w, stride, pad, dimension_numbers=dn,
            preferred_element_type=jnp.float32)

    def affine(z, s, sh):
        return z * s.reshape(1, 1, 1, -1) + sh.reshape(1, 1, 1, -1)

    x = jnp.transpose(x_nchw, (0, 2, 3, 1)).astype(jnp.float32)
    y = conv(x, p["stem_w"], 7, 7, stride=(4, 2), pad=((3, 3), (3, 3)))
    y = jnp.maximum(y + p["stem_b"].reshape(1, 1, 1, -1), 0.0)

    for kind, bp in p["blocks"]:
        if kind == "pool":
            y = lax.reduce_window(y, -jnp.inf, lax.max, (1, 2, 2, 1),
                                  (1, 2, 2, 1), "VALID")
            continue
        o1 = jnp.maximum(affine(conv(y, bp["w1"], 3, 3), bp["s1"], bp["sh1"]), 0.0)
        o2 = affine(conv(o1, bp["w2"], 3, 3), bp["s2"], bp["sh2"])
        sc = (affine(conv(y, bp["wsc"], 1, 1), bp["ssc"], bp["shsc"])
              if "wsc" in bp else y)
        y = jnp.maximum(o2 + sc, 0.0)

    Hr = y.shape[1]
    y = lax.reduce_window(y, -jnp.inf, lax.max, (1, Hr, 3, 1), (1, Hr, 1, 1),
                          ((0, 0), (0, 0), (1, 1), (0, 0)))
    y = jnp.maximum(affine(conv(y, p["h1_w"], 1, 5), p["h1_s"], p["h1_sh"]), 0.0)
    y = jnp.maximum(affine(conv(y, p["h2_w"], 1, 5), p["h2_s"], p["h2_sh"]), 0.0)
    y = conv(y, p["h3_w"], 1, 5) + p["h3_b"].reshape(1, 1, 1, -1)
    y = y[..., :nclasses]
    return jnp.transpose(y[:, 0], (1, 0, 2))


if __name__ == "__main__":
    cnn_cfg = [(1, 8), "M", (1, 16)]          # HTRNetC(cnn_cfg, hidden, nclasses)
    hidden, nclasses = 32, 11

    key = jax.random.PRNGKey(0)
    kp, kx = jax.random.split(key)
    params = init_params(kp, cnn_cfg, hidden, nclasses)
    x = jax.random.normal(kx, (2, 1, 16, 32), jnp.float32)    # NCHW, 1 channel

    fwd = jax.jit(functools.partial(pallas_forward, p=params, nclasses=nclasses))
    out = jax.block_until_ready(fwd(x))                       # (W', N, nclasses)

    ref = reference_forward(x, params, nclasses)
    assert out.shape == ref.shape == (8, 2, nclasses), (out.shape, ref.shape)
    err = float(jnp.max(jnp.abs(out - ref)))
    assert err < 2e-3, f"max abs error vs reference: {err}"
    print("KERNEL_OK")
</pallas_src>

<mosaic_0001>
module attributes {stable_mosaic.version = 11 : i64} {
  func.func @kernel(%arg0: i32, %arg1: memref<1x64x49xbf16, #tpu.memory_space<vmem>>, %arg2: memref<49x32xbf16, #tpu.memory_space<vmem>>, %arg3: memref<1x32xf32, #tpu.memory_space<vmem>>, %arg4: memref<288x8xbf16, #tpu.memory_space<vmem>>, %arg5: memref<1x8xf32, #tpu.memory_space<vmem>>, %arg6: memref<1x8xf32, #tpu.memory_space<vmem>>, %arg7: memref<72x8xbf16, #tpu.memory_space<vmem>>, %arg8: memref<1x8xf32, #tpu.memory_space<vmem>>, %arg9: memref<1x8xf32, #tpu.memory_space<vmem>>, %arg10: memref<32x8xbf16, #tpu.memory_space<vmem>>, %arg11: memref<1x8xf32, #tpu.memory_space<vmem>>, %arg12: memref<1x8xf32, #tpu.memory_space<vmem>>, %arg13: memref<72x16xbf16, #tpu.memory_space<vmem>>, %arg14: memref<1x16xf32, #tpu.memory_space<vmem>>, %arg15: memref<1x16xf32, #tpu.memory_space<vmem>>, %arg16: memref<144x16xbf16, #tpu.memory_space<vmem>>, %arg17: memref<1x16xf32, #tpu.memory_space<vmem>>, %arg18: memref<1x16xf32, #tpu.memory_space<vmem>>, %arg19: memref<8x16xbf16, #tpu.memory_space<vmem>>, %arg20: memref<1x16xf32, #tpu.memory_space<vmem>>, %arg21: memref<1x16xf32, #tpu.memory_space<vmem>>, %arg22: memref<80x32xbf16, #tpu.memory_space<vmem>>, %arg23: memref<1x32xf32, #tpu.memory_space<vmem>>, %arg24: memref<1x32xf32, #tpu.memory_space<vmem>>, %arg25: memref<160x32xbf16, #tpu.memory_space<vmem>>, %arg26: memref<1x32xf32, #tpu.memory_space<vmem>>, %arg27: memref<1x32xf32, #tpu.memory_space<vmem>>, %arg28: memref<160x128xbf16, #tpu.memory_space<vmem>>, %arg29: memref<1x128xf32, #tpu.memory_space<vmem>>, %arg30: memref<1x8x128xf32, #tpu.memory_space<vmem>>, %arg31: memref<6x18x32xf32, #tpu.memory_space<vmem>>, %arg32: memref<6x18x8xf32, #tpu.memory_space<vmem>>, %arg33: memref<6x18x8xf32, #tpu.memory_space<vmem>>, %arg34: memref<2x16x8xf32, #tpu.memory_space<vmem>>, %arg35: memref<4x10x8xf32, #tpu.memory_space<vmem>>, %arg36: memref<4x10x16xf32, #tpu.memory_space<vmem>>, %arg37: memref<4x10x16xf32, #tpu.memory_space<vmem>>, %arg38: memref<12x16xf32, #tpu.memory_space<vmem>>, %arg39: memref<12x32xf32, #tpu.memory_space<vmem>>, %arg40: memref<12x32xf32, #tpu.memory_space<vmem>>) attributes {dimension_semantics = [#tpu.dimension_semantics<parallel>], iteration_bounds = array<i64: 2>, scalar_prefetch = 0 : i64, scratch_operands = 10 : i64, tpu.core_type = #tpu.core_type<tc>, window_params = [{transform_indices = @transform_0, window_bounds = array<i64: 1, 64, 49>}, {pipeline_mode = #tpu.pipeline_mode<synchronous>, transform_indices = @transform_1, window_bounds = array<i64: 49, 32>}, {pipeline_mode = #tpu.pipeline_mode<synchronous>, transform_indices = @transform_2, window_bounds = array<i64: 1, 32>}, {pipeline_mode = #tpu.pipeline_mode<synchronous>, transform_indices = @transform_3, window_bounds = array<i64: 288, 8>}, {pipeline_mode = #tpu.pipeline_mode<synchronous>, transform_indices = @transform_4, window_bounds = array<i64: 1, 8>}, {pipeline_mode = #tpu.pipeline_mode<synchronous>, transform_indices = @transform_5, window_bounds = array<i64: 1, 8>}, {pipeline_mode = #tpu.pipeline_mode<synchronous>, transform_indices = @transform_6, window_bounds = array<i64: 72, 8>}, {pipeline_mode = #tpu.pipeline_mode<synchronous>, transform_indices = @transform_7, window_bounds = array<i64: 1, 8>}, {pipeline_mode = #tpu.pipeline_mode<synchronous>, transform_indices = @transform_8, window_bounds = array<i64: 1, 8>}, {pipeline_mode = #tpu.pipeline_mode<synchronous>, transform_indices = @transform_9, window_bounds = array<i64: 32, 8>}, {pipeline_mode = #tpu.pipeline_mode<synchronous>, transform_indices = @transform_10, window_bounds = array<i64: 1, 8>}, {pipeline_mode = #tpu.pipeline_mode<synchronous>, transform_indices = @transform_11, window_bounds = array<i64: 1, 8>}, {pipeline_mode = #tpu.pipeline_mode<synchronous>, transform_indices = @transform_12, window_bounds = array<i64: 72, 16>}, {pipeline_mode = #tpu.pipeline_mode<synchronous>, transform_indices = @transform_13, window_bounds = array<i64: 1, 16>}, {pipeline_mode = #tpu.pipeline_mode<synchronous>, transform_indices = @transform_14, window_bounds = array<i64: 1, 16>}, {pipeline_mode = #tpu.pipeline_mode<synchronous>, transform_indices = @transform_15, window_bounds = array<i64: 144, 16>}, {pipeline_mode = #tpu.pipeline_mode<synchronous>, transform_indices = @transform_16, window_bounds = array<i64: 1, 16>}, {pipeline_mode = #tpu.pipeline_mode<synchronous>, transform_indices = @transform_17, window_bounds = array<i64: 1, 16>}, {pipeline_mode = #tpu.pipeline_mode<synchronous>, transform_indices = @transform_18, window_bounds = array<i64: 8, 16>}, {pipeline_mode = #tpu.pipeline_mode<synchronous>, transform_indices = @transform_19, window_bounds = array<i64: 1, 16>}, {pipeline_mode = #tpu.pipeline_mode<synchronous>, transform_indices = @transform_20, window_bounds = array<i64: 1, 16>}, {pipeline_mode = #tpu.pipeline_mode<synchronous>, transform_indices = @transform_21, window_bounds = array<i64: 80, 32>}, {pipeline_mode = #tpu.pipeline_mode<synchronous>, transform_indices = @transform_22, window_bounds = array<i64: 1, 32>}, {pipeline_mode = #tpu.pipeline_mode<synchronous>, transform_indices = @transform_23, window_bounds = array<i64: 1, 32>}, {pipeline_mode = #tpu.pipeline_mode<synchronous>, transform_indices = @transform_24, window_bounds = array<i64: 160, 32>}, {pipeline_mode = #tpu.pipeline_mode<synchronous>, transform_indices = @transform_25, window_bounds = array<i64: 1, 32>}, {pipeline_mode = #tpu.pipeline_mode<synchronous>, transform_indices = @transform_26, window_bounds = array<i64: 1, 32>}, {pipeline_mode = #tpu.pipeline_mode<synchronous>, transform_indices = @transform_27, window_bounds = array<i64: 160, 128>}, {pipeline_mode = #tpu.pipeline_mode<synchronous>, transform_indices = @transform_28, window_bounds = array<i64: 1, 128>}, {transform_indices = @transform_29, window_bounds = array<i64: 1, 8, 128>}]} {
    %c0 = arith.constant 0 : index
    %c0_0 = arith.constant 0 : index
    %c0_1 = arith.constant 0 : index
    %0 = vector.load %arg1[%c0, %c0_0, %c0_1] : memref<1x64x49xbf16, #tpu.memory_space<vmem>>, vector<1x64x49xbf16>
    %1 = vector.shape_cast %0 : vector<1x64x49xbf16> to vector<64x49xbf16>
    %c0_2 = arith.constant 0 : index
    %c0_3 = arith.constant 0 : index
    %2 = vector.load %arg2[%c0_2, %c0_3] : memref<49x32xbf16, #tpu.memory_space<vmem>>, vector<49x32xbf16>
    %cst = arith.constant dense<0.000000e+00> : vector<64x32xf32>
    %3 = tpu.matmul %1, %2, %cst {dimension_numbers = #tpu.dot_dimension_numbers<[1], [0], [0], [1], [0, 0, 1, 1], [], []>} : vector<64x49xbf16>, vector<49x32xbf16>, vector<64x32xf32> -> vector<64x32xf32>
    %c0_4 = arith.constant 0 : index
    %c0_5 = arith.constant 0 : index
    %4 = vector.load %arg3[%c0_4, %c0_5] : memref<1x32xf32, #tpu.memory_space<vmem>>, vector<1x32xf32>
    %5 = vector.broadcast %4 : vector<1x32xf32> to vector<64x32xf32>
    %6 = arith.addf %3, %5 : vector<64x32xf32>
    %cst_6 = arith.constant 0.000000e+00 : f32
    %7 = vector.broadcast %cst_6 : f32 to vector<64x32xf32>
    %8 = arith.maximumf %6, %7 : vector<64x32xf32>
    %cst_7 = arith.constant 0.000000e+00 : f32
    %9 = vector.broadcast %cst_7 : f32 to vector<6x18x32xf32>
    %c0_8 = arith.constant 0 : index
    %c0_9 = arith.constant 0 : index
    %c0_10 = arith.constant 0 : index
    %10 = vector.load %arg31[%c0_8, %c0_9, %c0_10] : memref<6x18x32xf32, #tpu.memory_space<vmem>>, vector<6x18x32xf32>
    tpu.vector_store %arg31[%c0_8, %c0_9, %c0_10], %9 {strides = array<i32>} : memref<6x18x32xf32, #tpu.memory_space<vmem>>, vector<6x18x32xf32>,
    %11 = vector.shape_cast %8 : vector<64x32xf32> to vector<4x16x32xf32>
    %c1 = arith.constant 1 : index
    %c1_11 = arith.constant 1 : index
    %c0_12 = arith.constant 0 : index
    %12 = vector.load %arg31[%c1, %c1_11, %c0_12] : memref<6x18x32xf32, #tpu.memory_space<vmem>>, vector<4x16x32xf32>
    tpu.vector_store %arg31[%c1, %c1_11, %c0_12], %11 {strides = array<i32>} : memref<6x18x32xf32, #tpu.memory_space<vmem>>, vector<4x16x32xf32>,
    %c0_13 = arith.constant 0 : index
    %c0_14 = arith.constant 0 : index
    %c0_15 = arith.constant 0 : index
    %13 = vector.load %arg31[%c0_13, %c0_14, %c0_15] : memref<6x18x32xf32, #tpu.memory_space<vmem>>, vector<4x16x32xf32>
    %14 = vector.shape_cast %13 : vector<4x16x32xf32> to vector<64x32xf32>
    %c0_16 = arith.constant 0 : index
    %c1_17 = arith.constant 1 : index
    %c0_18 = arith.constant 0 : index
    %15 = vector.load %arg31[%c0_16, %c1_17, %c0_18] : memref<6x18x32xf32, #tpu.memory_space<vmem>>, vector<4x16x32xf32>
    %16 = vector.shape_cast %15 : vector<4x16x32xf32> to vector<64x32xf32>
    %c0_19 = arith.constant 0 : index
    %c2 = arith.constant 2 : index
    %c0_20 = arith.constant 0 : index
    %17 = vector.load %arg31[%c0_19, %c2, %c0_20] : memref<6x18x32xf32, #tpu.memory_space<vmem>>, vector<4x16x32xf32>
    %18 = vector.shape_cast %17 : vector<4x16x32xf32> to vector<64x32xf32>
    %c1_21 = arith.constant 1 : index
    %c0_22 = arith.constant 0 : index
    %c0_23 = arith.constant 0 : index
    %19 = vector.load %arg31[%c1_21, %c0_22, %c0_23] : memref<6x18x32xf32, #tpu.memory_space<vmem>>, vector<4x16x32xf32>
    %20 = vector.shape_cast %19 : vector<4x16x32xf32> to vector<64x32xf32>
    %c1_24 = arith.constant 1 : index
    %c1_25 = arith.constant 1 : index
    %c0_26 = arith.constant 0 : index
    %21 = vector.load %arg31[%c1_24, %c1_25, %c0_26] : memref<6x18x32xf32, #tpu.memory_space<vmem>>, vector<4x16x32xf32>
    %22 = vector.shape_cast %21 : vector<4x16x32xf32> to vector<64x32xf32>
    %c1_27 = arith.constant 1 : index
    %c2_28 = arith.constant 2 : index
    %c0_29 = arith.constant 0 : index
    %23 = vector.load %arg31[%c1_27, %c2_28, %c0_29] : memref<6x18x32xf32, #tpu.memory_space<vmem>>, vector<4x16x32xf32>
    %24 = vector.shape_cast %23 : vector<4x16x32xf32> to vector<64x32xf32>
    %c2_30 = arith.constant 2 : index
    %c0_31 = arith.constant 0 : index
    %c0_32 = arith.constant 0 : index
    %25 = vector.load %arg31[%c2_30, %c0_31, %c0_32] : memref<6x18x32xf32, #tpu.memory_space<vmem>>, vector<4x16x32xf32>
    %26 = vector.shape_cast %25 : vector<4x16x32xf32> to vector<64x32xf32>
    %c2_33 = arith.constant 2 : index
    %c1_34 = arith.constant 1 : index
    %c0_35 = arith.constant 0 : index
    %27 = vector.load %arg31[%c2_33, %c1_34, %c0_35] : memref<6x18x32xf32, #tpu.memory_space<vmem>>, vector<4x16x32xf32>
    %28 = vector.shape_cast %27 : vector<4x16x32xf32> to vector<64x32xf32>
    %c2_36 = arith.constant 2 : index
    %c2_37 = arith.constant 2 : index
    %c0_38 = arith.constant 0 : index
    %29 = vector.load %arg31[%c2_36, %c2_37, %c0_38] : memref<6x18x32xf32, #tpu.memory_space<vmem>>, vector<4x16x32xf32>
    %30 = vector.shape_cast %29 : vector<4x16x32xf32> to vector<64x32xf32>
    %31 = tpu.concatenate %14, %16, %18, %20, %22, %24, %26, %28, %30 in 1 : vector<64x32xf32>, vector<64x32xf32>, vector<64x32xf32>, vector<64x32xf32>, vector<64x32xf32>, vector<64x32xf32>, vector<64x32xf32>, vector<64x32xf32>, vector<64x32xf32> -> vector<64x288xf32>
    %32 = arith.truncf %31 : vector<64x288xf32> to vector<64x288xbf16>
    %c0_39 = arith.constant 0 : index
    %c0_40 = arith.constant 0 : index
    %33 = vector.load %arg4[%c0_39, %c0_40] : memref<288x8xbf16, #tpu.memory_space<vmem>>, vector<288x8xbf16>
    %cst_41 = arith.constant dense<0.000000e+00> : vector<64x8xf32>
    %34 = tpu.matmul %32, %33, %cst_41 {dimension_numbers = #tpu.dot_dimension_numbers<[1], [0], [0], [1], [0, 0, 1, 1], [], []>} : vector<64x288xbf16>, vector<288x8xbf16>, vector<64x8xf32> -> vector<64x8xf32>
    %c0_42 = arith.constant 0 : index
    %c0_43 = arith.constant 0 : index
    %35 = vector.load %arg5[%c0_42, %c0_43] : memref<1x8xf32, #tpu.memory_space<vmem>>, vector<1x8xf32>
    %36 = vector.broadcast %35 : vector<1x8xf32> to vector<64x8xf32>
    %37 = arith.mulf %34, %36 : vector<64x8xf32>
    %c0_44 = arith.constant 0 : index
    %c0_45 = arith.constant 0 : index
    %38 = vector.load %arg6[%c0_44, %c0_45] : memref<1x8xf32, #tpu.memory_space<vmem>>, vector<1x8xf32>
    %39 = vector.broadcast %38 : vector<1x8xf32> to vector<64x8xf32>
    %40 = arith.addf %37, %39 : vector<64x8xf32>
    %cst_46 = arith.constant 0.000000e+00 : f32
    %41 = vector.broadcast %cst_46 : f32 to vector<64x8xf32>
    %42 = arith.maximumf %40, %41 : vector<64x8xf32>
    %cst_47 = arith.constant 0.000000e+00 : f32
    %43 = vector.broadcast %cst_47 : f32 to vector<6x18x8xf32>
    %c0_48 = arith.constant 0 : index
    %c0_49 = arith.constant 0 : index
    %c0_50 = arith.constant 0 : index
    %44 = vector.load %arg32[%c0_48, %c0_49, %c0_50] : memref<6x18x8xf32, #tpu.memory_space<vmem>>, vector<6x18x8xf32>
    tpu.vector_store %arg32[%c0_48, %c0_49, %c0_50], %43 {strides = array<i32>} : memref<6x18x8xf32, #tpu.memory_space<vmem>>, vector<6x18x8xf32>,
    %45 = vector.shape_cast %42 : vector<64x8xf32> to vector<4x16x8xf32>
    %c1_51 = arith.constant 1 : index
    %c1_52 = arith.constant 1 : index
    %c0_53 = arith.constant 0 : index
    %46 = vector.load %arg32[%c1_51, %c1_52, %c0_53] : memref<6x18x8xf32, #tpu.memory_space<vmem>>, vector<4x16x8xf32>
    tpu.vector_store %arg32[%c1_51, %c1_52, %c0_53], %45 {strides = array<i32>} : memref<6x18x8xf32, #tpu.memory_space<vmem>>, vector<4x16x8xf32>,
    %c1_54 = arith.constant 1 : index
    %c1_55 = arith.constant 1 : index
    %c0_56 = arith.constant 0 : index
    %47 = vector.load %arg31[%c1_54, %c1_55, %c0_56] : memref<6x18x32xf32, #tpu.memory_space<vmem>>, vector<4x16x32xf32>
    %48 = vector.shape_cast %47 : vector<4x16x32xf32> to vector<64x32xf32>
    %49 = arith.truncf %48 : vector<64x32xf32> to vector<64x32xbf16>
    %c0_57 = arith.constant 0 : index
    %c0_58 = arith.constant 0 : index
    %50 = vector.load %arg10[%c0_57, %c0_58] : memref<32x8xbf16, #tpu.memory_space<vmem>>, vector<32x8xbf16>
    %cst_59 = arith.constant dense<0.000000e+00> : vector<64x8xf32>
    %51 = tpu.matmul %49, %50, %cst_59 {dimension_numbers = #tpu.dot_dimension_numbers<[1], [0], [0], [1], [0, 0, 1, 1], [], []>} : vector<64x32xbf16>, vector<32x8xbf16>, vector<64x8xf32> -> vector<64x8xf32>
    %c0_60 = arith.constant 0 : index
    %c0_61 = arith.constant 0 : index
    %52 = vector.load %arg11[%c0_60, %c0_61] : memref<1x8xf32, #tpu.memory_space<vmem>>, vector<1x8xf32>
    %53 = vector.broadcast %52 : vector<1x8xf32> to vector<64x8xf32>
    %54 = arith.mulf %51, %53 : vector<64x8xf32>
    %c0_62 = arith.constant 0 : index
    %c0_63 = arith.constant 0 : index
    %55 = vector.load %arg12[%c0_62, %c0_63] : memref<1x8xf32, #tpu.memory_space<vmem>>, vector<1x8xf32>
    %56 = vector.broadcast %55 : vector<1x8xf32> to vector<64x8xf32>
    %57 = arith.addf %54, %56 : vector<64x8xf32>
    %c0_64 = arith.constant 0 : index
    %c0_65 = arith.constant 0 : index
    %c0_66 = arith.constant 0 : index
    %58 = vector.load %arg32[%c0_64, %c0_65, %c0_66] : memref<6x18x8xf32, #tpu.memory_space<vmem>>, vector<4x16x8xf32>
    %59 = vector.shape_cast %58 : vector<4x16x8xf32> to vector<64x8xf32>
    %c0_67 = arith.constant 0 : index
    %c1_68 = arith.constant 1 : index
    %c0_69 = arith.constant 0 : index
    %60 = vector.load %arg32[%c0_67, %c1_68, %c0_69] : memref<6x18x8xf32, #tpu.memory_space<vmem>>, vector<4x16x8xf32>
    %61 = vector.shape_cast %60 : vector<4x16x8xf32> to vector<64x8xf32>
    %c0_70 = arith.constant 0 : index
    %c2_71 = arith.constant 2 : index
    %c0_72 = arith.constant 0 : index
    %62 = vector.load %arg32[%c0_70, %c2_71, %c0_72] : memref<6x18x8xf32, #tpu.memory_space<vmem>>, vector<4x16x8xf32>
    %63 = vector.shape_cast %62 : vector<4x16x8xf32> to vector<64x8xf32>
    %c1_73 = arith.constant 1 : index
    %c0_74 = arith.constant 0 : index
    %c0_75 = arith.constant 0 : index
    %64 = vector.load %arg32[%c1_73, %c0_74, %c0_75] : memref<6x18x8xf32, #tpu.memory_space<vmem>>, vector<4x16x8xf32>
    %65 = vector.shape_cast %64 : vector<4x16x8xf32> to vector<64x8xf32>
    %c1_76 = arith.constant 1 : index
    %c1_77 = arith.constant 1 : index
    %c0_78 = arith.constant 0 : index
    %66 = vector.load %arg32[%c1_76, %c1_77, %c0_78] : memref<6x18x8xf32, #tpu.memory_space<vmem>>, vector<4x16x8xf32>
    %67 = vector.shape_cast %66 : vector<4x16x8xf32> to vector<64x8xf32>
    %c1_79 = arith.constant 1 : index
    %c2_80 = arith.constant 2 : index
    %c0_81 = arith.constant 0 : index
    %68 = vector.load %arg32[%c1_79, %c2_80, %c0_81] : memref<6x18x8xf32, #tpu.memory_space<vmem>>, vector<4x16x8xf32>
    %69 = vector.shape_cast %68 : vector<4x16x8xf32> to vector<64x8xf32>
    %c2_82 = arith.constant 2 : index
    %c0_83 = arith.constant 0 : index
    %c0_84 = arith.constant 0 : index
    %70 = vector.load %arg32[%c2_82, %c0_83, %c0_84] : memref<6x18x8xf32, #tpu.memory_space<vmem>>, vector<4x16x8xf32>
    %71 = vector.shape_cast %70 : vector<4x16x8xf32> to vector<64x8xf32>
    %c2_85 = arith.constant 2 : index
    %c1_86 = arith.constant 1 : index
    %c0_87 = arith.constant 0 : index
    %72 = vector.load %arg32[%c2_85, %c1_86, %c0_87] : memref<6x18x8xf32, #tpu.memory_space<vmem>>, vector<4x16x8xf32>
    %73 = vector.shape_cast %72 : vector<4x16x8xf32> to vector<64x8xf32>
    %c2_88 = arith.constant 2 : index
    %c2_89 = arith.constant 2 : index
    %c0_90 = arith.constant 0 : index
    %74 = vector.load %arg32[%c2_88, %c2_89, %c0_90] : memref<6x18x8xf32, #tpu.memory_space<vmem>>, vector<4x16x8xf32>
    %75 = vector.shape_cast %74 : vector<4x16x8xf32> to vector<64x8xf32>
    %76 = tpu.concatenate %59, %61, %63, %65, %67, %69, %71, %73, %75 in 1 : vector<64x8xf32>, vector<64x8xf32>, vector<64x8xf32>, vector<64x8xf32>, vector<64x8xf32>, vector<64x8xf32>, vector<64x8xf32>, vector<64x8xf32>, vector<64x8xf32> -> vector<64x72xf32>
    %77 = arith.truncf %76 : vector<64x72xf32> to vector<64x72xbf16>
    %c0_91 = arith.constant 0 : index
    %c0_92 = arith.constant 0 : index
    %78 = vector.load %arg7[%c0_91, %c0_92] : memref<72x8xbf16, #tpu.memory_space<vmem>>, vector<72x8xbf16>
    %cst_93 = arith.constant dense<0.000000e+00> : vector<64x8xf32>
    %79 = tpu.matmul %77, %78, %cst_93 {dimension_numbers = #tpu.dot_dimension_numbers<[1], [0], [0], [1], [0, 0, 1, 1], [], []>} : vector<64x72xbf16>, vector<72x8xbf16>, vector<64x8xf32> -> vector<64x8xf32>
    %c0_94 = arith.constant 0 : index
    %c0_95 = arith.constant 0 : index
    %80 = vector.load %arg8[%c0_94, %c0_95] : memref<1x8xf32, #tpu.memory_space<vmem>>, vector<1x8xf32>
    %81 = vector.broadcast %80 : vector<1x8xf32> to vector<64x8xf32>
    %82 = arith.mulf %79, %81 : vector<64x8xf32>
    %c0_96 = arith.constant 0 : index
    %c0_97 = arith.constant 0 : index
    %83 = vector.load %arg9[%c0_96, %c0_97] : memref<1x8xf32, #tpu.memory_space<vmem>>, vector<1x8xf32>
    %84 = vector.broadcast %83 : vector<1x8xf32> to vector<64x8xf32>
    %85 = arith.addf %82, %84 : vector<64x8xf32>
    %86 = arith.addf %85, %57 : vector<64x8xf32>
    %cst_98 = arith.constant 0.000000e+00 : f32
    %87 = vector.broadcast %cst_98 : f32 to vector<64x8xf32>
    %88 = arith.maximumf %86, %87 : vector<64x8xf32>
    %cst_99 = arith.constant 0.000000e+00 : f32
    %89 = vector.broadcast %cst_99 : f32 to vector<6x18x8xf32>
    %c0_100 = arith.constant 0 : index
    %c0_101 = arith.constant 0 : index
    %c0_102 = arith.constant 0 : index
    %90 = vector.load %arg33[%c0_100, %c0_101, %c0_102] : memref<6x18x8xf32, #tpu.memory_space<vmem>>, vector<6x18x8xf32>
    tpu.vector_store %arg33[%c0_100, %c0_101, %c0_102], %89 {strides = array<i32>} : memref<6x18x8xf32, #tpu.memory_space<vmem>>, vector<6x18x8xf32>,
    %91 = vector.shape_cast %88 : vector<64x8xf32> to vector<4x16x8xf32>
    %c1_103 = arith.constant 1 : index
    %c1_104 = arith.constant 1 : index
    %c0_105 = arith.constant 0 : index
    %92 = vector.load %arg33[%c1_103, %c1_104, %c0_105] : memref<6x18x8xf32, #tpu.memory_space<vmem>>, vector<4x16x8xf32>
    tpu.vector_store %arg33[%c1_103, %c1_104, %c0_105], %91 {strides = array<i32>} : memref<6x18x8xf32, #tpu.memory_space<vmem>>, vector<4x16x8xf32>,
    %c1_106 = arith.constant 1 : index
    %c1_107 = arith.constant 1 : index
    %c0_108 = arith.constant 0 : index
    %93 = vector.load %arg33[%c1_106, %c1_107, %c0_108] : memref<6x18x8xf32, #tpu.memory_space<vmem>>, vector<1x16x8xf32>
    %94 = vector.shape_cast %93 : vector<1x16x8xf32> to vector<16x8xf32>
    %c2_109 = arith.constant 2 : index
    %c1_110 = arith.constant 1 : index
    %c0_111 = arith.constant 0 : index
    %95 = vector.load %arg33[%c2_109, %c1_110, %c0_111] : memref<6x18x8xf32, #tpu.memory_space<vmem>>, vector<1x16x8xf32>
    %96 = vector.shape_cast %95 : vector<1x16x8xf32> to vector<16x8xf32>
    %97 = arith.maximumf %94, %96 : vector<16x8xf32>
    %c0_112 = arith.constant 0 : index
    %c0_113 = arith.constant 0 : index
    %c0_114 = arith.constant 0 : index
    %98 = vector.load %arg34[%c0_112, %c0_113, %c0_114] : memref<2x16x8xf32, #tpu.memory_space<vmem>>, vector<1x16x8xf32>
    %99 = vector.shape_cast %98 : vector<1x16x8xf32> to vector<16x8xf32>
    %100 = vector.shape_cast %97 : vector<16x8xf32> to vector<1x16x8xf32>
    tpu.vector_store %arg34[%c0_112, %c0_113, %c0_114], %100 {strides = array<i32>} : memref<2x16x8xf32, #tpu.memory_space<vmem>>, vector<1x16x8xf32>,
    %c3 = arith.constant 3 : index
    %c1_115 = arith.constant 1 : index
    %c0_116 = arith.constant 0 : index
    %101 = vector.load %arg33[%c3, %c1_115, %c0_116] : memref<6x18x8xf32, #tpu.memory_space<vmem>>, vector<1x16x8xf32>
    %102 = vector.shape_cast %101 : vector<1x16x8xf32> to vector<16x8xf32>
    %c4 = arith.constant 4 : index
    %c1_117 = arith.constant 1 : index
    %c0_118 = arith.constant 0 : index
    %103 = vector.load %arg33[%c4, %c1_117, %c0_118] : memref<6x18x8xf32, #tpu.memory_space<vmem>>, vector<1x16x8xf32>
    %104 = vector.shape_cast %103 : vector<1x16x8xf32> to vector<16x8xf32>
    %105 = arith.maximumf %102, %104 : vector<16x8xf32>
    %c1_119 = arith.constant 1 : index
    %c0_120 = arith.constant 0 : index
    %c0_121 = arith.constant 0 : index
    %106 = vector.load %arg34[%c1_119, %c0_120, %c0_121] : memref<2x16x8xf32, #tpu.memory_space<vmem>>, vector<1x16x8xf32>
    %107 = vector.shape_cast %106 : vector<1x16x8xf32> to vector<16x8xf32>
    %108 = vector.shape_cast %105 : vector<16x8xf32> to vector<1x16x8xf32>
    tpu.vector_store %arg34[%c1_119, %c0_120, %c0_121], %108 {strides = array<i32>} : memref<2x16x8xf32, #tpu.memory_space<vmem>>, vector<1x16x8xf32>,
    %c0_122 = arith.constant 0 : index
    %c0_123 = arith.constant 0 : index
    %c0_124 = arith.constant 0 : index
    %109 = tpu.strided_load %arg34[%c0_122, %c0_123, %c0_124] {strides = array<i32: 1, 2, 1>} : memref<2x16x8xf32, #tpu.memory_space<vmem>>, vector<2x8x8xf32>
    %c0_125 = arith.constant 0 : index
    %c1_126 = arith.constant 1 : index
    %c0_127 = arith.constant 0 : index
    %110 = tpu.strided_load %arg34[%c0_125, %c1_126, %c0_127] {strides = array<i32: 1, 2, 1>} : memref<2x16x8xf32, #tpu.memory_space<vmem>>, vector<2x8x8xf32>
    %111 = arith.maximumf %109, %110 : vector<2x8x8xf32>
    %cst_128 = arith.constant 0.000000e+00 : f32
    %112 = vector.broadcast %cst_128 : f32 to vector<4x10x8xf32>
    %c0_129 = arith.constant 0 : index
    %c0_130 = arith.constant 0 : index
    %c0_131 = arith.constant 0 : index
    %113 = vector.load %arg35[%c0_129, %c0_130, %c0_131] : memref<4x10x8xf32, #tpu.memory_space<vmem>>, vector<4x10x8xf32>
    tpu.vector_store %arg35[%c0_129, %c0_130, %c0_131], %112 {strides = array<i32>} : memref<4x10x8xf32, #tpu.memory_space<vmem>>, vector<4x10x8xf32>,
    %c1_132 = arith.constant 1 : index
    %c1_133 = arith.constant 1 : index
    %c0_134 = arith.constant 0 : index
    %114 = vector.load %arg35[%c1_132, %c1_133, %c0_134] : memref<4x10x8xf32, #tpu.memory_space<vmem>>, vector<2x8x8xf32>
    tpu.vector_store %arg35[%c1_132, %c1_133, %c0_134], %111 {strides = array<i32>} : memref<4x10x8xf32, #tpu.memory_space<vmem>>, vector<2x8x8xf32>,
    %c0_135 = arith.constant 0 : index
    %c0_136 = arith.constant 0 : index
    %c0_137 = arith.constant 0 : index
    %115 = vector.load %arg35[%c0_135, %c0_136, %c0_137] : memref<4x10x8xf32, #tpu.memory_space<vmem>>, vector<2x8x8xf32>
    %116 = vector.shape_cast %115 : vector<2x8x8xf32> to vector<16x8xf32>
    %c0_138 = arith.constant 0 : index
    %c1_139 = arith.constant 1 : index
    %c0_140 = arith.constant 0 : index
    %117 = vector.load %arg35[%c0_138, %c1_139, %c0_140] : memref<4x10x8xf32, #tpu.memory_space<vmem>>, vector<2x8x8xf32>
    %118 = vector.shape_cast %117 : vector<2x8x8xf32> to vector<16x8xf32>
    %c0_141 = arith.constant 0 : index
    %c2_142 = arith.constant 2 : index
    %c0_143 = arith.constant 0 : index
    %119 = vector.load %arg35[%c0_141, %c2_142, %c0_143] : memref<4x10x8xf32, #tpu.memory_space<vmem>>, vector<2x8x8xf32>
    %120 = vector.shape_cast %119 : vector<2x8x8xf32> to vector<16x8xf32>
    %c1_144 = arith.constant 1 : index
    %c0_145 = arith.constant 0 : index
    %c0_146 = arith.constant 0 : index
    %121 = vector.load %arg35[%c1_144, %c0_145, %c0_146] : memref<4x10x8xf32, #tpu.memory_space<vmem>>, vector<2x8x8xf32>
    %122 = vector.shape_cast %121 : vector<2x8x8xf32> to vector<16x8xf32>
    %c1_147 = arith.constant 1 : index
    %c1_148 = arith.constant 1 : index
    %c0_149 = arith.constant 0 : index
    %123 = vector.load %arg35[%c1_147, %c1_148, %c0_149] : memref<4x10x8xf32, #tpu.memory_space<vmem>>, vector<2x8x8xf32>
    %124 = vector.shape_cast %123 : vector<2x8x8xf32> to vector<16x8xf32>
    %c1_150 = arith.constant 1 : index
    %c2_151 = arith.constant 2 : index
    %c0_152 = arith.constant 0 : index
    %125 = vector.load %arg35[%c1_150, %c2_151, %c0_152] : memref<4x10x8xf32, #tpu.memory_space<vmem>>, vector<2x8x8xf32>
    %126 = vector.shape_cast %125 : vector<2x8x8xf32> to vector<16x8xf32>
    %c2_153 = arith.constant 2 : index
    %c0_154 = arith.constant 0 : index
    %c0_155 = arith.constant 0 : index
    %127 = vector.load %arg35[%c2_153, %c0_154, %c0_155] : memref<4x10x8xf32, #tpu.memory_space<vmem>>, vector<2x8x8xf32>
    %128 = vector.shape_cast %127 : vector<2x8x8xf32> to vector<16x8xf32>
    %c2_156 = arith.constant 2 : index
    %c1_157 = arith.constant 1 : index
    %c0_158 = arith.constant 0 : index
    %129 = vector.load %arg35[%c2_156, %c1_157, %c0_158] : memref<4x10x8xf32, #tpu.memory_space<vmem>>, vector<2x8x8xf32>
    %130 = vector.shape_cast %129 : vector<2x8x8xf32> to vector<16x8xf32>
    %c2_159 = arith.constant 2 : index
    %c2_160 = arith.constant 2 : index
    %c0_161 = arith.constant 0 : index
    %131 = vector.load %arg35[%c2_159, %c2_160, %c0_161] : memref<4x10x8xf32, #tpu.memory_space<vmem>>, vector<2x8x8xf32>
    %132 = vector.shape_cast %131 : vector<2x8x8xf32> to vector<16x8xf32>
    %133 = tpu.concatenate %116, %118, %120, %122, %124, %126, %128, %130, %132 in 1 : vector<16x8xf32>, vector<16x8xf32>, vector<16x8xf32>, vector<16x8xf32>, vector<16x8xf32>, vector<16x8xf32>, vector<16x8xf32>, vector<16x8xf32>, vector<16x8xf32> -> vector<16x72xf32>
    %134 = arith.truncf %133 : vector<16x72xf32> to vector<16x72xbf16>
    %c0_162 = arith.constant 0 : index
    %c0_163 = arith.constant 0 : index
    %135 = vector.load %arg13[%c0_162, %c0_163] : memref<72x16xbf16, #tpu.memory_space<vmem>>, vector<72x16xbf16>
    %cst_164 = arith.constant dense<0.000000e+00> : vector<16x16xf32>
    %136 = tpu.matmul %134, %135, %cst_164 {dimension_numbers = #tpu.dot_dimension_numbers<[1], [0], [0], [1], [0, 0, 1, 1], [], []>} : vector<16x72xbf16>, vector<72x16xbf16>, vector<16x16xf32> -> vector<16x16xf32>
    %c0_165 = arith.constant 0 : index
    %c0_166 = arith.constant 0 : index
    %137 = vector.load %arg14[%c0_165, %c0_166] : memref<1x16xf32, #tpu.memory_space<vmem>>, vector<1x16xf32>
    %138 = vector.broadcast %137 : vector<1x16xf32> to vector<16x16xf32>
    %139 = arith.mulf %136, %138 : vector<16x16xf32>
    %c0_167 = arith.constant 0 : index
    %c0_168 = arith.constant 0 : index
    %140 = vector.load %arg15[%c0_167, %c0_168] : memref<1x16xf32, #tpu.memory_space<vmem>>, vector<1x16xf32>
    %141 = vector.broadcast %140 : vector<1x16xf32> to vector<16x16xf32>
    %142 = arith.addf %139, %141 : vector<16x16xf32>
    %cst_169 = arith.constant 0.000000e+00 : f32
    %143 = vector.broadcast %cst_169 : f32 to vector<16x16xf32>
    %144 = arith.maximumf %142, %143 : vector<16x16xf32>
    %cst_170 = arith.constant 0.000000e+00 : f32
    %145 = vector.broadcast %cst_170 : f32 to vector<4x10x16xf32>
    %c0_171 = arith.constant 0 : index
    %c0_172 = arith.constant 0 : index
    %c0_173 = arith.constant 0 : index
    %146 = vector.load %arg36[%c0_171, %c0_172, %c0_173] : memref<4x10x16xf32, #tpu.memory_space<vmem>>, vector<4x10x16xf32>
    tpu.vector_store %arg36[%c0_171, %c0_172, %c0_173], %145 {strides = array<i32>} : memref<4x10x16xf32, #tpu.memory_space<vmem>>, vector<4x10x16xf32>,
    %147 = vector.shape_cast %144 : vector<16x16xf32> to vector<2x8x16xf32>
    %c1_174 = arith.constant 1 : index
    %c1_175 = arith.constant 1 : index
    %c0_176 = arith.constant 0 : index
    %148 = vector.load %arg36[%c1_174, %c1_175, %c0_176] : memref<4x10x16xf32, #tpu.memory_space<vmem>>, vector<2x8x16xf32>
    tpu.vector_store %arg36[%c1_174, %c1_175, %c0_176], %147 {strides = array<i32>} : memref<4x10x16xf32, #tpu.memory_space<vmem>>, vector<2x8x16xf32>,
    %c1_177 = arith.constant 1 : index
    %c1_178 = arith.constant 1 : index
    %c0_179 = arith.constant 0 : index
    %149 = vector.load %arg35[%c1_177, %c1_178, %c0_179] : memref<4x10x8xf32, #tpu.memory_space<vmem>>, vector<2x8x8xf32>
    %150 = vector.shape_cast %149 : vector<2x8x8xf32> to vector<16x8xf32>
    %151 = arith.truncf %150 : vector<16x8xf32> to vector<16x8xbf16>
    %c0_180 = arith.constant 0 : index
    %c0_181 = arith.constant 0 : index
    %152 = vector.load %arg19[%c0_180, %c0_181] : memref<8x16xbf16, #tpu.memory_space<vmem>>, vector<8x16xbf16>
    %cst_182 = arith.constant dense<0.000000e+00> : vector<16x16xf32>
    %153 = tpu.matmul %151, %152, %cst_182 {dimension_numbers = #tpu.dot_dimension_numbers<[1], [0], [0], [1], [0, 0, 1, 1], [], []>} : vector<16x8xbf16>, vector<8x16xbf16>, vector<16x16xf32> -> vector<16x16xf32>
    %c0_183 = arith.constant 0 : index
    %c0_184 = arith.constant 0 : index
    %154 = vector.load %arg20[%c0_183, %c0_184] : memref<1x16xf32, #tpu.memory_space<vmem>>, vector<1x16xf32>
    %155 = vector.broadcast %154 : vector<1x16xf32> to vector<16x16xf32>
    %156 = arith.mulf %153, %155 : vector<16x16xf32>
    %c0_185 = arith.constant 0 : index
    %c0_186 = arith.constant 0 : index
    %157 = vector.load %arg21[%c0_185, %c0_186] : memref<1x16xf32, #tpu.memory_space<vmem>>, vector<1x16xf32>
    %158 = vector.broadcast %157 : vector<1x16xf32> to vector<16x16xf32>
    %159 = arith.addf %156, %158 : vector<16x16xf32>
    %c0_187 = arith.constant 0 : index
    %c0_188 = arith.constant 0 : index
    %c0_189 = arith.constant 0 : index
    %160 = vector.load %arg36[%c0_187, %c0_188, %c0_189] : memref<4x10x16xf32, #tpu.memory_space<vmem>>, vector<2x8x16xf32>
    %161 = vector.shape_cast %160 : vector<2x8x16xf32> to vector<16x16xf32>
    %c0_190 = arith.constant 0 : index
    %c1_191 = arith.constant 1 : index
    %c0_192 = arith.constant 0 : index
    %162 = vector.load %arg36[%c0_190, %c1_191, %c0_192] : memref<4x10x16xf32, #tpu.memory_space<vmem>>, vector<2x8x16xf32>
    %163 = vector.shape_cast %162 : vector<2x8x16xf32> to vector<16x16xf32>
    %c0_193 = arith.constant 0 : index
    %c2_194 = arith.constant 2 : index
    %c0_195 = arith.constant 0 : index
    %164 = vector.load %arg36[%c0_193, %c2_194, %c0_195] : memref<4x10x16xf32, #tpu.memory_space<vmem>>, vector<2x8x16xf32>
    %165 = vector.shape_cast %164 : vector<2x8x16xf32> to vector<16x16xf32>
    %c1_196 = arith.constant 1 : index
    %c0_197 = arith.constant 0 : index
    %c0_198 = arith.constant 0 : index
    %166 = vector.load %arg36[%c1_196, %c0_197, %c0_198] : memref<4x10x16xf32, #tpu.memory_space<vmem>>, vector<2x8x16xf32>
    %167 = vector.shape_cast %166 : vector<2x8x16xf32> to vector<16x16xf32>
    %c1_199 = arith.constant 1 : index
    %c1_200 = arith.constant 1 : index
    %c0_201 = arith.constant 0 : index
    %168 = vector.load %arg36[%c1_199, %c1_200, %c0_201] : memref<4x10x16xf32, #tpu.memory_space<vmem>>, vector<2x8x16xf32>
    %169 = vector.shape_cast %168 : vector<2x8x16xf32> to vector<16x16xf32>
    %c1_202 = arith.constant 1 : index
    %c2_203 = arith.constant 2 : index
    %c0_204 = arith.constant 0 : index
    %170 = vector.load %arg36[%c1_202, %c2_203, %c0_204] : memref<4x10x16xf32, #tpu.memory_space<vmem>>, vector<2x8x16xf32>
    %171 = vector.shape_cast %170 : vector<2x8x16xf32> to vector<16x16xf32>
    %c2_205 = arith.constant 2 : index
    %c0_206 = arith.constant 0 : index
    %c0_207 = arith.constant 0 : index
    %172 = vector.load %arg36[%c2_205, %c0_206, %c0_207] : memref<4x10x16xf32, #tpu.memory_space<vmem>>, vector<2x8x16xf32>
    %173 = vector.shape_cast %172 : vector<2x8x16xf32> to vector<16x16xf32>
    %c2_208 = arith.constant 2 : index
    %c1_209 = arith.constant 1 : index
    %c0_210 = arith.constant 0 : index
    %174 = vector.load %arg36[%c2_208, %c1_209, %c0_210] : memref<4x10x16xf32, #tpu.memory_space<vmem>>, vector<2x8x16xf32>
    %175 = vector.shape_cast %174 : vector<2x8x16xf32> to vector<16x16xf32>
    %c2_211 = arith.constant 2 : index
    %c2_212 = arith.constant 2 : index
    %c0_213 = arith.constant 0 : index
    %176 = vector.load %arg36[%c2_211, %c2_212, %c0_213] : memref<4x10x16xf32, #tpu.memory_space<vmem>>, vector<2x8x16xf32>
    %177 = vector.shape_cast %176 : vector<2x8x16xf32> to vector<16x16xf32>
    %178 = tpu.concatenate %161, %163, %165, %167, %169, %171, %173, %175, %177 in 1 : vector<16x16xf32>, vector<16x16xf32>, vector<16x16xf32>, vector<16x16xf32>, vector<16x16xf32>, vector<16x16xf32>, vector<16x16xf32>, vector<16x16xf32>, vector<16x16xf32> -> vector<16x144xf32>
    %179 = arith.truncf %178 : vector<16x144xf32> to vector<16x144xbf16>
    %c0_214 = arith.constant 0 : index
    %c0_215 = arith.constant 0 : index
    %180 = vector.load %arg16[%c0_214, %c0_215] : memref<144x16xbf16, #tpu.memory_space<vmem>>, vector<144x16xbf16>
    %cst_216 = arith.constant dense<0.000000e+00> : vector<16x16xf32>
    %181 = tpu.matmul %179, %180, %cst_216 {dimension_numbers = #tpu.dot_dimension_numbers<[1], [0], [0], [1], [0, 0, 1, 1], [], []>} : vector<16x144xbf16>, vector<144x16xbf16>, vector<16x16xf32> -> vector<16x16xf32>
    %c0_217 = arith.constant 0 : index
    %c0_218 = arith.constant 0 : index
    %182 = vector.load %arg17[%c0_217, %c0_218] : memref<1x16xf32, #tpu.memory_space<vmem>>, vector<1x16xf32>
    %183 = vector.broadcast %182 : vector<1x16xf32> to vector<16x16xf32>
    %184 = arith.mulf %181, %183 : vector<16x16xf32>
    %c0_219 = arith.constant 0 : index
    %c0_220 = arith.constant 0 : index
    %185 = vector.load %arg18[%c0_219, %c0_220] : memref<1x16xf32, #tpu.memory_space<vmem>>, vector<1x16xf32>
    %186 = vector.broadcast %185 : vector<1x16xf32> to vector<16x16xf32>
    %187 = arith.addf %184, %186 : vector<16x16xf32>
    %188 = arith.addf %187, %159 : vector<16x16xf32>
    %cst_221 = arith.constant 0.000000e+00 : f32
    %189 = vector.broadcast %cst_221 : f32 to vector<16x16xf32>
    %190 = arith.maximumf %188, %189 : vector<16x16xf32>
    %cst_222 = arith.constant 0.000000e+00 : f32
    %191 = vector.broadcast %cst_222 : f32 to vector<4x10x16xf32>
    %c0_223 = arith.constant 0 : index
    %c0_224 = arith.constant 0 : index
    %c0_225 = arith.constant 0 : index
    %192 = vector.load %arg37[%c0_223, %c0_224, %c0_225] : memref<4x10x16xf32, #tpu.memory_space<vmem>>, vector<4x10x16xf32>
    tpu.vector_store %arg37[%c0_223, %c0_224, %c0_225], %191 {strides = array<i32>} : memref<4x10x16xf32, #tpu.memory_space<vmem>>, vector<4x10x16xf32>,
    %193 = vector.shape_cast %190 : vector<16x16xf32> to vector<2x8x16xf32>
    %c1_226 = arith.constant 1 : index
    %c1_227 = arith.constant 1 : index
    %c0_228 = arith.constant 0 : index
    %194 = vector.load %arg37[%c1_226, %c1_227, %c0_228] : memref<4x10x16xf32, #tpu.memory_space<vmem>>, vector<2x8x16xf32>
    tpu.vector_store %arg37[%c1_226, %c1_227, %c0_228], %193 {strides = array<i32>} : memref<4x10x16xf32, #tpu.memory_space<vmem>>, vector<2x8x16xf32>,
    %c1_229 = arith.constant 1 : index
    %c1_230 = arith.constant 1 : index
    %c0_231 = arith.constant 0 : index
    %195 = vector.load %arg37[%c1_229, %c1_230, %c0_231] : memref<4x10x16xf32, #tpu.memory_space<vmem>>, vector<1x8x16xf32>
    %196 = vector.shape_cast %195 : vector<1x8x16xf32> to vector<8x16xf32>
    %c2_232 = arith.constant 2 : index
    %c1_233 = arith.constant 1 : index
    %c0_234 = arith.constant 0 : index
    %197 = vector.load %arg37[%c2_232, %c1_233, %c0_234] : memref<4x10x16xf32, #tpu.memory_space<vmem>>, vector<1x8x16xf32>
    %198 = vector.shape_cast %197 : vector<1x8x16xf32> to vector<8x16xf32>
    %199 = arith.maximumf %196, %198 : vector<8x16xf32>
    %cst_235 = arith.constant 0xFF800000 : f32
    %200 = vector.broadcast %cst_235 : f32 to vector<1x16xf32>
    %201 = vector.extract_strided_slice %199 {offsets = [0, 0], sizes = [7, 16], strides = [1, 1]} : vector<8x16xf32> to vector<7x16xf32>
    %202 = tpu.concatenate %200, %201 in 0 : vector<1x16xf32>, vector<7x16xf32> -> vector<8x16xf32>
    %203 = vector.extract_strided_slice %199 {offsets = [1, 0], sizes = [7, 16], strides = [1, 1]} : vector<8x16xf32> to vector<7x16xf32>
    %204 = tpu.concatenate %203, %200 in 0 : vector<7x16xf32>, vector<1x16xf32> -> vector<8x16xf32>
    %205 = arith.maximumf %202, %204 : vector<8x16xf32>
    %206 = arith.maximumf %199, %205 : vector<8x16xf32>
    %cst_236 = arith.constant 0.000000e+00 : f32
    %207 = vector.broadcast %cst_236 : f32 to vector<12x16xf32>
    %c0_237 = arith.constant 0 : index
    %c0_238 = arith.constant 0 : index
    %208 = vector.load %arg38[%c0_237, %c0_238] : memref<12x16xf32, #tpu.memory_space<vmem>>, vector<12x16xf32>
    tpu.vector_store %arg38[%c0_237, %c0_238], %207 {strides = array<i32>} : memref<12x16xf32, #tpu.memory_space<vmem>>, vector<12x16xf32>,
    %c2_239 = arith.constant 2 : index
    %c0_240 = arith.constant 0 : index
    %209 = vector.load %arg38[%c2_239, %c0_240] : memref<12x16xf32, #tpu.memory_space<vmem>>, vector<8x16xf32>
    tpu.vector_store %arg38[%c2_239, %c0_240], %206 {strides = array<i32>} : memref<12x16xf32, #tpu.memory_space<vmem>>, vector<8x16xf32>,
    %c0_241 = arith.constant 0 : index
    %c0_242 = arith.constant 0 : index
    %210 = vector.load %arg38[%c0_241, %c0_242] : memref<12x16xf32, #tpu.memory_space<vmem>>, vector<8x16xf32>
    %c1_243 = arith.constant 1 : index
    %c0_244 = arith.constant 0 : index
    %211 = vector.load %arg38[%c1_243, %c0_244] : memref<12x16xf32, #tpu.memory_space<vmem>>, vector<8x16xf32>
    %c2_245 = arith.constant 2 : index
    %c0_246 = arith.constant 0 : index
    %212 = vector.load %arg38[%c2_245, %c0_246] : memref<12x16xf32, #tpu.memory_space<vmem>>, vector<8x16xf32>
    %c3_247 = arith.constant 3 : index
    %c0_248 = arith.constant 0 : index
    %213 = vector.load %arg38[%c3_247, %c0_248] : memref<12x16xf32, #tpu.memory_space<vmem>>, vector<8x16xf32>
    %c4_249 = arith.constant 4 : index
    %c0_250 = arith.constant 0 : index
    %214 = vector.load %arg38[%c4_249, %c0_250] : memref<12x16xf32, #tpu.memory_space<vmem>>, vector<8x16xf32>
    %215 = tpu.concatenate %210, %211, %212, %213, %214 in 1 : vector<8x16xf32>, vector<8x16xf32>, vector<8x16xf32>, vector<8x16xf32>, vector<8x16xf32> -> vector<8x80xf32>
    %216 = arith.truncf %215 : vector<8x80xf32> to vector<8x80xbf16>
    %c0_251 = arith.constant 0 : index
    %c0_252 = arith.constant 0 : index
    %217 = vector.load %arg22[%c0_251, %c0_252] : memref<80x32xbf16, #tpu.memory_space<vmem>>, vector<80x32xbf16>
    %cst_253 = arith.constant dense<0.000000e+00> : vector<8x32xf32>
    %218 = tpu.matmul %216, %217, %cst_253 {dimension_numbers = #tpu.dot_dimension_numbers<[1], [0], [0], [1], [0, 0, 1, 1], [], []>} : vector<8x80xbf16>, vector<80x32xbf16>, vector<8x32xf32> -> vector<8x32xf32>
    %c0_254 = arith.constant 0 : index
    %c0_255 = arith.constant 0 : index
    %219 = vector.load %arg23[%c0_254, %c0_255] : memref<1x32xf32, #tpu.memory_space<vmem>>, vector<1x32xf32>
    %220 = vector.broadcast %219 : vector<1x32xf32> to vector<8x32xf32>
    %221 = arith.mulf %218, %220 : vector<8x32xf32>
    %c0_256 = arith.constant 0 : index
    %c0_257 = arith.constant 0 : index
    %222 = vector.load %arg24[%c0_256, %c0_257] : memref<1x32xf32, #tpu.memory_space<vmem>>, vector<1x32xf32>
    %223 = vector.broadcast %222 : vector<1x32xf32> to vector<8x32xf32>
    %224 = arith.addf %221, %223 : vector<8x32xf32>
    %cst_258 = arith.constant 0.000000e+00 : f32
    %225 = vector.broadcast %cst_258 : f32 to vector<8x32xf32>
    %226 = arith.maximumf %224, %225 : vector<8x32xf32>
    %cst_259 = arith.constant 0.000000e+00 : f32
    %227 = vector.broadcast %cst_259 : f32 to vector<12x32xf32>
    %c0_260 = arith.constant 0 : index
    %c0_261 = arith.constant 0 : index
    %228 = vector.load %arg39[%c0_260, %c0_261] : memref<12x32xf32, #tpu.memory_space<vmem>>, vector<12x32xf32>
    tpu.vector_store %arg39[%c0_260, %c0_261], %227 {strides = array<i32>} : memref<12x32xf32, #tpu.memory_space<vmem>>, vector<12x32xf32>,
    %c2_262 = arith.constant 2 : index
    %c0_263 = arith.constant 0 : index
    %229 = vector.load %arg39[%c2_262, %c0_263] : memref<12x32xf32, #tpu.memory_space<vmem>>, vector<8x32xf32>
    tpu.vector_store %arg39[%c2_262, %c0_263], %226 {strides = array<i32>} : memref<12x32xf32, #tpu.memory_space<vmem>>, vector<8x32xf32>,
    %c0_264 = arith.constant 0 : index
    %c0_265 = arith.constant 0 : index
    %230 = vector.load %arg39[%c0_264, %c0_265] : memref<12x32xf32, #tpu.memory_space<vmem>>, vector<8x32xf32>
    %c1_266 = arith.constant 1 : index
    %c0_267 = arith.constant 0 : index
    %231 = vector.load %arg39[%c1_266, %c0_267] : memref<12x32xf32, #tpu.memory_space<vmem>>, vector<8x32xf32>
    %c2_268 = arith.constant 2 : index
    %c0_269 = arith.constant 0 : index
    %232 = vector.load %arg39[%c2_268, %c0_269] : memref<12x32xf32, #tpu.memory_space<vmem>>, vector<8x32xf32>
    %c3_270 = arith.constant 3 : index
    %c0_271 = arith.constant 0 : index
    %233 = vector.load %arg39[%c3_270, %c0_271] : memref<12x32xf32, #tpu.memory_space<vmem>>, vector<8x32xf32>
    %c4_272 = arith.constant 4 : index
    %c0_273 = arith.constant 0 : index
    %234 = vector.load %arg39[%c4_272, %c0_273] : memref<12x32xf32, #tpu.memory_space<vmem>>, vector<8x32xf32>
    %235 = tpu.concatenate %230, %231, %232, %233, %234 in 1 : vector<8x32xf32>, vector<8x32xf32>, vector<8x32xf32>, vector<8x32xf32>, vector<8x32xf32> -> vector<8x160xf32>
    %236 = arith.truncf %235 : vector<8x160xf32> to vector<8x160xbf16>
    %c0_274 = arith.constant 0 : index
    %c0_275 = arith.constant 0 : index
    %237 = vector.load %arg25[%c0_274, %c0_275] : memref<160x32xbf16, #tpu.memory_space<vmem>>, vector<160x32xbf16>
    %cst_276 = arith.constant dense<0.000000e+00> : vector<8x32xf32>
    %238 = tpu.matmul %236, %237, %cst_276 {dimension_numbers = #tpu.dot_dimension_numbers<[1], [0], [0], [1], [0, 0, 1, 1], [], []>} : vector<8x160xbf16>, vector<160x32xbf16>, vector<8x32xf32> -> vector<8x32xf32>
    %c0_277 = arith.constant 0 : index
    %c0_278 = arith.constant 0 : index
    %239 = vector.load %arg26[%c0_277, %c0_278] : memref<1x32xf32, #tpu.memory_space<vmem>>, vector<1x32xf32>
    %240 = vector.broadcast %239 : vector<1x32xf32> to vector<8x32xf32>
    %241 = arith.mulf %238, %240 : vector<8x32xf32>
    %c0_279 = arith.constant 0 : index
    %c0_280 = arith.constant 0 : index
    %242 = vector.load %arg27[%c0_279, %c0_280] : memref<1x32xf32, #tpu.memory_space<vmem>>, vector<1x32xf32>
    %243 = vector.broadcast %242 : vector<1x32xf32> to vector<8x32xf32>
    %244 = arith.addf %241, %243 : vector<8x32xf32>
    %cst_281 = arith.constant 0.000000e+00 : f32
    %245 = vector.broadcast %cst_281 : f32 to vector<8x32xf32>
    %246 = arith.maximumf %244, %245 : vector<8x32xf32>
    %cst_282 = arith.constant 0.000000e+00 : f32
    %247 = vector.broadcast %cst_282 : f32 to vector<12x32xf32>
    %c0_283 = arith.constant 0 : index
    %c0_284 = arith.constant 0 : index
    %248 = vector.load %arg40[%c0_283, %c0_284] : memref<12x32xf32, #tpu.memory_space<vmem>>, vector<12x32xf32>
    tpu.vector_store %arg40[%c0_283, %c0_284], %247 {strides = array<i32>} : memref<12x32xf32, #tpu.memory_space<vmem>>, vector<12x32xf32>,
    %c2_285 = arith.constant 2 : index
    %c0_286 = arith.constant 0 : index
    %249 = vector.load %arg40[%c2_285, %c0_286] : memref<12x32xf32, #tpu.memory_space<vmem>>, vector<8x32xf32>
    tpu.vector_store %arg40[%c2_285, %c0_286], %246 {strides = array<i32>} : memref<12x32xf32, #tpu.memory_space<vmem>>, vector<8x32xf32>,
    %c0_287 = arith.constant 0 : index
    %c0_288 = arith.constant 0 : index
    %250 = vector.load %arg40[%c0_287, %c0_288] : memref<12x32xf32, #tpu.memory_space<vmem>>, vector<8x32xf32>
    %c1_289 = arith.constant 1 : index
    %c0_290 = arith.constant 0 : index
    %251 = vector.load %arg40[%c1_289, %c0_290] : memref<12x32xf32, #tpu.memory_space<vmem>>, vector<8x32xf32>
    %c2_291 = arith.constant 2 : index
    %c0_292 = arith.constant 0 : index
    %252 = vector.load %arg40[%c2_291, %c0_292] : memref<12x32xf32, #tpu.memory_space<vmem>>, vector<8x32xf32>
    %c3_293 = arith.constant 3 : index
    %c0_294 = arith.constant 0 : index
    %253 = vector.load %arg40[%c3_293, %c0_294] : memref<12x32xf32, #tpu.memory_space<vmem>>, vector<8x32xf32>
    %c4_295 = arith.constant 4 : index
    %c0_296 = arith.constant 0 : index
    %254 = vector.load %arg40[%c4_295, %c0_296] : memref<12x32xf32, #tpu.memory_space<vmem>>, vector<8x32xf32>
    %255 = tpu.concatenate %250, %251, %252, %253, %254 in 1 : vector<8x32xf32>, vector<8x32xf32>, vector<8x32xf32>, vector<8x32xf32>, vector<8x32xf32> -> vector<8x160xf32>
    %256 = arith.truncf %255 : vector<8x160xf32> to vector<8x160xbf16>
    %c0_297 = arith.constant 0 : index
    %c0_298 = arith.constant 0 : index
    %257 = vector.load %arg28[%c0_297, %c0_298] : memref<160x128xbf16, #tpu.memory_space<vmem>>, vector<160x128xbf16>
    %cst_299 = arith.constant dense<0.000000e+00> : vector<8x128xf32>
    %258 = tpu.matmul %256, %257, %cst_299 {dimension_numbers = #tpu.dot_dimension_numbers<[1], [0], [0], [1], [0, 0, 1, 1], [], []>} : vector<8x160xbf16>, vector<160x128xbf16>, vector<8x128xf32> -> vector<8x128xf32>
    %c0_300 = arith.constant 0 : index
    %c0_301 = arith.constant 0 : index
    %259 = vector.load %arg29[%c0_300, %c0_301] : memref<1x128xf32, #tpu.memory_space<vmem>>, vector<1x128xf32>
    %260 = vector.broadcast %259 : vector<1x128xf32> to vector<8x128xf32>
    %261 = arith.addf %258, %260 : vector<8x128xf32>
    %c0_302 = arith.constant 0 : index
    %c0_303 = arith.constant 0 : index
    %c0_304 = arith.constant 0 : index
    %262 = vector.load %arg30[%c0_302, %c0_303, %c0_304] : memref<1x8x128xf32, #tpu.memory_space<vmem>>, vector<1x8x128xf32>
    %263 = vector.shape_cast %262 : vector<1x8x128xf32> to vector<8x128xf32>
    %264 = vector.shape_cast %261 : vector<8x128xf32> to vector<1x8x128xf32>
    tpu.vector_store %arg30[%c0_302, %c0_303, %c0_304], %264 {strides = array<i32>} : memref<1x8x128xf32, #tpu.memory_space<vmem>>, vector<1x8x128xf32>,
    return
  }
  func.func @transform_0(%arg0: i32) -> (i32, i32, i32) {
    %c0_i32 = arith.constant 0 : i32
    %c0_i32_0 = arith.constant 0 : i32
    %c0_i32_1 = arith.constant 0 : i32
    return %arg0, %c0_i32, %c0_i32_0 : i32, i32, i32
  }
  func.func @transform_1(%arg0: i32) -> (i32, i32) {
    %c0_i32 = arith.constant 0 : i32
    %c0_i32_0 = arith.constant 0 : i32
    %c0_i32_1 = arith.constant 0 : i32
    return %c0_i32, %c0_i32_0 : i32, i32
  }
  func.func @transform_2(%arg0: i32) -> (i32, i32) {
    %c0_i32 = arith.constant 0 : i32
    %c0_i32_0 = arith.constant 0 : i32
    %c0_i32_1 = arith.constant 0 : i32
    return %c0_i32, %c0_i32_0 : i32, i32
  }
  func.func @transform_3(%arg0: i32) -> (i32, i32) {
    %c0_i32 = arith.constant 0 : i32
    %c0_i32_0 = arith.constant 0 : i32
    %c0_i32_1 = arith.constant 0 : i32
    return %c0_i32, %c0_i32_0 : i32, i32
  }
  func.func @transform_4(%arg0: i32) -> (i32, i32) {
    %c0_i32 = arith.constant 0 : i32
    %c0_i32_0 = arith.constant 0 : i32
    %c0_i32_1 = arith.constant 0 : i32
    return %c0_i32, %c0_i32_0 : i32, i32
  }
  func.func @transform_5(%arg0: i32) -> (i32, i32) {
    %c0_i32 = arith.constant 0 : i32
    %c0_i32_0 = arith.constant 0 : i32
    %c0_i32_1 = arith.constant 0 : i32
    return %c0_i32, %c0_i32_0 : i32, i32
  }
  func.func @transform_6(%arg0: i32) -> (i32, i32) {
    %c0_i32 = arith.constant 0 : i32
    %c0_i32_0 = arith.constant 0 : i32
    %c0_i32_1 = arith.constant 0 : i32
    return %c0_i32, %c0_i32_0 : i32, i32
  }
  func.func @transform_7(%arg0: i32) -> (i32, i32) {
    %c0_i32 = arith.constant 0 : i32
    %c0_i32_0 = arith.constant 0 : i32
    %c0_i32_1 = arith.constant 0 : i32
    return %c0_i32, %c0_i32_0 : i32, i32
  }
  func.func @transform_8(%arg0: i32) -> (i32, i32) {
    %c0_i32 = arith.constant 0 : i32
    %c0_i32_0 = arith.constant 0 : i32
    %c0_i32_1 = arith.constant 0 : i32
    return %c0_i32, %c0_i32_0 : i32, i32
  }
  func.func @transform_9(%arg0: i32) -> (i32, i32) {
    %c0_i32 = arith.constant 0 : i32
    %c0_i32_0 = arith.constant 0 : i32
    %c0_i32_1 = arith.constant 0 : i32
    return %c0_i32, %c0_i32_0 : i32, i32
  }
  func.func @transform_10(%arg0: i32) -> (i32, i32) {
    %c0_i32 = arith.constant 0 : i32
    %c0_i32_0 = arith.constant 0 : i32
    %c0_i32_1 = arith.constant 0 : i32
    return %c0_i32, %c0_i32_0 : i32, i32
  }
  func.func @transform_11(%arg0: i32) -> (i32, i32) {
    %c0_i32 = arith.constant 0 : i32
    %c0_i32_0 = arith.constant 0 : i32
    %c0_i32_1 = arith.constant 0 : i32
    return %c0_i32, %c0_i32_0 : i32, i32
  }
  func.func @transform_12(%arg0: i32) -> (i32, i32) {
    %c0_i32 = arith.constant 0 : i32
    %c0_i32_0 = arith.constant 0 : i32
    %c0_i32_1 = arith.constant 0 : i32
    return %c0_i32, %c0_i32_0 : i32, i32
  }
  func.func @transform_13(%arg0: i32) -> (i32, i32) {
    %c0_i32 = arith.constant 0 : i32
    %c0_i32_0 = arith.constant 0 : i32
    %c0_i32_1 = arith.constant 0 : i32
    return %c0_i32, %c0_i32_0 : i32, i32
  }
  func.func @transform_14(%arg0: i32) -> (i32, i32) {
    %c0_i32 = arith.constant 0 : i32
    %c0_i32_0 = arith.constant 0 : i32
    %c0_i32_1 = arith.constant 0 : i32
    return %c0_i32, %c0_i32_0 : i32, i32
  }
  func.func @transform_15(%arg0: i32) -> (i32, i32) {
    %c0_i32 = arith.constant 0 : i32
    %c0_i32_0 = arith.constant 0 : i32
    %c0_i32_1 = arith.constant 0 : i32
    return %c0_i32, %c0_i32_0 : i32, i32
  }
  func.func @transform_16(%arg0: i32) -> (i32, i32) {
    %c0_i32 = arith.constant 0 : i32
    %c0_i32_0 = arith.constant 0 : i32
    %c0_i32_1 = arith.constant 0 : i32
    return %c0_i32, %c0_i32_0 : i32, i32
  }
  func.func @transform_17(%arg0: i32) -> (i32, i32) {
    %c0_i32 = arith.constant 0 : i32
    %c0_i32_0 = arith.constant 0 : i32
    %c0_i32_1 = arith.constant 0 : i32
    return %c0_i32, %c0_i32_0 : i32, i32
  }
  func.func @transform_18(%arg0: i32) -> (i32, i32) {
    %c0_i32 = arith.constant 0 : i32
    %c0_i32_0 = arith.constant 0 : i32
    %c0_i32_1 = arith.constant 0 : i32
    return %c0_i32, %c0_i32_0 : i32, i32
  }
  func.func @transform_19(%arg0: i32) -> (i32, i32) {
    %c0_i32 = arith.constant 0 : i32
    %c0_i32_0 = arith.constant 0 : i32
    %c0_i32_1 = arith.constant 0 : i32
    return %c0_i32, %c0_i32_0 : i32, i32
  }
  func.func @transform_20(%arg0: i32) -> (i32, i32) {
    %c0_i32 = arith.constant 0 : i32
    %c0_i32_0 = arith.constant 0 : i32
    %c0_i32_1 = arith.constant 0 : i32
    return %c0_i32, %c0_i32_0 : i32, i32
  }
  func.func @transform_21(%arg0: i32) -> (i32, i32) {
    %c0_i32 = arith.constant 0 : i32
    %c0_i32_0 = arith.constant 0 : i32
    %c0_i32_1 = arith.constant 0 : i32
    return %c0_i32, %c0_i32_0 : i32, i32
  }
  func.func @transform_22(%arg0: i32) -> (i32, i32) {
    %c0_i32 = arith.constant 0 : i32
    %c0_i32_0 = arith.constant 0 : i32
    %c0_i32_1 = arith.constant 0 : i32
    return %c0_i32, %c0_i32_0 : i32, i32
  }
  func.func @transform_23(%arg0: i32) -> (i32, i32) {
    %c0_i32 = arith.constant 0 : i32
    %c0_i32_0 = arith.constant 0 : i32
    %c0_i32_1 = arith.constant 0 : i32
    return %c0_i32, %c0_i32_0 : i32, i32
  }
  func.func @transform_24(%arg0: i32) -> (i32, i32) {
    %c0_i32 = arith.constant 0 : i32
    %c0_i32_0 = arith.constant 0 : i32
    %c0_i32_1 = arith.constant 0 : i32
    return %c0_i32, %c0_i32_0 : i32, i32
  }
  func.func @transform_25(%arg0: i32) -> (i32, i32) {
    %c0_i32 = arith.constant 0 : i32
    %c0_i32_0 = arith.constant 0 : i32
    %c0_i32_1 = arith.constant 0 : i32
    return %c0_i32, %c0_i32_0 : i32, i32
  }
  func.func @transform_26(%arg0: i32) -> (i32, i32) {
    %c0_i32 = arith.constant 0 : i32
    %c0_i32_0 = arith.constant 0 : i32
    %c0_i32_1 = arith.constant 0 : i32
    return %c0_i32, %c0_i32_0 : i32, i32
  }
  func.func @transform_27(%arg0: i32) -> (i32, i32) {
    %c0_i32 = arith.constant 0 : i32
    %c0_i32_0 = arith.constant 0 : i32
    %c0_i32_1 = arith.constant 0 : i32
    return %c0_i32, %c0_i32_0 : i32, i32
  }
  func.func @transform_28(%arg0: i32) -> (i32, i32) {
    %c0_i32 = arith.constant 0 : i32
    %c0_i32_0 = arith.constant 0 : i32
    %c0_i32_1 = arith.constant 0 : i32
    return %c0_i32, %c0_i32_0 : i32, i32
  }
  func.func @transform_29(%arg0: i32) -> (i32, i32, i32) {
    %c0_i32 = arith.constant 0 : i32
    %c0_i32_0 = arith.constant 0 : i32
    %c0_i32_1 = arith.constant 0 : i32
    return %arg0, %c0_i32, %c0_i32_0 : i32, i32, i32
  }
}

</mosaic_0001>

<bundles_post_ra>
// kernel: pallas_forward.1
= control target key start
LH: loop header
LB: loop body
LE: loop exit
PB: predicated region body
PF: predicated region fallthrough
CT: control target
= control target key end

     0   :  { %s4393_s6 = smov 1   ;;  %s4394_s10 = smov 2   ;;  %s5362_s0 = inlined_call_operand.smem [shape: u32[30], index: -1, kind: input, shape index: {}] }
   0x1   :  { %s4444_s5 = sld [smem:[%s5362_s0]]   ;;  %s4395_s14 = smov 3  }
   0x2   :  { %s4449_s9 = sld [smem:[%s5362_s0 + %s4393_s6]]   ;;  %s4396_s18 = smov 4  }
   0x3   :  { %s4454_s13 = sld [smem:[%s5362_s0 + %s4394_s10]]   ;;  %s4397_s22 = smov 5  }
   0x4   :  { %s4459_s17 = sld [smem:[%s5362_s0 + %s4395_s14]]   ;;  %s4398_s26 = smov 6  }
   0x5   :  { %s4464_s21 = sld [smem:[%s5362_s0 + %s4396_s18]]   ;;  %s4399_s30 = smov 7  }
   0x6   :  { %s4469_s25 = sld [smem:[%s5362_s0 + %s4397_s22]]   ;;  %s4400_s4 = smov 8  }
   0x7   :  { %s4474_s29 = sld [smem:[%s5362_s0 + %s4398_s26]]   ;;  %s4401_s10 = smov 9  }
   0x8   :  { %s4479_s3 = sld [smem:[%s5362_s0 + %s4399_s30]]   ;;  %s4402_s15 = smov 10  }
   0x9   :  { %s4484_s8 = sld [smem:[%s5362_s0 + %s4400_s4]]   ;;  %s4403_s20 = smov 11  }
   0xa   :  { %s4489_s14 = sld [smem:[%s5362_s0 + %s4401_s10]]   ;;  %s4404_s26 = smov 12  }
   0xb   :  { %s4494_s19 = sld [smem:[%s5362_s0 + %s4402_s15]]   ;;  %s4405_s1 = smov 13  }
   0xc   :  { %s4499_s24 = sld [smem:[%s5362_s0 + %s4403_s20]]   ;;  %s4406_s7 = smov 14  }
   0xd   :  { %s4504_s30 = sld [smem:[%s5362_s0 + %s4404_s26]]   ;;  %s4407_s15 = smov 15  }
   0xe   :  { %s4509_s6 = sld [smem:[%s5362_s0 + %s4405_s1]]   ;;  %s4408_s22 = smov 16  }
   0xf   :  { %s4514_s12 = sld [smem:[%s5362_s0 + %s4406_s7]]   ;;  %s4409_s28 = smov 17  }
  0x10   :  { %s4519_s20 = sld [smem:[%s5362_s0 + %s4407_s15]]   ;;  %s4410_s7 = smov 18  }
  0x11   :  { %s4524_s27 = sld [smem:[%s5362_s0 + %s4408_s22]]   ;;  %s4411_s15 = smov 19  }
  0x12   :  { %s4529_s4 = sld [smem:[%s5362_s0 + %s4409_s28]]   ;;  %s4412_s22 = smov 20  }
  0x13   :  { %s4413_s28 = smov 21  }
  0x14   :  { %5366 = sst [smem:[#allocation12_spill]] %s4509_s6 }
  0x15   :  { %5367 = sst [smem:[#allocation13_spill]] %s4514_s12 }
  0x16   :  { %5368 = sst [smem:[#allocation14_spill]] %s4519_s20 }
  0x17   :  { %5369 = sst [smem:[#allocation15_spill]] %s4524_s27 }
  0x18   :  { %5370 = sst [smem:[#allocation16_spill]] %s4529_s4 }
  0x19   :  { %s4534_s12 = sld [smem:[%s5362_s0 + %s4410_s7]]   ;;  %s4414_s7 = smov 22  }
  0x1a   :  { %s4539_s6 = sld [smem:[%s5362_s0 + %s4411_s15]]   ;;  %s4415_s15 = smov 23  }
  0x1b   :  { %s4544_s27 = sld [smem:[%s5362_s0 + %s4412_s22]]   ;;  %s4416_s22 = smov 24  }
  0x1c   :  { %s4549_s4 = sld [smem:[%s5362_s0 + %s4413_s28]]   ;;  %s4417_s28 = smov 25  }
  0x1d   :  { %s4554_s20 = sld [smem:[%s5362_s0 + %s4414_s7]]   ;;  %s4418_s7 = smov 26  }
  0x20   :  { %5371 = sst [smem:[#allocation17_spill]] %s4539_s6 }
  0x21   :  { %5372 = sst [smem:[#allocation18_spill]] %s4544_s27 }
  0x22   :  { %5373 = sst [smem:[#allocation19_spill]] %s4549_s4 }
  0x23   :  { %5374 = sst [smem:[#allocation20_spill]] %s4554_s20 }
  0x24   :  { %s4559_s6 = sld [smem:[%s5362_s0 + %s4415_s15]]   ;;  %s4419_s15 = smov 27  }
  0x25   :  { %s4564_s27 = sld [smem:[%s5362_s0 + %s4416_s22]]   ;;  %s4420_s22 = smov 28  }
  0x26   :  { %s4569_s4 = sld [smem:[%s5362_s0 + %s4417_s28]]   ;;  %s4421_s28 = smov 29  }
  0x27   :  { %s4574_s20 = sld [smem:[%s5362_s0 + %s4418_s7]]   ;;  %s4591_s7 = smov 0  }
  0x2a   :  { %5375 = sst [smem:[#allocation21_spill]] %s4559_s6 }
  0x2b   :  { %5376 = sst [smem:[#allocation22_spill]] %s4564_s27 }
  0x2c   :  { %5377 = sst [smem:[#allocation23_spill]] %s4569_s4 }
  0x2d   :  { %s4579_s6 = sld [smem:[%s5362_s0 + %s4419_s15]]  }
  0x2e   :  { %s4584_s27 = sld [smem:[%s5362_s0 + %s4420_s22]]  }
  0x2f   :  { %s4589_s4 = sld [smem:[%s5362_s0 + %s4421_s28]]  }
  0x30 LB: > { %s3608_s10 = sadd.s32 4294967295, %s4391_s7   ;;  %p3612_p0 = scmp.ge.s32.totalorder %s4391_s7, 1  ;;  %s4391_s7 = sphi %s4591_s7, %s69_s7  }
  0x31   : > { %p817_p1 = scmp.lt.s32.totalorder %s4391_s7, 3 }
  0x33   : > { %p818_p2 = pnand %p3612_p0, %p817_p1 }
  0x34   : > { %p892_p3 = scmp.lt.s32.totalorder (!%p818_p2), %s3608_s10, 1  ;;  %s4424_s15 = smov (!%p818_p2), 64  }
  0x35   : > { %821 = sbr.rel (%p818_p2) target bundleno = 2741 (0xab5), region = 136  ;;  %s4425_s16 = smov (!%p818_p2), 32  }
  0x36   : > { %s4426_s18 = smov (!%p818_p2), 96   ;;  %s4427_s22 = smov (!%p818_p2), 8  }
  0x37   : > { %s4428_s23 = smov (!%p818_p2), 48   ;;  %s4429_s26 = smov (!%p818_p2), 16  }
  0x38   : > { %s4430_s28 = smov (!%p818_p2), 56   ;;  %s4431_s1 = smov (!%p818_p2), 24  }
  0x39   : > { %s4432_s2 = smov (!%p818_p2), 40  }
  0x3a   : > { %v4313_v0 = vld [vmem:[%s4449_s9 + $0x18] ss:$0 sps:$4 sm:$0x11]   ;;  %vm978_vm0 = vcmask 1040384   ;;  %v4422_v1 = vmov 0   ;;  %v4314_v4 = vld [vmem:[%s4449_s9 + $0x10] sm:$0xff]  }
  0x3b   : > { %v980_v2 = vsel %vm978_vm0, 65535, %v4422_v1  ;;  %v4315_v5 = vld [vmem:[%s4449_s9 + $0x8] sm:$0xff]   ;;  %s5391_s10 = smov (!%p892_p3, %s3608_s10), 1  ;;  %vm965_vm1 = vcmask 400384   ;;  %v4316_v7 = vld [vmem:[%s4449_s9] sm:$0xff]   ;;  %vm1057_vm2 = vcmask 261120  }
  0x3c   : > { %v982_v3 = vand.u32 %v4313_v0, %v980_v2  ;;  %s3730_s0 = sshll.u32 %s5391_s10, 5  ;;  %v4423_v11 = vmov 0.0   ;;  %vm1060_vm3 = vcmask 254976   ;;  %v4321_v18 = vld [vmem:[%s4459_s17 + $0x88] sm:$0xff]   ;;  %v4322_v19 = vld [vmem:[%s4459_s17 + $0x80] sm:$0xff]   ;;  %v4325_v21 = vld [vmem:[%s4459_s17 + $0x78] sm:$0xff]  }
  0x3d   : > { %s896_s11 = scalar_lea.vmem %s4444_s5, %s3730_s0  ;;  %1065 = vst.msk [vmem:[#allocation2 + $0x30] sm:$0xff] %vm1057_vm2, %v4423_v11  ;;  %1066 = vst.msk [vmem:[#allocation2 + $0x38] sm:$0xff] %vm1057_vm2, %v4423_v11  ;;  %v4648_v20 = vld [vmem:[%s4489_s14 + $0x8] sm:$0xff]   ;;  %v4326_v22 = vld [vmem:[%s4459_s17 + $0x38] sm:$0xff]   ;;  %3739 = vmatprep.subr.bf16.mxu1 %v4325_v21  ;;  %vm1359_vm4 = vcmask 523264   ;;  %vm1368_vm5 = vcmask 785408  }
  0x3e   : > { %3814 = vmatprep.subr.bf16.mxu0 %v982_v3  ;;  %v4317_v6 = vld [vmem:[%s896_s11] sm:$0xff]   ;;  %v4318_v8 = vld [vmem:[%s896_s11 + $0x8] sm:$0xff]   ;;  %v4319_v9 = vld [vmem:[%s896_s11 + $0x10] sm:$0xff]   ;;  %1058 = vst.msk [vmem:[#allocation2] sm:$0xff] %vm1057_vm2, %v4423_v11  ;;  %3740 = vmatpush3.bf16.msra.mxu1 %v4326_v22  ;;  %vm1737_vm6 = vcmask 64512   ;;  %vm1740_vm7 = vcmask 58368  }
  0x3f   : > { %3815 = vmatpush3.bf16.msra.mxu0 %v982_v3  ;;  %3822 = vmatprep.mubr.msk.bf16.mxu0 %vm965_vm1, %v4317_v6  ;;  %v4320_v10 = vld [vmem:[%s896_s11 + $0x18] sm:$0xff]   ;;  %1059 = vst.msk [vmem:[#allocation2 + $0x8] sm:$0xff] %vm1057_vm2, %v4423_v11  ;;  %1062 = vst.msk [vmem:[#allocation2 + $0x18] sm:$0xff] %vm1057_vm2, %v4423_v11  ;;  %v4327_v23 = vld [vmem:[%s4459_s17 + $0x70] sm:$0xff]   ;;  %vm2238_vm8 = vcmask 130048   ;;  %vm2352_vm9 = vcmask 1043456  }
  0x40   : > { %3816 = vmatprep.subr.bf16.mxu0 %v4314_v4  ;;  %1063 = vst.msk [vmem:[#allocation2 + $0x20] sm:$0xff] %vm1057_vm2, %v4423_v11  ;;  %1068 = vst.msk [vmem:[#allocation2 + $0x48] sm:$0xff] %vm1057_vm2, %v4423_v11  ;;  %v4328_v24 = vld [vmem:[%s4459_s17 + $0x30] sm:$0xff]   ;;  %3741 = vmatprep.subr.bf16.mxu1 %v4327_v23  ;;  %v4329_v25 = vld [vmem:[%s4459_s17 + $0x68] sm:$0xff]   ;;  %vm2247_vm10 = vcmask 195584   ;;  %vm2264_vm11 = vcmask 326656  }
  0x41   : > { %1069 = vst.msk [vmem:[#allocation2 + $0x50] sm:$0xff] %vm1057_vm2, %v4423_v11  ;;  %1071 = vst.msk [vmem:[#allocation2 + $0x60] sm:$0xff] %vm1057_vm2, %v4423_v11  ;;  %v4330_v26 = vld [vmem:[%s4459_s17 + $0x28] sm:$0xff]   ;;  %v4331_v27 = vld [vmem:[%s4459_s17 + $0x60] sm:$0xff]   ;;  %vm2273_vm12 = vcmask 392192   ;;  %vm2282_vm13 = vcmask 457728  }
  0x42   : > { %1072 = vst.msk [vmem:[#allocation2 + $0x68] sm:$0xff] %vm1057_vm2, %v4423_v11  ;;  %1074 = vst.msk [vmem:[#allocation2 + $0x78] sm:$0xff] %vm1057_vm2, %v4423_v11  ;;  %3742 = vmatpush3.bf16.msra.mxu1 %v4328_v24  ;;  %v4332_v28 = vld [vmem:[%s4459_s17 + $0x20] sm:$0xff]   ;;  %v4333_v39 = vld [vmem:[%s4459_s17 + $0x58] sm:$0xff]   ;;  %vm2339_vm14 = vcmask 588800   ;;  %vm4433_vm15 = vmmov 0  }
  0x43   : > { %3817 = vmatpush3.bf16.msra.mxu0 %v4314_v4  ;;  %1075 = vst.msk [vmem:[#allocation2 + $0x80] sm:$0xff] %vm1057_vm2, %v4423_v11  ;;  %3204 = vst.msk [vmem:[#allocation10] sm:$0xff] %vm1057_vm2, %v4423_v11  ;;  %3743 = vmatprep.subr.bf16.mxu1 %v4329_v25  ;;  %v3616_v29 = vld [vmem:[%s4454_s13] ss:$0 sm:$0xff]  ;;  %v4334_v42 = vld [vmem:[%s4459_s17 + $0x18] sm:$0xff]   ;;  %s5378_s0 = sld [smem:[#allocation14_spill]] }
  0x44   : > { %3818 = vmatprep.subr.bf16.mxu0 %v4315_v5  ;;  %3370 = vst.msk [vmem:[#allocation11] sm:$0xff] %vm1057_vm2, %v4423_v11  ;;  %v4335_v47 = vld [vmem:[%s4459_s17 + $0x50] sm:$0xff]   ;;  %v4337_v55 = vld [vmem:[%s4459_s17 + $0x48] sm:$0xff]   ;;  %v4339_v6 = vld [vmem:[%s4459_s17 + $0x40] sm:$0xff]   ;;  %s5379_s11 = sld [smem:[#allocation12_spill]] }
  0x45   : > { %1061 = vst.msk [vmem:[#allocation2 + $0x10] sm:$0x3] %vm1060_vm3, %v4423_v11  ;;  %1067 = vst.msk [vmem:[#allocation2 + $0x40] sm:$0x3] %vm1060_vm3, %v4423_v11  ;;  %v4336_v50 = vld [vmem:[%s4459_s17 + $0x10] sm:$0xff]   ;;  %v4338_v59 = vld [vmem:[%s4459_s17 + $0x8] sm:$0xff]  }
  0x46   : > { %1076 = vst.msk [vmem:[#allocation2 + $0x88] sm:$0x3] %vm1060_vm3, %v4423_v11  ;;  %1064 = vst.msk [vmem:[#allocation2 + $0x28] sm:$0x3] %vm1060_vm3, %v4423_v11  ;;  %v1102_v12 = vld [vmem:[#allocation2 + $0x2] sm:$0xff]  ;;  %3744 = vmatpush3.bf16.msra.mxu1 %v4330_v26 }
  0x47   : > { %3819 = vmatpush3.bf16.msra.mxu0 %v4315_v5  ;;  %1070 = vst.msk [vmem:[#allocation2 + $0x58] sm:$0x3] %vm1060_vm3, %v4423_v11  ;;  %1073 = vst.msk [vmem:[#allocation2 + $0x70] sm:$0x3] %vm1060_vm3, %v4423_v11  ;;  %v1094_v14 = vld [vmem:[#allocation2 + $0x1] sm:$0xff]  ;;  %3745 = vmatprep.subr.bf16.mxu1 %v4331_v27  ;;  %vm2901_vm3 = vcmask 654336  }
  0x48   : > { %3820 = vmatprep.subr.bf16.mxu0 %v4316_v7  ;;  %v4324_v22 = vld [vmem:[%s4489_s14] sm:$0xff]   ;;  %1742 = vst.msk [vmem:[#allocation3 + $0x18] sm:$0xff] %vm1737_vm6, %v4423_v11  ;;  %1743 = vst.msk [vmem:[#allocation3 + $0x20] sm:$0xff] %vm1737_vm6, %v4423_v11 }
  0x49   : > { %1738 = vst.msk [vmem:[#allocation3] sm:$0xff] %vm1737_vm6, %v4423_v11  ;;  %1739 = vst.msk [vmem:[#allocation3 + $0x8] sm:$0xff] %vm1737_vm6, %v4423_v11 }
  0x4a   : > { %3746 = vmatpush3.bf16.msra.mxu1 %v4332_v28  ;;  %v1157_v26 = vld [vmem:[#allocation2 + $0x7a] sm:$0xff]  ;;  %1745 = vst.msk [vmem:[#allocation3 + $0x30] sm:$0xff] %vm1737_vm6, %v4423_v11  ;;  %1746 = vst.msk [vmem:[#allocation3 + $0x38] sm:$0xff] %vm1737_vm6, %v4423_v11 }
  0x4b   : > { %3821 = vmatpush3.bf16.msra.mxu0 %v4316_v7  ;;  %3747 = vmatprep.subr.bf16.mxu1 %v4333_v39  ;;  %v4340_v7 = vld [vmem:[%s4459_s17] sm:$0xff]   ;;  %1748 = vst.msk [vmem:[#allocation3 + $0x48] sm:$0xff] %vm1737_vm6, %v4423_v11  ;;  %1749 = vst.msk [vmem:[#allocation3 + $0x50] sm:$0xff] %vm1737_vm6, %v4423_v11 }
  0x4c   : > { %v1103_v13 = vld [vmem:[#allocation2 + $0xa] sm:$0xff]  ;;  %3830 = vmatprep.subr.bf16.mxu0 %v4321_v18  ;;  %1751 = vst.msk [vmem:[#allocation3 + $0x60] sm:$0xff] %vm1737_vm6, %v4423_v11  ;;  %1752 = vst.msk [vmem:[#allocation3 + $0x68] sm:$0xff] %vm1737_vm6, %v4423_v11 }
  0x4d   : > { %v3963_v15 = vpack.i.bf16 %v1103_v13, %v1102_v12  ;;  %v1095_v16 = vld [vmem:[#allocation2 + $0x9] sm:$0xff]  ;;  %1754 = vst.msk [vmem:[#allocation3 + $0x78] sm:$0xff] %vm1737_vm6, %v4423_v11  ;;  %1755 = vst.msk [vmem:[#allocation3 + $0x80] sm:$0xff] %vm1737_vm6, %v4423_v11 }
  0x4e   : > { %3823 = vmatmul.mubr.msk.bf16.vlgmr.msra.gmra.mxu0 %vm965_vm1, %v4318_v8  ;;  %v3958_v17 = vpack.i.bf16 %v1095_v16, %v1094_v14  ;;  %3748 = vmatpush3.bf16.msra.mxu1 %v4334_v42  ;;  %2470 = vst.msk [vmem:[#allocation4 + $0x18] sm:$0xff] %vm1737_vm6, %v4423_v11  ;;  %2471 = vst.msk [vmem:[#allocation4 + $0x20] sm:$0xff] %vm1737_vm6, %v4423_v11 }
  0x4f   : > { %3826 = vmatprep.mubr.msk.bf16.mxu0 %vm965_vm1, %v4319_v9  ;;  %3964 = vrot.lane.b32.xlu1 %v3963_v15, %s4424_s15  ;;  %2473 = vst.msk [vmem:[#allocation4 + $0x30] sm:$0xff] %vm1737_vm6, %v4423_v11  ;;  %2474 = vst.msk [vmem:[#allocation4 + $0x38] sm:$0xff] %vm1737_vm6, %v4423_v11 }
  0x50   : > { %3959 = vrot.lane.b32.xlu0 %v3958_v17, %s4425_s16  ;;  %3831 = vmatpush3.bf16.msra.mxu0 %v4321_v18  ;;  %2476 = vst.msk [vmem:[#allocation4 + $0x48] sm:$0xff] %vm1737_vm6, %v4423_v11  ;;  %2477 = vst.msk [vmem:[#allocation4 + $0x50] sm:$0xff] %vm1737_vm6, %v4423_v11 }
  0x51   : > { %3832 = vmatprep.subr.bf16.mxu0 %v4322_v19  ;;  %3749 = vmatprep.subr.bf16.mxu1 %v4335_v47  ;;  %2479 = vst.msk [vmem:[#allocation4 + $0x60] sm:$0xff] %vm1737_vm6, %v4423_v11  ;;  %2480 = vst.msk [vmem:[#allocation4 + $0x68] sm:$0xff] %vm1737_vm6, %v4423_v11 }
  0x52   : > { %3750 = vmatpush3.bf16.msra.mxu1 %v4336_v50  ;;  %v1149_v50 = vld [vmem:[#allocation2 + $0x79] sm:$0xff]  ;;  %2523 = vst.msk [vmem:[#allocation6] sm:$0xff] %vm1737_vm6, %v4423_v11  ;;  %2525 = vst.msk [vmem:[#allocation6 + $0x10] sm:$0xff] %vm1737_vm6, %v4423_v11 }
  0x53   : > { %3751 = vmatprep.subr.bf16.mxu1 %v4337_v55  ;;  %2527 = vst.msk [vmem:[#allocation6 + $0x20] sm:$0xff] %vm1737_vm6, %v4423_v11  ;;  %2529 = vst.msk [vmem:[#allocation6 + $0x30] sm:$0xff] %vm1737_vm6, %v4423_v11 }
  0x54   : > { %3833 = vmatpush3.bf16.msra.mxu0 %v4322_v19  ;;  %1744 = vst.msk [vmem:[#allocation3 + $0x28] sm:$0x3] %vm1740_vm7, %v4423_v11  ;;  %1741 = vst.msk [vmem:[#allocation3 + $0x10] sm:$0x3] %vm1740_vm7, %v4423_v11 }
  0x55   : > { %3842 = vmatprep.subr.bf16.mxu0 %v4648_v20  ;;  %1747 = vst.msk [vmem:[#allocation3 + $0x40] sm:$0x3] %vm1740_vm7, %v4423_v11  ;;  %1750 = vst.msk [vmem:[#allocation3 + $0x58] sm:$0x3] %vm1740_vm7, %v4423_v11 }
  0x56   : > { %3827 = vmatmul.mubr.msk.bf16.gmra.mxu0 %vm965_vm1, %v4320_v10  ;;  %3752 = vmatpush3.bf16.msra.mxu1 %v4338_v59  ;;  %1753 = vst.msk [vmem:[#allocation3 + $0x70] sm:$0x3] %vm1740_vm7, %v4423_v11  ;;  %1756 = vst.msk [vmem:[#allocation3 + $0x88] sm:$0x3] %vm1740_vm7, %v4423_v11  ;;  %vm2738_vm1 = vcmask 123904  }
  0x57   : > { %3753 = vmatprep.subr.bf16.mxu1 %v4339_v6  ;;  %v1086_v6 = vld [vmem:[#allocation2] sm:$0xff]  ;;  %2472 = vst.msk [vmem:[#allocation4 + $0x28] sm:$0x3] %vm1740_vm7, %v4423_v11  ;;  %2475 = vst.msk [vmem:[#allocation4 + $0x40] sm:$0x3] %vm1740_vm7, %v4423_v11 }
  0x58   : > { %2478 = vst.msk [vmem:[#allocation4 + $0x58] sm:$0x3] %vm1740_vm7, %v4423_v11  ;;  %2481 = vst.msk [vmem:[#allocation4 + $0x70] sm:$0x3] %vm1740_vm7, %v4423_v11 }
  0x59   : > { %2524 = vst.msk [vmem:[#allocation6 + $0x8] sm:$0x3] %vm1740_vm7, %v4423_v11  ;;  %2526 = vst.msk [vmem:[#allocation6 + $0x18] sm:$0x3] %vm1740_vm7, %v4423_v11 }
  0x5a   : > { %3754 = vmatpush3.bf16.msra.mxu1 %v4340_v7  ;;  %2528 = vst.msk [vmem:[#allocation6 + $0x28] sm:$0x3] %vm1740_vm7, %v4423_v11  ;;  %2530 = vst.msk [vmem:[#allocation6 + $0x38] sm:$0x3] %vm1740_vm7, %v4423_v11  ;;  %vm3075_vm7 = vcmask 125952  }
  0x5b   : > { %2737 = vst.msk [vmem:[#allocation7] sm:$0xff] %vm2238_vm8, %v4423_v11  ;;  %2740 = vst.msk [vmem:[#allocation7 + $0x10] sm:$0xff] %vm2238_vm8, %v4423_v11 }
  0x5c   : > { %2742 = vst.msk [vmem:[#allocation7 + $0x20] sm:$0xff] %vm2238_vm8, %v4423_v11  ;;  %2744 = vst.msk [vmem:[#allocation7 + $0x30] sm:$0xff] %vm2238_vm8, %v4423_v11 }
  0x5d   : > { %3051 = vst.msk [vmem:[#allocation8 + $0x10] sm:$0xff] %vm2238_vm8, %v4423_v11  ;;  %3053 = vst.msk [vmem:[#allocation8 + $0x20] sm:$0xff] %vm2238_vm8, %v4423_v11 }
  0x5e   : > { %3074 = vst.msk [vmem:[#allocation9] sm:$0xff] %vm2238_vm8, %v4423_v11 }
  0x5f   : > { %2741 = vst.msk [vmem:[#allocation7 + $0x18] sm:$0x3] %vm2738_vm1, %v4423_v11  ;;  %2739 = vst.msk [vmem:[#allocation7 + $0x8] sm:$0x3] %vm2738_vm1, %v4423_v11 }
  0x60   : > { %2743 = vst.msk [vmem:[#allocation7 + $0x28] sm:$0x3] %vm2738_vm1, %v4423_v11  ;;  %2745 = vst.msk [vmem:[#allocation7 + $0x38] sm:$0x3] %vm2738_vm1, %v4423_v11 }
  0x61   : > { %3052 = vst.msk [vmem:[#allocation8 + $0x18] sm:$0x3] %vm2738_vm1, %v4423_v11  ;;  %3054 = vst.msk [vmem:[#allocation8 + $0x28] sm:$0x3] %vm2738_vm1, %v4423_v11 }
  0x62   : > { %3076 = vst.msk [vmem:[#allocation9 + $0x8] sm:$0xf] %vm3075_vm7, %v4423_v11 }
 0x10e   : > { %v3824_v30 = vpop.f32.mrf.mxu0 }
 0x10f   : > { %v1027_v31 = vadd.f32 %v3824_v30, %v3616_v29  ;;  %v1158_v30 = vld [vmem:[#allocation2 + $0x82] sm:$0xff] }
 0x110   : > { %v1018_v32 = vpop.f32.mrf.mxu0 }
 0x111   : > { %v1051_v33 = vmax.f32 %v1027_v31, 0.0  ;;  %v1019_v34 = vadd.f32 %v3616_v29, %v1018_v32 }
 0x112   : > { %v3825_v35 = vpop.f32.mrf.mxu0 }
 0x113   : > { %1080 = vst.msk [vmem:[#allocation2 + $0x31] sm:$0xff] %vm1057_vm2, %v1051_v33  ;;  %v1049_v36 = vmax.f32 %v1019_v34, 0.0  ;;  %v1030_v37 = vadd.f32 %v3825_v35, %v3616_v29  ;;  %v1412_v34 = vpack.c.bf16 %v1158_v30, %v1157_v26 }
 0x114   : > { %v1021_v38 = vpop.f32.mrf.mxu0 }
 0x115   : > { %1078 = vst.msk [vmem:[#allocation2 + $0x19] sm:$0xff] %vm1057_vm2, %v1049_v36  ;;  %v1052_v40 = vmax.f32 %v1030_v37, 0.0  ;;  %v1022_v41 = vadd.f32 %v3616_v29, %v1021_v38 }
 0x116   : > { %v3828_v43 = vpop.f32.mrf.mxu0 }
 0x117   : > { %1081 = vst.msk [vmem:[#allocation2 + $0x39] sm:$0xff] %vm1057_vm2, %v1052_v40  ;;  %v1050_v44 = vmax.f32 %v1022_v41, 0.0  ;;  %v1043_v45 = vadd.f32 %v3828_v43, %v3616_v29 }
 0x118   : > { %v1034_v46 = vpop.f32.mrf.mxu0 }
 0x119   : > { %1079 = vst.msk [vmem:[#allocation2 + $0x21] sm:$0xff] %vm1057_vm2, %v1050_v44  ;;  %v1055_v48 = vmax.f32 %v1043_v45, 0.0  ;;  %v1035_v49 = vadd.f32 %v3616_v29, %v1034_v46  ;;  %v1141_v45 = vld [vmem:[#allocation2 + $0x78] sm:$0xff]  ;;  %v1142_v46 = vld [vmem:[#allocation2 + $0x80] sm:$0xff] }
 0x11a   : > { %v3829_v51 = vpop.f32.mrf.mxu0  ;;  %v4671_v58 = vld [vmem:[#allocation2 + $0x31] sm:$0xff] }
 0x11b   : > { %1084 = vst.msk [vmem:[#allocation2 + $0x61] sm:$0xff] %vm1057_vm2, %v1055_v48  ;;  %v1053_v52 = vmax.f32 %v1035_v49, 0.0  ;;  %v1046_v53 = vadd.f32 %v3829_v51, %v3616_v29  ;;  %v4679_v3 = vld [vmem:[#allocation2 + $0x30] sm:$0xff]  ;;  %v4048_v49 = vpack.i.bf16 %v1142_v46, %v1141_v45  ;;  %v1150_v51 = vld [vmem:[#allocation2 + $0x81] sm:$0xff] }
 0x11c   : > { %v1037_v54 = vpop.f32.mrf.mxu0  ;;  %v4699_v25 = vld [vmem:[#allocation2 + $0x18] sm:$0xff] }
 0x11d   : > { %1082 = vst.msk [vmem:[#allocation2 + $0x49] sm:$0xff] %vm1057_vm2, %v1053_v52  ;;  %v1056_v56 = vmax.f32 %v1046_v53, 0.0  ;;  %v1038_v57 = vadd.f32 %v3616_v29, %v1037_v54  ;;  %v4715_v33 = vld [vmem:[#allocation2 + $0x19] sm:$0xff]  ;;  %v4053_v52 = vpack.i.bf16 %v1150_v51, %v1149_v50  ;;  %v3960_v53 = vpop.permute.xlu0 %3959  ;;  %v3965_v54 = vpop.permute.xlu1 %3964 }
 0x11e   : > { %v1151_v60 = vld [vmem:[#allocation2 + $0x32] sm:$0xff]  ;;  %v1152_v61 = vld [vmem:[#allocation2 + $0x3a] sm:$0xff] }
 0x11f   : > { %v4674_v62 = vld [vmem:[#allocation2 + $0x39] sm:$0xff]  ;;  %1085 = vst.msk [vmem:[#allocation2 + $0x69] sm:$0xff] %vm1057_vm2, %v1056_v56  ;;  %v1054_v63 = vmax.f32 %v1038_v57, 0.0  ;;  %v1403_v0 = vpack.c.bf16 %v1152_v61, %v1151_v60  ;;  %v3978_v8 = vpack.i.bf16 %v1152_v61, %v1151_v60  ;;  %v3962_v60 = vunpack.i.h.bf16 %v3960_v53 }
 0x120   : > { %v3973_v2 = vpack.i.bf16 %v4674_v62, %v4671_v58  ;;  %v4681_v4 = vld [vmem:[#allocation2 + $0x38] sm:$0xff]  ;;  %v1127_v10 = vld [vmem:[#allocation2 + $0x22] sm:$0xff]  ;;  %v1775_v42 = vpack.c.bf16 %v4674_v62, %v4671_v58  ;;  %v3961_v61 = vunpack.i.l.bf16 %v3960_v53 }
 0x121   : > { %v3968_v5 = vpack.i.bf16 %v4681_v4, %v4679_v3  ;;  %1083 = vst.msk [vmem:[#allocation2 + $0x51] sm:$0xff] %vm1057_vm2, %v1054_v63  ;;  %3834 = vmatprep.mubr.msk.bf16.mxu0 %vm1057_vm2, %v1403_v0  ;;  %v1126_v9 = vld [vmem:[#allocation2 + $0x1a] sm:$0xff]  ;;  %v3967_v0 = vunpack.i.h.bf16 %v3965_v54 }
 0x122   : > { %3974 = vrot.lane.b32.xlu0 %v3973_v2, %s4426_s18  ;;  %v3993_v12 = vpack.i.bf16 %v1127_v10, %v1126_v9  ;;  %v1139_v15 = vld [vmem:[#allocation2 + $0x60] sm:$0xff] }
 0x123   : > { %3969 = vrot.lane.b32.xlu1 %v3968_v5, %s4424_s15  ;;  %v4694_v21 = vld [vmem:[#allocation2 + $0x20] sm:$0xff] }
 0x124   : > { %v3998_v27 = vpack.i.bf16 %v4694_v21, %v4699_v25  ;;  %v4704_v28 = vld [vmem:[#allocation2 + $0x61] sm:$0xff]  ;;  %v4736_v40 = vld [vmem:[#allocation2 + $0x49] sm:$0xff] }
 0x125   : > { %v4710_v31 = vld [vmem:[#allocation2 + $0x21] sm:$0xff] }
 0x126   : > { %3979 = vrot.lane.b32.xlu0 %v3978_v8, %s4425_s16  ;;  %v1155_v13 = vld [vmem:[#allocation2 + $0x62] sm:$0xff]  ;;  %v1156_v14 = vld [vmem:[#allocation2 + $0x6a] sm:$0xff]  ;;  %v4003_v35 = vpack.i.bf16 %v4710_v31, %v4715_v33 }
 0x127   : > { %3984 = vrot.lane.b32.xlu1 %v3968_v5, %s4426_s18  ;;  %v1140_v18 = vld [vmem:[#allocation2 + $0x68] sm:$0xff]  ;;  %v1409_v23 = vpack.c.bf16 %v1156_v14, %v1155_v13  ;;  %v4043_v47 = vpack.i.bf16 %v1156_v14, %v1155_v13 }
 0x128   : > { %v1153_v16 = vld [vmem:[#allocation2 + $0x4a] sm:$0xff]  ;;  %v1154_v17 = vld [vmem:[#allocation2 + $0x52] sm:$0xff]  ;;  %v4018_v24 = vpack.i.bf16 %v1140_v18, %v1139_v15  ;;  %v1351_v18 = vsel %vm1057_vm2, %v1086_v6, %v3961_v61 }
 0x129   : > { %v1406_v19 = vpack.c.bf16 %v1154_v17, %v1153_v16  ;;  %v4706_v29 = vld [vmem:[#allocation2 + $0x69] sm:$0xff]  ;;  %v4732_v39 = vld [vmem:[#allocation2 + $0x51] sm:$0xff]  ;;  %v4038_v44 = vpack.i.bf16 %v1154_v17, %v1153_v16 }
 0x12a   : > { %3994 = vrot.lane.b32.xlu0 %v3993_v12, %s4425_s16  ;;  %v4023_v32 = vpack.i.bf16 %v4706_v29, %v4704_v28  ;;  %v4719_v36 = vld [vmem:[#allocation2 + $0x50] sm:$0xff]  ;;  %v4726_v37 = vld [vmem:[#allocation2 + $0x48] sm:$0xff]  ;;  %v4033_v41 = vpack.i.bf16 %v4732_v39, %v4736_v40  ;;  %v1776_v43 = vpack.c.bf16 %v4732_v39, %v4736_v40  ;;  %v1777_v48 = vpack.c.bf16 %v4706_v29, %v4704_v28 }
 0x12b   : > { %3989 = vrot.lane.b32.xlu1 %v3973_v2, %s4425_s16  ;;  %3835 = vmatmul.mubr.msk.bf16.vlgmr.msra.gmra.mxu0 %vm1057_vm2, %v1406_v19  ;;  %v4028_v38 = vpack.i.bf16 %v4719_v36, %v4726_v37  ;;  %v3966_v2 = vunpack.i.l.bf16 %v3965_v54  ;;  %v1087_v5 = vld [vmem:[#allocation2 + $0x8] sm:$0xff] }
 0x12c   : > { %3838 = vmatprep.mubr.msk.bf16.mxu0 %vm1057_vm2, %v1409_v23  ;;  %3843 = vmatpush3.bf16.msra.mxu0 %v4648_v20  ;;  %v1774_v20 = vpack.c.bf16 %v4710_v31, %v4715_v33  ;;  %v1352_v17 = vsel %vm1057_vm2, %v1087_v5, %v3962_v60 }
 0x12d   : > { %3844 = vmatprep.subr.bf16.mxu0 %v4324_v22 }
 0x12e   : > { %4019 = vrot.lane.b32.xlu0 %v4018_v24, %s4424_s15 }
 0x12f   : > { %3999 = vrot.lane.b32.xlu1 %v3998_v27, %s4426_s18 }
 0x130   : > { %3845 = vmatpush3.bf16.msra.mxu0 %v4324_v22 }
 0x131   : > { %3872 = vmatprep.subr.bf16.mxu0 %v4423_v11 }
 0x132   : > { %4024 = vrot.lane.b32.xlu0 %v4023_v32, %s4426_s18 }
 0x133   : > { %4004 = vrot.lane.b32.xlu1 %v4003_v35, %s4425_s16  ;;  %3839 = vmatmul.mubr.msk.bf16.gmra.mxu0 %vm1057_vm2, %v1412_v34  ;;  %v1361_v34 = vsel %vm1359_vm4, %v1352_v17, %v3967_v0 }
 0x134   : > { %3846 = vmatprep.mubr.msk.bf16.mxu0 %vm1057_vm2, %v1774_v20 }
 0x136   : > { %4029 = vrot.lane.b32.xlu0 %v4028_v38, %s4424_s15 }
 0x137   : > { %4009 = vrot.lane.b32.xlu1 %v3993_v12, %s4424_s15 }
 0x13a   : > { %4034 = vrot.lane.b32.xlu0 %v4033_v41, %s4426_s18 }
 0x13b   : > { %4014 = vrot.lane.b32.xlu1 %v3978_v8, %s4424_s15  ;;  %3847 = vmatmul.mubr.msk.bf16.vlgmr.msra.gmra.mxu0 %vm1057_vm2, %v1775_v42 }
 0x13c   : > { %3850 = vmatprep.mubr.msk.bf16.mxu0 %vm1057_vm2, %v1776_v43 }
 0x13e   : > { %4039 = vrot.lane.b32.xlu0 %v4038_v44, %s4425_s16 }
 0x13f   : > { %4059 = vrot.lane.b32.xlu1 %v4028_v38, %s4426_s18 }
 0x142   : > { %4044 = vrot.lane.b32.xlu0 %v4043_v47, %s4425_s16 }
 0x143   : > { %4064 = vrot.lane.b32.xlu1 %v4033_v41, %s4425_s16  ;;  %3851 = vmatmul.mubr.msk.bf16.gmra.mxu0 %vm1057_vm2, %v1777_v48 }
 0x144   : > { %3882 = vmatprep.mubr.msk.bf16.mxu0 %vm4433_vm15, %v4423_v11 }
 0x146   : > { %4049 = vrot.lane.b32.xlu0 %v4048_v49, %s4424_s15 }
 0x147   : > { %4069 = vrot.lane.b32.xlu1 %v4038_v44, %s4424_s15 }
 0x14a   : > { %4054 = vrot.lane.b32.xlu0 %v4053_v52, %s4426_s18 }
 0x14b   : > { %4074 = vrot.lane.b32.xlu1 %v4018_v24, %s4426_s18 }
 0x194   : > { %v3975_v55 = vpop.permute.xlu0 %3974 }
 0x195   : > { %v3970_v56 = vpop.permute.xlu1 %3969  ;;  %v3977_v13 = vunpack.i.h.bf16 %v3975_v55  ;;  %v3976_v14 = vunpack.i.l.bf16 %v3975_v55 }
 0x196   : > { %v3972_v10 = vunpack.i.h.bf16 %v3970_v56  ;;  %v3971_v12 = vunpack.i.l.bf16 %v3970_v56 }
 0x198   : > { %v3980_v57 = vpop.permute.xlu0 %3979 }
 0x199   : > { %v4759_v59 = vpop.permute.xlu1 %3984  ;;  %v3982_v46 = vunpack.i.h.bf16 %v3980_v57  ;;  %v3981_v47 = vunpack.i.l.bf16 %v3980_v57 }
 0x19a   : > { %v3987_v55 = vunpack.i.h.bf16 %v4759_v59  ;;  %v3986_v56 = vunpack.i.l.bf16 %v4759_v59 }
 0x19b   : > { %v1380_v0 = vsel %vm1057_vm2, %v4674_v62, %v3982_v46 }
 0x19c   : > { %v3995_v63 = vpop.permute.xlu0 %3994 }
 0x19d   : > { %v4761_v7 = vpop.permute.xlu1 %3989  ;;  %v3997_v8 = vunpack.i.h.bf16 %v3995_v63  ;;  %v3996_v9 = vunpack.i.l.bf16 %v3995_v63  ;;  %v1379_v63 = vsel %vm1057_vm2, %v4671_v58, %v3981_v47 }
 0x19e   : > { %v3992_v58 = vunpack.i.h.bf16 %v4761_v7 }
 0x19f   : > { %v1377_v15 = vsel %vm1057_vm2, %v4715_v33, %v3996_v9  ;;  %v1378_v16 = vsel %vm1057_vm2, %v4710_v31, %v3997_v8  ;;  %v1360_v31 = vsel %vm1359_vm4, %v1351_v18, %v3966_v2 }
 0x1a0   : > { %v4769_v19 = vpop.permute.xlu0 %4019  ;;  %v1385_v22 = vsel %vm1359_vm4, %v1377_v15, %v3971_v12  ;;  %v1386_v23 = vsel %vm1359_vm4, %v1378_v16, %v3972_v10  ;;  %v3991_v12 = vunpack.i.l.bf16 %v4761_v7 }
 0x1a1   : > { %v4000_v24 = vpop.permute.xlu1 %3999  ;;  %v1393_v26 = vsel %vm1368_vm5, %v1385_v22, %v3976_v14  ;;  %v1394_v27 = vsel %vm1368_vm5, %v1386_v23, %v3977_v13  ;;  %v4022_v23 = vunpack.i.h.bf16 %v4769_v19 }
 0x1a2   : > { %v4002_v30 = vunpack.i.h.bf16 %v4000_v24  ;;  %v4001_v32 = vunpack.i.l.bf16 %v4000_v24  ;;  %v1402_v33 = vpack.c.bf16 %v1394_v27, %v1393_v26  ;;  %v4021_v24 = vunpack.i.l.bf16 %v4769_v19 }
 0x1a3   : > { %v1356_v19 = vsel %vm1057_vm2, %v4681_v4, %v3992_v58  ;;  %v1909_v58 = vld [vmem:[#allocation3 + $0x1] sm:$0xff] }
 0x1a4   : > { %v4777_v35 = vpop.permute.xlu0 %4024  ;;  %1601 = vmatprep.mubr.bf16.mxu1 %v1402_v33  ;;  %v1369_v20 = vsel %vm1368_vm5, %v1360_v31, %v4001_v32  ;;  %v1370_v38 = vsel %vm1368_vm5, %v1361_v34, %v4002_v30  ;;  %v1355_v31 = vsel %vm1057_vm2, %v4679_v3, %v3991_v12  ;;  %v1910_v12 = vld [vmem:[#allocation3 + $0x9] sm:$0xff] }
 0x1a5   : > { %v4005_v41 = vpop.permute.xlu1 %4004  ;;  %v1401_v42 = vpack.c.bf16 %v1370_v38, %v1369_v20  ;;  %v4027_v30 = vunpack.i.h.bf16 %v4777_v35  ;;  %v4026_v32 = vunpack.i.l.bf16 %v4777_v35 }
 0x1a6   : > { %v4007_v43 = vunpack.i.h.bf16 %v4005_v41  ;;  %v4006_v44 = vunpack.i.l.bf16 %v4005_v41 }
 0x1a7   : > { %1602 = vmatmul.mubr.bf16.vlgmr.msra.gmra.mxu1 %v1401_v42 }
 0x1a8   : > { %v4030_v45 = vpop.permute.xlu0 %4029  ;;  %v1353_v53 = vsel %vm1057_vm2, %v4699_v25, %v4006_v44  ;;  %v1354_v54 = vsel %vm1057_vm2, %v4694_v21, %v4007_v43 }
 0x1a9   : > { %v4010_v48 = vpop.permute.xlu1 %4009  ;;  %v4032_v49 = vunpack.i.h.bf16 %v4030_v45  ;;  %v4031_v50 = vunpack.i.l.bf16 %v4030_v45 }
 0x1aa   : > { %v4012_v51 = vunpack.i.h.bf16 %v4010_v48  ;;  %v4011_v52 = vunpack.i.l.bf16 %v4010_v48 }
 0x1ab   : > { %v1388_v21 = vsel %vm1359_vm4, %v1380_v0, %v4032_v49  ;;  %v1387_v6 = vsel %vm1359_vm4, %v1379_v63, %v4031_v50 }
 0x1ac   : > { %v1362_v60 = vsel %vm1359_vm4, %v1353_v53, %v4011_v52  ;;  %v1363_v61 = vsel %vm1359_vm4, %v1354_v54, %v4012_v51  ;;  %v4035_v57 = vpop.permute.xlu0 %4034 }
 0x1ad   : > { %v4037_v2 = vunpack.i.h.bf16 %v4035_v57  ;;  %v4036_v25 = vunpack.i.l.bf16 %v4035_v57  ;;  %v4015_v5 = vpop.permute.xlu1 %4014  ;;  %v1371_v59 = vsel %vm1368_vm5, %v1362_v60, %v3986_v56  ;;  %v1372_v8 = vsel %vm1368_vm5, %v1363_v61, %v3987_v55 }
 0x1ae   : > { %v4017_v62 = vunpack.i.h.bf16 %v4015_v5  ;;  %v4016_v15 = vunpack.i.l.bf16 %v4015_v5  ;;  %v1404_v22 = vpack.c.bf16 %v1372_v8, %v1371_v59 }
 0x1af   : > { %v1395_v9 = vsel %vm1368_vm5, %v1387_v6, %v4036_v25  ;;  %v1396_v10 = vsel %vm1368_vm5, %v1388_v21, %v4037_v2 }
 0x1b0   : > { %v4040_v13 = vpop.permute.xlu0 %4039  ;;  %v1405_v14 = vpack.c.bf16 %v1396_v10, %v1395_v9  ;;  %v1365_v35 = vsel %vm1359_vm4, %v1356_v19, %v4017_v62  ;;  %v1364_v41 = vsel %vm1359_vm4, %v1355_v31, %v4016_v15  ;;  %v1956_v62 = vld [vmem:[#allocation3 + $0x78] sm:$0xff]  ;;  %v4932_v31 = vld [vmem:[%s4464_s21] ss:$0 sm:$0xff] }
 0x1b1   : > { %v4042_v16 = vunpack.i.h.bf16 %v4040_v13  ;;  %v4041_v17 = vunpack.i.l.bf16 %v4040_v13  ;;  %v4060_v18 = vpop.permute.xlu1 %4059  ;;  %v4078_v13 = vpack.i.bf16 %v1910_v12, %v1909_v58 }
 0x1b2   : > { %v4062_v26 = vunpack.i.h.bf16 %v4060_v18  ;;  %v4061_v27 = vunpack.i.l.bf16 %v4060_v18  ;;  %1609 = vmatprep.mubr.bf16.mxu1 %v1405_v14  ;;  %v1957_v14 = vld [vmem:[#allocation3 + $0x80] sm:$0xff] }
 0x1b3   : > { %v1382_v7 = vsel %vm1057_vm2, %v4732_v39, %v4042_v16  ;;  %v1381_v33 = vsel %vm1057_vm2, %v4736_v40, %v4041_v17  ;;  %1610 = vmatmul.mubr.bf16.gmra.mxu1 %v1404_v22  ;;  %v4088_v15 = vpack.i.bf16 %v1957_v14, %v1956_v62  ;;  %4079 = vrot.lane.b32.xlu0 %v4078_v13, %s4427_s22  ;;  %v1917_v16 = vld [vmem:[#allocation3 + $0x2] sm:$0xff]  ;;  %v1918_v17 = vld [vmem:[#allocation3 + $0xa] sm:$0xff]  ;;  %v1964_v18 = vld [vmem:[#allocation3 + $0x79] sm:$0xff] }
 0x1b4   : > { %v4045_v34 = vpop.permute.xlu0 %4044  ;;  %v1389_v20 = vsel %vm1359_vm4, %v1381_v33, %v4021_v24  ;;  %v1390_v38 = vsel %vm1359_vm4, %v1382_v7, %v4022_v23  ;;  %v1373_v3 = vsel %vm1368_vm5, %v1364_v41, %v4061_v27  ;;  %v1374_v44 = vsel %vm1368_vm5, %v1365_v35, %v4062_v26  ;;  %v1965_v23 = vld [vmem:[#allocation3 + $0x81] sm:$0xff] }
 0x1b5   : > { %v4065_v39 = vpop.permute.xlu1 %4064  ;;  %v1397_v42 = vsel %vm1368_vm5, %v1389_v20, %v4026_v32  ;;  %v1398_v40 = vsel %vm1368_vm5, %v1390_v38, %v4027_v30  ;;  %v4047_v4 = vunpack.i.h.bf16 %v4045_v34  ;;  %v4046_v45 = vunpack.i.l.bf16 %v4045_v34  ;;  %4089 = vrot.lane.b32.xlu1 %v4088_v15, %s4428_s23  ;;  %v4935_v20 = vld [vmem:[%s4469_s25] ss:$0 sm:$0xff] }
 0x1b6   : > { %v1408_v43 = vpack.c.bf16 %v1398_v40, %v1397_v42  ;;  %v4067_v47 = vunpack.i.h.bf16 %v4065_v39  ;;  %v4066_v48 = vunpack.i.l.bf16 %v4065_v39  ;;  %v1407_v50 = vpack.c.bf16 %v1374_v44, %v1373_v3 }
 0x1b7   : > { %v1384_v55 = vsel %vm1057_vm2, %v4706_v29, %v4047_v4  ;;  %v1383_v56 = vsel %vm1057_vm2, %v4704_v28, %v4046_v45  ;;  %v4083_v22 = vpack.i.bf16 %v1918_v17, %v1917_v16  ;;  %v4093_v24 = vpack.i.bf16 %v1965_v23, %v1964_v18 }
 0x1b8   : > { %v4050_v46 = vpop.permute.xlu0 %4049  ;;  %1617 = vmatprep.mubr.bf16.mxu1 %v1408_v43  ;;  %v1358_v61 = vsel %vm1057_vm2, %v4719_v36, %v4067_v47  ;;  %v1357_v57 = vsel %vm1057_vm2, %v4726_v37, %v4066_v48 }
 0x1b9   : > { %v4070_v49 = vpop.permute.xlu1 %4069  ;;  %v4052_v51 = vunpack.i.h.bf16 %v4050_v46  ;;  %v4051_v52 = vunpack.i.l.bf16 %v4050_v46  ;;  %4084 = vrot.lane.b32.xlu0 %v4083_v22, %s4429_s26  ;;  %4094 = vrot.lane.b32.xlu1 %v4093_v24, %s4430_s28 }
 0x1ba   : > { %v4072_v53 = vunpack.i.h.bf16 %v4070_v49  ;;  %v4071_v54 = vunpack.i.l.bf16 %v4070_v49 }
 0x1bb   : > { %1618 = vmatmul.mubr.bf16.gmra.mxu1 %v1407_v50  ;;  %v1391_v25 = vsel %vm1359_vm4, %v1383_v56, %v4051_v52  ;;  %v1392_v5 = vsel %vm1359_vm4, %v1384_v55, %v4052_v51 }
 0x1bc   : > { %v4055_v60 = vpop.permute.xlu0 %4054  ;;  %v1366_v29 = vsel %vm1359_vm4, %v1357_v57, %v4071_v54  ;;  %v1367_v28 = vsel %vm1359_vm4, %v1358_v61, %v4072_v53 }
 0x1bd   : > { %v4057_v63 = vunpack.i.h.bf16 %v4055_v60  ;;  %v4056_v0 = vunpack.i.l.bf16 %v4055_v60  ;;  %v4075_v2 = vpop.permute.xlu1 %4074 }
 0x1be   : > { %v4077_v21 = vunpack.i.h.bf16 %v4075_v2  ;;  %v4076_v6 = vunpack.i.l.bf16 %v4075_v2 }
 0x1bf   : > { %v1399_v59 = vsel %vm1368_vm5, %v1391_v25, %v4056_v0  ;;  %v1400_v36 = vsel %vm1368_vm5, %v1392_v5, %v4057_v63 }
 0x1c0   : > { %v1411_v8 = vpack.c.bf16 %v1400_v36, %v1399_v59  ;;  %v1375_v37 = vsel %vm1368_vm5, %v1366_v29, %v4076_v6  ;;  %v1376_v9 = vsel %vm1368_vm5, %v1367_v28, %v4077_v21 }
 0x1c1   : > { %v1410_v10 = vpack.c.bf16 %v1376_v9, %v1375_v37 }
 0x1c2   : > { %1625 = vmatprep.mubr.bf16.mxu1 %v1411_v8 }
 0x1c3   : > { %1626 = vmatmul.mubr.bf16.gmra.mxu1 %v1410_v10 }
 0x1eb   : > { %v3836_v26 = vpop.f32.mrf.mxu0 }
 0x1ed   : > { %v1668_v27 = vpop.f32.mrf.mxu0 }
 0x1ef   : > { %v3837_v33 = vpop.f32.mrf.mxu0 }
 0x1f1   : > { %v1671_v39 = vpop.f32.mrf.mxu0 }
 0x1f3   : > { %v3840_v48 = vpop.f32.mrf.mxu0 }
 0x1f5   : > { %v1684_v54 = vpop.f32.mrf.mxu0 }
 0x1f7   : > { %v3841_v25 = vpop.f32.mrf.mxu0 }
 0x1f9   : > { %v1687_v13 = vpop.f32.mrf.mxu0 }
 0x267   : > { %v3755_v30 = vpop.f32.mrf.mxu1 }
 0x269   : > { %v3756_v32 = vpop.f32.mrf.mxu1 }
 0x26a   : > { %v3757_v7 = vadd.f32 %v3756_v32, %v3755_v30 }
 0x26b   : > { %v3758_v19 = vpop.f32.mrf.mxu1 }
 0x26c   : > { %v1669_v34 = vadd.f32 %v3757_v7, %v1668_v27  ;;  %v4341_v27 = vld [vmem:[%s4474_s29 + $0x20] ss:$0 sps:$4 sm:$0xff]  }
 0x26d   : > { %v3759_v38 = vpop.f32.mrf.mxu1  ;;  %3906 = vmatprep.subr.msk.bf16.mxu1 %vm2352_vm9, %v4341_v27 }
 0x26e   : > { %v1706_v35 = vmul.f32 %v4932_v31, %v1669_v34  ;;  %v3760_v41 = vadd.f32 %v3759_v38, %v3758_v19 }
 0x270   : > { %v1721_v42 = vadd.f32 %v4935_v20, %v1706_v35  ;;  %v1672_v40 = vadd.f32 %v3760_v41, %v1671_v39 }
 0x272   : > { %v1729_v43 = vmax.f32 %v1721_v42, 0.0  ;;  %v1707_v3 = vmul.f32 %v4932_v31, %v1672_v40 }
 0x273   : > { %v3761_v44 = vpop.f32.mrf.mxu1 }
 0x274   : > { %1758 = vst.msk [vmem:[#allocation3 + $0x19] sm:$0xff] %vm1737_vm6, %v1729_v43  ;;  %v1722_v4 = vadd.f32 %v4935_v20, %v1707_v3  ;;  %v4342_v43 = vld [vmem:[%s4474_s29 + $0x18] sm:$0xff]  }
 0x275   : > { %v3762_v45 = vpop.f32.mrf.mxu1 }
 0x276   : > { %v1730_v46 = vmax.f32 %v1722_v4, 0.0  ;;  %v3763_v47 = vadd.f32 %v3762_v45, %v3761_v44 }
 0x277   : > { %v3764_v49 = vpop.f32.mrf.mxu1 }
 0x278   : > { %1759 = vst.msk [vmem:[#allocation3 + $0x21] sm:$0xff] %vm1737_vm6, %v1730_v46  ;;  %v1677_v50 = vadd.f32 %v3836_v26, %v3763_v47  ;;  %v4343_v46 = vld [vmem:[%s4474_s29 + $0x10] sm:$0xff]  }
 0x279   : > { %v3765_v51 = vpop.f32.mrf.mxu1 }
 0x27a   : > { %v1708_v52 = vmul.f32 %v4932_v31, %v1677_v50  ;;  %v3766_v53 = vadd.f32 %v3765_v51, %v3764_v49 }
 0x27b   : > { %v3767_v55 = vpop.f32.mrf.mxu1  ;;  %v4946_v2 = vld [vmem:[#allocation3 + $0x18] sm:$0xff] }
 0x27c   : > { %v1723_v56 = vadd.f32 %v4935_v20, %v1708_v52  ;;  %v1680_v60 = vadd.f32 %v3837_v33, %v3766_v53  ;;  %v1911_v6 = vld [vmem:[#allocation3 + $0x19] sm:$0xff]  ;;  %v2354_v33 = vsel %vm2352_vm9, %v4341_v27, 0  ;;  %v1902_v27 = vld [vmem:[#allocation3 + $0x8] sm:$0xff] }
 0x27d   : > { %v3768_v61 = vpop.f32.mrf.mxu1  ;;  %3855 = vmatpush3.bf16.msra.mxu1 %v2354_v33  ;;  %v4344_v52 = vld [vmem:[%s4474_s29 + $0x8] sm:$0xff]  }
 0x27e   : > { %v1731_v57 = vmax.f32 %v1723_v56, 0.0  ;;  %v1709_v63 = vmul.f32 %v4932_v31, %v1680_v60  ;;  %v3769_v0 = vadd.f32 %v3768_v61, %v3767_v55  ;;  %3856 = vmatprep.subr.bf16.mxu1 %v4342_v43 }
 0x27f   : > { %v3770_v5 = vpop.f32.mrf.mxu1  ;;  %v4948_v21 = vld [vmem:[#allocation3 + $0x20] sm:$0xff] }
 0x280   : > { %v1912_v29 = vld [vmem:[#allocation3 + $0x21] sm:$0xff]  ;;  %1760 = vst.msk [vmem:[#allocation3 + $0x31] sm:$0xff] %vm1737_vm6, %v1731_v57  ;;  %v1724_v28 = vadd.f32 %v4935_v20, %v1709_v63  ;;  %v1685_v59 = vadd.f32 %v3769_v0, %v1684_v54  ;;  %v4108_v36 = vpack.i.bf16 %v4948_v21, %v4946_v2 }
 0x281   : > { %v4098_v8 = vpack.i.bf16 %v1912_v29, %v1911_v6  ;;  %v3771_v37 = vpop.f32.mrf.mxu1  ;;  %v1919_v9 = vld [vmem:[#allocation3 + $0x1a] sm:$0xff]  ;;  %v1920_v10 = vld [vmem:[#allocation3 + $0x22] sm:$0xff]  ;;  %3857 = vmatpush3.bf16.msra.mxu1 %v4342_v43 }
 0x282   : > { %v1732_v58 = vmax.f32 %v1724_v28, 0.0  ;;  %v1710_v12 = vmul.f32 %v4932_v31, %v1685_v59  ;;  %4109 = vrot.lane.b32.xlu0 %v4108_v36, %s4431_s1  ;;  %v3772_v62 = vadd.f32 %v3771_v37, %v3770_v5  ;;  %v4103_v17 = vpack.i.bf16 %v1920_v10, %v1919_v9  ;;  %3858 = vmatprep.subr.bf16.mxu1 %v4343_v46  ;;  %v1972_v37 = vld [vmem:[#allocation3 + $0x7a] sm:$0xff]  ;;  %v1973_v9 = vld [vmem:[#allocation3 + $0x82] sm:$0xff] }
 0x283   : > { %4099 = vrot.lane.b32.xlu1 %v4098_v8, %s4427_s22  ;;  %v3773_v14 = vpop.f32.mrf.mxu1 }
 0x284   : > { %1761 = vst.msk [vmem:[#allocation3 + $0x39] sm:$0xff] %vm1737_vm6, %v1732_v58  ;;  %v1725_v15 = vadd.f32 %v4935_v20, %v1710_v12  ;;  %v1688_v16 = vadd.f32 %v3772_v62, %v1687_v13  ;;  %v4233_v58 = vpack.i.bf16 %v1973_v9, %v1972_v37  ;;  %v4080_v12 = vpop.permute.xlu0 %4079  ;;  %v5015_v62 = vpop.permute.xlu1 %4089 }
 0x285   : > { %v3774_v18 = vpop.f32.mrf.mxu1  ;;  %3859 = vmatpush3.bf16.msra.mxu1 %v4343_v46 }
 0x286   : > { %v1733_v22 = vmax.f32 %v1725_v15, 0.0  ;;  %v1711_v23 = vmul.f32 %v4932_v31, %v1688_v16  ;;  %4114 = vrot.lane.b32.xlu0 %v4098_v8, %s4425_s16  ;;  %v3775_v24 = vadd.f32 %v3774_v18, %v3773_v14  ;;  %3860 = vmatprep.subr.bf16.mxu1 %v4344_v52 }
 0x287   : > { %4104 = vrot.lane.b32.xlu1 %v4103_v17, %s4429_s26  ;;  %v3776_v26 = vpop.f32.mrf.mxu1  ;;  %v4969_v35 = vld [vmem:[#allocation3 + $0x30] sm:$0xff] }
 0x288   : > { %1762 = vst.msk [vmem:[#allocation3 + $0x49] sm:$0xff] %vm1737_vm6, %v1733_v22  ;;  %v1726_v30 = vadd.f32 %v4935_v20, %v1711_v23  ;;  %v1693_v32 = vadd.f32 %v3840_v48, %v3775_v24  ;;  %v1958_v45 = vld [vmem:[#allocation3 + $0x31] sm:$0xff]  ;;  %v4085_v13 = vpop.permute.xlu0 %4084  ;;  %v5017_v14 = vpop.permute.xlu1 %4094  ;;  %v4082_v23 = vunpack.i.h.bf16 %v4080_v12  ;;  %v4081_v24 = vunpack.i.l.bf16 %v4080_v12 }
 0x289   : > { %v3777_v7 = vpop.f32.mrf.mxu1  ;;  %3861 = vmatpush3.bf16.msra.mxu1 %v4344_v52 }
 0x28a   : > { %v1734_v19 = vmax.f32 %v1726_v30, 0.0  ;;  %v1712_v34 = vmul.f32 %v4932_v31, %v1693_v32  ;;  %4119 = vrot.lane.b32.xlu0 %v4103_v17, %s4432_s2  ;;  %v3778_v38 = vadd.f32 %v3777_v7, %v3776_v26  ;;  %v1901_v26 = vld [vmem:[#allocation3] sm:$0xff]  ;;  %v4087_v30 = vunpack.i.h.bf16 %v4085_v13 }
 0x28b   : > { %v4971_v41 = vld [vmem:[#allocation3 + $0x38] sm:$0xff]  ;;  %v4086_v32 = vunpack.i.l.bf16 %v4085_v13 }
 0x28c   : > { %1763 = vst.msk [vmem:[#allocation3 + $0x51] sm:$0xff] %vm1737_vm6, %v1734_v19  ;;  %v1727_v39 = vadd.f32 %v4935_v20, %v1712_v34  ;;  %v1696_v42 = vadd.f32 %v3841_v25, %v3778_v38  ;;  %v4138_v40 = vpack.i.bf16 %v4971_v41, %v4969_v35  ;;  %v1959_v3 = vld [vmem:[#allocation3 + $0x39] sm:$0xff]  ;;  %v2231_v19 = vsel %vm1737_vm6, %v1902_v27, %v4082_v23 }
 0x28d   : > { %v4143_v48 = vpack.i.bf16 %v1959_v3, %v1958_v45  ;;  %v1966_v49 = vld [vmem:[#allocation3 + $0x32] sm:$0xff]  ;;  %v1967_v50 = vld [vmem:[#allocation3 + $0x3a] sm:$0xff]  ;;  %v2230_v34 = vsel %vm1737_vm6, %v1901_v26, %v4081_v24  ;;  %v2240_v3 = vsel %vm2238_vm8, %v2231_v19, %v4087_v30 }
 0x28e   : > { %v1735_v44 = vmax.f32 %v1727_v39, 0.0  ;;  %v1713_v4 = vmul.f32 %v4932_v31, %v1696_v42  ;;  %4139 = vrot.lane.b32.xlu0 %v4138_v40, %s4428_s23  ;;  %4124 = vrot.lane.b32.xlu1 %v4138_v40, %s4431_s1  ;;  %v4148_v31 = vpack.i.bf16 %v1967_v50, %v1966_v49  ;;  %v2239_v43 = vsel %vm2238_vm8, %v2230_v34, %v4086_v32 }
 0x28f   : > { %v4995_v56 = vld [vmem:[#allocation3 + $0x48] sm:$0xff] }
 0x290   : > { %1764 = vst.msk [vmem:[#allocation3 + $0x61] sm:$0xff] %vm1737_vm6, %v1735_v44  ;;  %v1728_v47 = vadd.f32 %v4935_v20, %v1713_v4  ;;  %v4345_v20 = vld [vmem:[%s4474_s29] sm:$0xff]  }
 0x291   : > { %3862 = vmatprep.subr.bf16.mxu1 %v4345_v20  ;;  %v1960_v63 = vld [vmem:[#allocation3 + $0x49] sm:$0xff] }
 0x292   : > { %v1736_v51 = vmax.f32 %v1728_v47, 0.0  ;;  %4144 = vrot.lane.b32.xlu0 %v4143_v48, %s4430_s28  ;;  %4129 = vrot.lane.b32.xlu1 %v4143_v48, %s4425_s16 }
 0x293   : > { %v1968_v53 = vld [vmem:[#allocation3 + $0x4a] sm:$0xff]  ;;  %v1969_v54 = vld [vmem:[#allocation3 + $0x52] sm:$0xff]  ;;  %3863 = vmatpush3.bf16.msra.mxu1 %v4345_v20 }
 0x294   : > { %1765 = vst.msk [vmem:[#allocation3 + $0x69] sm:$0xff] %vm1737_vm6, %v1736_v51  ;;  %v4991_v55 = vld [vmem:[#allocation3 + $0x50] sm:$0xff]  ;;  %v4173_v60 = vpack.i.bf16 %v1969_v54, %v1968_v53  ;;  %2986 = vmatprep.subr.bf16.mxu1 %v4422_v1 }
 0x295   : > { %v4163_v61 = vpack.i.bf16 %v4991_v55, %v4995_v56  ;;  %v1961_v57 = vld [vmem:[#allocation3 + $0x51] sm:$0xff] }
 0x296   : > { %4149 = vrot.lane.b32.xlu0 %v4148_v31, %s4424_s15  ;;  %4134 = vrot.lane.b32.xlu1 %v4148_v31, %s4432_s2  ;;  %v4168_v0 = vpack.i.bf16 %v1961_v57, %v1960_v63 }
 0x297   : > { %v1954_v5 = vld [vmem:[#allocation3 + $0x60] sm:$0xff] }
 0x298   : > { %v1962_v28 = vld [vmem:[#allocation3 + $0x61] sm:$0xff] }
 0x29a   : > { %4159 = vrot.lane.b32.xlu0 %v4148_v31, %s4429_s26  ;;  %4154 = vrot.lane.b32.xlu1 %v4143_v48, %s4427_s22 }
 0x29b   : > { %v1955_v25 = vld [vmem:[#allocation3 + $0x68] sm:$0xff] }
 0x29c   : > { %v4218_v6 = vpack.i.bf16 %v1955_v25, %v1954_v5  ;;  %v1963_v29 = vld [vmem:[#allocation3 + $0x69] sm:$0xff] }
 0x29d   : > { %v4223_v59 = vpack.i.bf16 %v1963_v29, %v1962_v28  ;;  %v1970_v36 = vld [vmem:[#allocation3 + $0x62] sm:$0xff]  ;;  %v1971_v8 = vld [vmem:[#allocation3 + $0x6a] sm:$0xff] }
 0x29e   : > { %4174 = vrot.lane.b32.xlu0 %v4173_v60, %s4424_s15  ;;  %4164 = vrot.lane.b32.xlu1 %v4163_v61, %s4428_s23  ;;  %v4228_v10 = vpack.i.bf16 %v1971_v8, %v1970_v36 }
 0x2a2   : > { %4189 = vrot.lane.b32.xlu0 %v4163_v61, %s4431_s1  ;;  %4169 = vrot.lane.b32.xlu1 %v4168_v0, %s4430_s28 }
 0x2a6   : > { %4194 = vrot.lane.b32.xlu0 %v4168_v0, %s4425_s16  ;;  %4179 = vrot.lane.b32.xlu1 %v4168_v0, %s4427_s22 }
 0x2aa   : > { %4199 = vrot.lane.b32.xlu0 %v4173_v60, %s4432_s2  ;;  %4184 = vrot.lane.b32.xlu1 %v4173_v60, %s4429_s26 }
 0x2ae   : > { %4219 = vrot.lane.b32.xlu0 %v4218_v6, %s4428_s23  ;;  %4204 = vrot.lane.b32.xlu1 %v4218_v6, %s4431_s1 }
 0x2b2   : > { %4224 = vrot.lane.b32.xlu0 %v4223_v59, %s4430_s28  ;;  %4209 = vrot.lane.b32.xlu1 %v4223_v59, %s4425_s16 }
 0x2b6   : > { %4229 = vrot.lane.b32.xlu0 %v4228_v10, %s4424_s15  ;;  %4214 = vrot.lane.b32.xlu1 %v4228_v10, %s4432_s2 }
 0x2ba   : > { %4234 = vrot.lane.b32.xlu1 %v4233_v58, %s4424_s15 }
 0x2f4   : > { %v4110_v15 = vpop.permute.xlu0 %4109 }
 0x2f5   : > { %v5019_v16 = vpop.permute.xlu1 %4099  ;;  %v4112_v38 = vunpack.i.h.bf16 %v4110_v15  ;;  %v4111_v39 = vunpack.i.l.bf16 %v4110_v15 }
 0x2f6   : > { %v4102_v37 = vunpack.i.h.bf16 %v5019_v16  ;;  %v4101_v9 = vunpack.i.l.bf16 %v5019_v16 }
 0x2f7   : > { %v2249_v49 = vsel %vm2247_vm10, %v2240_v3, %v4112_v38  ;;  %v2248_v50 = vsel %vm2247_vm10, %v2239_v43, %v4111_v39 }
 0x2f8   : > { %v4115_v17 = vpop.permute.xlu0 %4114  ;;  %v2233_v24 = vsel %vm1737_vm6, %v4948_v21, %v4102_v37  ;;  %v2232_v16 = vsel %vm1737_vm6, %v4946_v2, %v4101_v9 }
 0x2f9   : > { %v5021_v18 = vpop.permute.xlu1 %4104  ;;  %v4117_v42 = vunpack.i.h.bf16 %v4115_v17  ;;  %v4116_v40 = vunpack.i.l.bf16 %v4115_v17 }
 0x2fa   : > { %v4107_v10 = vunpack.i.h.bf16 %v5021_v18  ;;  %v4106_v58 = vunpack.i.l.bf16 %v5021_v18 }
 0x2fb   : > { %v2256_v52 = vsel %vm1057_vm2, %v2248_v50, %v4116_v40  ;;  %v2257_v20 = vsel %vm1057_vm2, %v2249_v49, %v4117_v42 }
 0x2fc   : > { %v4120_v22 = vpop.permute.xlu0 %4119  ;;  %v2241_v18 = vsel %vm2238_vm8, %v2232_v16, %v4106_v58  ;;  %v2242_v30 = vsel %vm2238_vm8, %v2233_v24, %v4107_v10 }
 0x2fd   : > { %v4122_v44 = vunpack.i.h.bf16 %v4120_v22  ;;  %v4121_v4 = vunpack.i.l.bf16 %v4120_v22 }
 0x2ff   : > { %v2265_v53 = vsel %vm2264_vm11, %v2256_v52, %v4121_v4  ;;  %v2266_v54 = vsel %vm2264_vm11, %v2257_v20, %v4122_v44 }
 0x300   : > { %v4140_v7 = vpop.permute.xlu0 %4139  ;;  %v5023_v33 = vpop.permute.xlu1 %4124 }
 0x301   : > { %v4142_v47 = vunpack.i.h.bf16 %v4140_v7  ;;  %v4141_v48 = vunpack.i.l.bf16 %v4140_v7  ;;  %v4127_v12 = vunpack.i.h.bf16 %v5023_v33  ;;  %v4126_v13 = vunpack.i.l.bf16 %v5023_v33 }
 0x303   : > { %v2275_v57 = vsel %vm2273_vm12, %v2266_v54, %v4142_v47  ;;  %v2274_v63 = vsel %vm2273_vm12, %v2265_v53, %v4141_v48  ;;  %v2251_v33 = vsel %vm2247_vm10, %v2242_v30, %v4127_v12  ;;  %v2250_v19 = vsel %vm2247_vm10, %v2241_v18, %v4126_v13 }
 0x304   : > { %v4145_v45 = vpop.permute.xlu0 %4144  ;;  %v4130_v46 = vpop.permute.xlu1 %4129 }
 0x305   : > { %v4147_v51 = vunpack.i.h.bf16 %v4145_v45  ;;  %v4146_v31 = vunpack.i.l.bf16 %v4145_v45  ;;  %v4132_v15 = vunpack.i.h.bf16 %v4130_v46  ;;  %v4131_v17 = vunpack.i.l.bf16 %v4130_v46 }
 0x307   : > { %v2283_v5 = vsel %vm2282_vm13, %v2274_v63, %v4146_v31  ;;  %v2284_v6 = vsel %vm2282_vm13, %v2275_v57, %v4147_v51  ;;  %v2258_v34 = vsel %vm1057_vm2, %v2250_v19, %v4131_v17  ;;  %v2259_v38 = vsel %vm1057_vm2, %v2251_v33, %v4132_v15 }
 0x308   : > { %v4150_v60 = vpop.permute.xlu0 %4149  ;;  %v4135_v61 = vpop.permute.xlu1 %4134 }
 0x309   : > { %v4152_v0 = vunpack.i.h.bf16 %v4150_v60  ;;  %v4151_v25 = vunpack.i.l.bf16 %v4150_v60  ;;  %v4137_v26 = vunpack.i.h.bf16 %v4135_v61  ;;  %v4136_v27 = vunpack.i.l.bf16 %v4135_v61 }
 0x30b   : > { %v2291_v29 = vsel %vm1359_vm4, %v2283_v5, %v4151_v25  ;;  %v2292_v28 = vsel %vm1359_vm4, %v2284_v6, %v4152_v0  ;;  %v2267_v2 = vsel %vm2264_vm11, %v2258_v34, %v4136_v27  ;;  %v2268_v42 = vsel %vm2264_vm11, %v2259_v38, %v4137_v26 }
 0x30c   : > { %v2299_v59 = vpack.c.bf16 %v2292_v28, %v2291_v29  ;;  %v4160_v36 = vpop.permute.xlu0 %4159  ;;  %v4155_v8 = vpop.permute.xlu1 %4154  ;;  %v4092_v5 = vunpack.i.h.bf16 %v5015_v62  ;;  %v4091_v6 = vunpack.i.l.bf16 %v5015_v62 }
 0x30d   : > { %v4157_v31 = vunpack.i.h.bf16 %v4155_v8  ;;  %v4156_v52 = vunpack.i.l.bf16 %v4155_v8  ;;  %v4162_v53 = vunpack.i.h.bf16 %v4160_v36  ;;  %v4161_v54 = vunpack.i.l.bf16 %v4160_v36 }
 0x30e   : > { %3864 = vmatprep.mubr.msk.bf16.mxu1 %vm2339_vm14, %v2299_v59 }
 0x30f   : > { %v2234_v57 = vsel %vm1737_vm6, %v4969_v35, %v4156_v52  ;;  %v2235_v63 = vsel %vm1737_vm6, %v4971_v41, %v4157_v31  ;;  %v4097_v35 = vunpack.i.h.bf16 %v5017_v14  ;;  %v4096_v41 = vunpack.i.l.bf16 %v5017_v14 }
 0x310   : > { %v4175_v22 = vpop.permute.xlu0 %4174  ;;  %v4165_v23 = vpop.permute.xlu1 %4164  ;;  %v2243_v29 = vsel %vm2238_vm8, %v2234_v57, %v4161_v54  ;;  %v2244_v28 = vsel %vm2238_vm8, %v2235_v63, %v4162_v53 }
 0x311   : > { %v4167_v32 = vunpack.i.h.bf16 %v4165_v23  ;;  %v4166_v7 = vunpack.i.l.bf16 %v4165_v23  ;;  %v4177_v3 = vunpack.i.h.bf16 %v4175_v22  ;;  %v4176_v44 = vunpack.i.l.bf16 %v4175_v22 }
 0x313   : > { %v2277_v4 = vsel %vm2273_vm12, %v2268_v42, %v4167_v32  ;;  %v2276_v45 = vsel %vm2273_vm12, %v2267_v2, %v4166_v7 }
 0x314   : > { %v4190_v21 = vpop.permute.xlu0 %4189  ;;  %v4170_v39 = vpop.permute.xlu1 %4169 }
 0x315   : > { %v4172_v40 = vunpack.i.h.bf16 %v4170_v39  ;;  %v4171_v43 = vunpack.i.l.bf16 %v4170_v39  ;;  %v4192_v0 = vunpack.i.h.bf16 %v4190_v21  ;;  %v4191_v25 = vunpack.i.l.bf16 %v4190_v21 }
 0x317   : > { %v2285_v46 = vsel %vm2282_vm13, %v2276_v45, %v4171_v43  ;;  %v2286_v47 = vsel %vm2282_vm13, %v2277_v4, %v4172_v40  ;;  %v2252_v58 = vsel %vm2247_vm10, %v2243_v29, %v4191_v25  ;;  %v2253_v12 = vsel %vm2247_vm10, %v2244_v28, %v4192_v0 }
 0x318   : > { %v2293_v48 = vsel %vm1359_vm4, %v2285_v46, %v4176_v44  ;;  %v2294_v49 = vsel %vm1359_vm4, %v2286_v47, %v4177_v3  ;;  %v4195_v50 = vpop.permute.xlu0 %4194  ;;  %v4180_v51 = vpop.permute.xlu1 %4179 }
 0x319   : > { %v2300_v20 = vpack.c.bf16 %v2294_v49, %v2293_v48  ;;  %v4197_v8 = vunpack.i.h.bf16 %v4195_v50  ;;  %v4196_v37 = vunpack.i.l.bf16 %v4195_v50  ;;  %v4182_v9 = vunpack.i.h.bf16 %v4180_v51 }
 0x31a   : > { %v4181_v10 = vunpack.i.l.bf16 %v4180_v51 }
 0x31b   : > { %3865 = vmatmul.mubr.msk.bf16.vlgmr.msra.gmra.mxu1 %vm2339_vm14, %v2300_v20  ;;  %v2260_v18 = vsel %vm1057_vm2, %v2252_v58, %v4196_v37  ;;  %v2261_v30 = vsel %vm1057_vm2, %v2253_v12, %v4197_v8  ;;  %v2237_v14 = vsel %vm1737_vm6, %v4991_v55, %v4182_v9  ;;  %v5111_v37 = vld [vmem:[%s4479_s3] ss:$0 sm:$0xff] }
 0x31c   : > { %v4200_v60 = vpop.permute.xlu0 %4199  ;;  %v4185_v61 = vpop.permute.xlu1 %4184  ;;  %v2236_v32 = vsel %vm1737_vm6, %v4995_v56, %v4181_v10  ;;  %v5114_v10 = vld [vmem:[%s4499_s24] ss:$0 sm:$0xff] }
 0x31d   : > { %v4202_v13 = vunpack.i.h.bf16 %v4200_v60  ;;  %v4201_v62 = vunpack.i.l.bf16 %v4200_v60  ;;  %v4187_v15 = vunpack.i.h.bf16 %v4185_v61  ;;  %v4186_v17 = vunpack.i.l.bf16 %v4185_v61  ;;  %v5117_v58 = vld [vmem:[%s4484_s8] ss:$0 sm:$0xff] }
 0x31f   : > { %v2269_v38 = vsel %vm2264_vm11, %v2260_v18, %v4201_v62  ;;  %v2270_v21 = vsel %vm2264_vm11, %v2261_v30, %v4202_v13  ;;  %v2245_v39 = vsel %vm2238_vm8, %v2236_v32, %v4186_v17  ;;  %v2246_v2 = vsel %vm2238_vm8, %v2237_v14, %v4187_v15 }
 0x320   : > { %v4220_v59 = vpop.permute.xlu0 %4219  ;;  %v4205_v36 = vpop.permute.xlu1 %4204 }
 0x321   : > { %v4222_v22 = vunpack.i.h.bf16 %v4220_v59  ;;  %v4221_v23 = vunpack.i.l.bf16 %v4220_v59  ;;  %v4207_v24 = vunpack.i.h.bf16 %v4205_v36  ;;  %v4206_v16 = vunpack.i.l.bf16 %v4205_v36  ;;  %v3659_v36 = vld [vmem:[%s4494_s19] ss:$0 sm:$0xff] }
 0x323   : > { %v2278_v42 = vsel %vm2273_vm12, %v2269_v38, %v4221_v23  ;;  %v2279_v40 = vsel %vm2273_vm12, %v2270_v21, %v4222_v22  ;;  %v2254_v55 = vsel %vm2247_vm10, %v2245_v39, %v4206_v16  ;;  %v2255_v56 = vsel %vm2247_vm10, %v2246_v2, %v4207_v24 }
 0x324   : > { %v4225_v26 = vpop.permute.xlu0 %4224  ;;  %v4210_v27 = vpop.permute.xlu1 %4209 }
 0x325   : > { %v4227_v7 = vunpack.i.h.bf16 %v4225_v26  ;;  %v4226_v33 = vunpack.i.l.bf16 %v4225_v26  ;;  %v4212_v19 = vunpack.i.h.bf16 %v4210_v27  ;;  %v4211_v34 = vunpack.i.l.bf16 %v4210_v27 }
 0x327   : > { %v2287_v47 = vsel %vm2282_vm13, %v2278_v42, %v4226_v33  ;;  %v2288_v48 = vsel %vm2282_vm13, %v2279_v40, %v4227_v7  ;;  %v2262_v49 = vsel %vm1057_vm2, %v2254_v55, %v4211_v34  ;;  %v2263_v50 = vsel %vm1057_vm2, %v2255_v56, %v4212_v19 }
 0x328   : > { %v4230_v43 = vpop.permute.xlu0 %4229  ;;  %v4215_v3 = vpop.permute.xlu1 %4214 }
 0x329   : > { %v4232_v44 = vunpack.i.h.bf16 %v4230_v43  ;;  %v4231_v4 = vunpack.i.l.bf16 %v4230_v43  ;;  %v4217_v45 = vunpack.i.h.bf16 %v4215_v3  ;;  %v4216_v46 = vunpack.i.l.bf16 %v4215_v3 }
 0x32b   : > { %v2295_v51 = vsel %vm1359_vm4, %v2287_v47, %v4231_v4  ;;  %v2296_v31 = vsel %vm1359_vm4, %v2288_v48, %v4232_v44  ;;  %v2271_v52 = vsel %vm2264_vm11, %v2262_v49, %v4216_v46  ;;  %v2272_v20 = vsel %vm2264_vm11, %v2263_v50, %v4217_v45 }
 0x32c   : > { %v2301_v53 = vpack.c.bf16 %v2296_v31, %v2295_v51  ;;  %v2280_v54 = vsel %vm2273_vm12, %v2271_v52, %v4091_v6  ;;  %v2281_v60 = vsel %vm2273_vm12, %v2272_v20, %v4092_v5  ;;  %v4235_v61 = vpop.permute.xlu1 %4234  ;;  %v3848_v6 = vpop.f32.mrf.mxu0 }
 0x32d   : > { %v4237_v57 = vunpack.i.h.bf16 %v4235_v61  ;;  %v4236_v63 = vunpack.i.l.bf16 %v4235_v61  ;;  %v2289_v0 = vsel %vm2282_vm13, %v2280_v54, %v4096_v41  ;;  %v2290_v25 = vsel %vm2282_vm13, %v2281_v60, %v4097_v35 }
 0x32e   : > { %3868 = vmatprep.mubr.msk.bf16.mxu1 %vm2339_vm14, %v2301_v53  ;;  %v1840_v5 = vpop.f32.mrf.mxu0  ;;  %v1880_v9 = vmul.f32 %v3848_v6, %v3659_v36 }
 0x32f   : > { %v2297_v29 = vsel %vm1359_vm4, %v2289_v0, %v4236_v63  ;;  %v2298_v28 = vsel %vm1359_vm4, %v2290_v25, %v4237_v57  ;;  %v1878_v41 = vmul.f32 %v3659_v36, %v1840_v5 }
 0x330   : > { %v2302_v59 = vpack.c.bf16 %v2298_v28, %v2297_v29  ;;  %v3849_v8 = vpop.f32.mrf.mxu0  ;;  %v1895_v17 = vadd.f32 %v5114_v10, %v1880_v9 }
 0x331   : > { %v1881_v13 = vmul.f32 %v3849_v8, %v3659_v36  ;;  %v1893_v24 = vadd.f32 %v5114_v10, %v1878_v41 }
 0x332   : > { %3869 = vmatmul.mubr.msk.bf16.gmra.mxu1 %vm2339_vm14, %v2302_v59  ;;  %v1843_v62 = vpop.f32.mrf.mxu0 }
 0x333   : > { %v1879_v26 = vmul.f32 %v3659_v36, %v1843_v62  ;;  %v1896_v14 = vadd.f32 %v5114_v10, %v1881_v13 }
 0x334   : > { %v3852_v55 = vpop.f32.mrf.mxu0 }
 0x335   : > { %v1894_v38 = vadd.f32 %v5114_v10, %v1879_v26  ;;  %v1884_v46 = vmul.f32 %v3852_v55, %v3659_v36  ;;  %v2536_v26 = vld [vmem:[#allocation6 + $0x1] sm:$0xff] }
 0x336   : > { %v1856_v43 = vpop.f32.mrf.mxu0 }
 0x337   : > { %v1882_v49 = vmul.f32 %v3659_v36, %v1856_v43  ;;  %v1899_v54 = vadd.f32 %v5114_v10, %v1884_v46 }
 0x338   : > { %v3853_v45 = vpop.f32.mrf.mxu0 }
 0x339   : > { %v1885_v52 = vmul.f32 %v3853_v45, %v3659_v36  ;;  %v1897_v57 = vadd.f32 %v5114_v10, %v1882_v49  ;;  %v2548_v45 = vld [vmem:[#allocation6 + $0x30] sm:$0xff] }
 0x33a   : > { %v1859_v20 = vpop.f32.mrf.mxu0 }
 0x33b   : > { %v1883_v0 = vmul.f32 %v3659_v36, %v1859_v20  ;;  %v1900_v59 = vadd.f32 %v5114_v10, %v1885_v52 }
 0x3db   : > { %v3866_v35 = vpop.f32.mrf.mxu1 }
 0x3dc   : > { %v2430_v12 = vmul.f32 %v3866_v35, %v5111_v37  ;;  %v1898_v35 = vadd.f32 %v5114_v10, %v1883_v0 }
 0x3dd   : > { %v2390_v15 = vpop.f32.mrf.mxu1 }
 0x3de   : > { %v2445_v22 = vadd.f32 %v5117_v58, %v2430_v12  ;;  %v2428_v23 = vmul.f32 %v5111_v37, %v2390_v15 }
 0x3df   : > { %v3867_v16 = vpop.f32.mrf.mxu1 }
 0x3e0   : > { %v2453_v27 = vadd.f32 %v2445_v22, %v1895_v17  ;;  %v2443_v18 = vadd.f32 %v5117_v58, %v2428_v23  ;;  %v2431_v30 = vmul.f32 %v3867_v16, %v5111_v37  ;;  %v4347_v16 = vld [vmem:[%s4504_s30 + $0x18] sm:$0xff]  }
 0x3e1   : > { %v2393_v32 = vpop.f32.mrf.mxu1 }
 0x3e2   : > { %v2461_v7 = vmax.f32 %v2453_v27, 0.0  ;;  %v2451_v33 = vadd.f32 %v2443_v18, %v1893_v24  ;;  %v2446_v19 = vadd.f32 %v5117_v58, %v2431_v30  ;;  %v2429_v34 = vmul.f32 %v5111_v37, %v2393_v32  ;;  %v4346_v24 = vld [vmem:[%s4504_s30 + $0x20] ss:$0 sps:$4 sm:$0xff]  }
 0x3e3   : > { %v2674_v10 = vsel %vm2352_vm9, %v4346_v24, 0 }
 0x3e4   : > { %2488 = vst.msk [vmem:[#allocation4 + $0x31] sm:$0xff] %vm1737_vm6, %v2461_v7  ;;  %v2459_v21 = vmax.f32 %v2451_v33, 0.0  ;;  %v2454_v39 = vadd.f32 %v2446_v19, %v1896_v14  ;;  %v2444_v2 = vadd.f32 %v5117_v58, %v2429_v34  ;;  %3873 = vmatpush3.bf16.msra.mxu0 %v2674_v10 }
 0x3e5   : > { %3874 = vmatprep.subr.bf16.mxu0 %v4423_v11 }
 0x3e6   : > { %2486 = vst.msk [vmem:[#allocation4 + $0x19] sm:$0xff] %vm1737_vm6, %v2459_v21  ;;  %v2462_v42 = vmax.f32 %v2454_v39, 0.0  ;;  %v2452_v40 = vadd.f32 %v2444_v2, %v1894_v38 }
 0x3e8   : > { %2489 = vst.msk [vmem:[#allocation4 + $0x39] sm:$0xff] %vm1737_vm6, %v2462_v42  ;;  %v2460_v56 = vmax.f32 %v2452_v40, 0.0  ;;  %3875 = vmatpush3.bf16.msra.mxu0 %v4347_v16  ;;  %v4348_v42 = vld [vmem:[%s4504_s30 + $0x10] sm:$0xff]   ;;  %v4349_v40 = vld [vmem:[%s4504_s30 + $0x8] sm:$0xff]  }
 0x3e9   : > { %3876 = vmatprep.subr.bf16.mxu0 %v4423_v11 }
 0x3ea   : > { %2487 = vst.msk [vmem:[#allocation4 + $0x21] sm:$0xff] %vm1737_vm6, %v2460_v56 }
 0x3eb   : > { %v2497_v3 = vld [vmem:[#allocation4 + $0x31] sm:$0xff] }
 0x3ec   : > { %3877 = vmatpush3.bf16.msra.mxu0 %v4348_v42  ;;  %v4352_v42 = vld [vmem:[%s5378_s0 + $0x30] sm:$0xff]  }
 0x3ed   : > { %v2494_v44 = vld [vmem:[#allocation4 + $0x19] sm:$0xff]  ;;  %3878 = vmatprep.subr.bf16.mxu0 %v4423_v11 }
 0x3ee   : > { %v2499_v4 = vmax.f32 %v2494_v44, %v2497_v3 }
 0x3ef   : > { %v2498_v47 = vld [vmem:[#allocation4 + $0x39] sm:$0xff] }
 0x3f0   : > { %2501 = vst.msk [vmem:[#allocation5] sm:$0xff] %vm1737_vm6, %v2499_v4  ;;  %3879 = vmatpush3.bf16.msra.mxu0 %v4349_v40  ;;  %v4350_v4 = vld [vmem:[%s4504_s30] sm:$0xff]   ;;  %v4353_v40 = vld [vmem:[%s5378_s0 + $0x28] sm:$0xff]  }
 0x3f1   : > { %v2495_v48 = vld [vmem:[#allocation4 + $0x21] sm:$0xff]  ;;  %3880 = vmatprep.subr.bf16.mxu0 %v4423_v11 }
 0x3f2   : > { %v2500_v50 = vmax.f32 %v2495_v48, %v2498_v47  ;;  %v3870_v51 = vpop.f32.mrf.mxu1 }
 0x3f3   : > { %v2434_v31 = vmul.f32 %v3870_v51, %v5111_v37  ;;  %v2550_v51 = vld [vmem:[#allocation6 + $0x31] sm:$0xff] }
 0x3f4   : > { %2502 = vst.msk [vmem:[#allocation5 + $0x8] sm:$0xff] %vm1737_vm6, %v2500_v50  ;;  %v2406_v53 = vpop.f32.mrf.mxu1  ;;  %3881 = vmatpush3.bf16.msra.mxu0 %v4350_v4  ;;  %v2552_v50 = vld [vmem:[#allocation6 + $0x32] sm:$0xff] }
 0x3f5   : > { %v2449_v60 = vadd.f32 %v5117_v58, %v2434_v31  ;;  %v2432_v61 = vmul.f32 %v5111_v37, %v2406_v53  ;;  %3886 = vmatprep.subr.bf16.mxu0 %v4423_v11 }
 0x3f6   : > { %v3871_v63 = vpop.f32.mrf.mxu1 }
 0x3f7   : > { %v2457_v25 = vadd.f32 %v2449_v60, %v1899_v54  ;;  %v2447_v29 = vadd.f32 %v5117_v58, %v2432_v61  ;;  %v2435_v28 = vmul.f32 %v3871_v63, %v5111_v37  ;;  %v2534_v61 = vld [vmem:[#allocation6] sm:$0xff] }
 0x3f8   : > { %v2409_v6 = vpop.f32.mrf.mxu1 }
 0x3f9   : > { %v2465_v5 = vmax.f32 %v2457_v25, 0.0  ;;  %v2455_v8 = vadd.f32 %v2447_v29, %v1897_v57  ;;  %v2450_v9 = vadd.f32 %v5117_v58, %v2435_v28  ;;  %v2433_v41 = vmul.f32 %v5111_v37, %v2409_v6 }
 0x3fb   : > { %2492 = vst.msk [vmem:[#allocation4 + $0x61] sm:$0xff] %vm1737_vm6, %v2465_v5  ;;  %v2463_v36 = vmax.f32 %v2455_v8, 0.0  ;;  %v2458_v12 = vadd.f32 %v2450_v9, %v1900_v59  ;;  %v2448_v13 = vadd.f32 %v5117_v58, %v2433_v41  ;;  %v2514_v62 = vld [vmem:[#allocation5] ss:$2 sm:$0xff]  ;;  %v2518_v15 = vld [vmem:[#allocation5 + $0x1] ss:$2 sm:$0xff] }
 0x3fc   : > { %v2521_v17 = vmax.f32 %v2514_v62, %v2518_v15  ;;  %v2538_v58 = vld [vmem:[#allocation6 + $0x2] sm:$0xff] }
 0x3fd   : > { %2490 = vst.msk [vmem:[#allocation4 + $0x49] sm:$0xff] %vm1737_vm6, %v2463_v36  ;;  %v2466_v22 = vmax.f32 %v2458_v12, 0.0  ;;  %v2456_v23 = vadd.f32 %v2448_v13, %v1898_v35 }
 0x3fe   : > { %2532 = vst.msk [vmem:[#allocation6 + $0x11] sm:$0xff] %vm1737_vm6, %v2521_v17 }
 0x3ff   : > { %2493 = vst.msk [vmem:[#allocation4 + $0x69] sm:$0xff] %vm1737_vm6, %v2466_v22  ;;  %v2464_v37 = vmax.f32 %v2456_v23, 0.0 }
 0x401   : > { %2491 = vst.msk [vmem:[#allocation4 + $0x51] sm:$0xff] %vm1737_vm6, %v2464_v37 }
 0x402   : > { %v2507_v27 = vld [vmem:[#allocation4 + $0x61] sm:$0xff] }
 0x404   : > { %v2504_v18 = vld [vmem:[#allocation4 + $0x49] sm:$0xff] }
 0x405   : > { %v2509_v30 = vmax.f32 %v2504_v18, %v2507_v27  ;;  %v2539_v14 = vld [vmem:[#allocation6 + $0x12] sm:$0xff] }
 0x406   : > { %v5158_v32 = vld [vmem:[#allocation6 + $0x11] sm:$0xff]  ;;  %v4243_v7 = vpack.i.bf16 %v2539_v14, %v2538_v58  ;;  %v2508_v19 = vld [vmem:[#allocation4 + $0x69] sm:$0xff] }
 0x407   : > { %v4238_v33 = vpack.i.bf16 %v5158_v32, %v2536_v26  ;;  %2512 = vst.msk [vmem:[#allocation5 + $0x10] sm:$0xff] %vm1737_vm6, %v2509_v30  ;;  %v2540_v56 = vld [vmem:[#allocation6 + $0x10] sm:$0xff] }
 0x408   : > { %v2505_v34 = vld [vmem:[#allocation4 + $0x51] sm:$0xff]  ;;  %4244 = vrot.lane.b32.xlu1 %v4243_v7, %s4429_s26 }
 0x409   : > { %4239 = vrot.lane.b32.xlu0 %v4238_v33, %s4427_s22  ;;  %v2510_v38 = vmax.f32 %v2505_v34, %v2508_v19  ;;  %v2752_v33 = vld [vmem:[%s4534_s12] sm:$0xf]  ;;  %s5380_s22 = sld [smem:[#allocation13_spill]] }
 0x40b   : > { %2513 = vst.msk [vmem:[#allocation5 + $0x18] sm:$0xff] %vm1737_vm6, %v2510_v38 }
 0x412   : > { %v2516_v21 = vld [vmem:[#allocation5 + $0x10] ss:$2 sm:$0xff]  ;;  %v2520_v39 = vld [vmem:[#allocation5 + $0x11] ss:$2 sm:$0xff] }
 0x413   : > { %v2522_v2 = vmax.f32 %v2516_v21, %v2520_v39 }
 0x415   : > { %2533 = vst.msk [vmem:[#allocation6 + $0x21] sm:$0xff] %vm1737_vm6, %v2522_v2  ;;  %v2757_v2 = vsel %vm2352_vm9, %v2752_v33, 0  ;;  %vm3070_vm9 = vcmask 1046528  }
 0x41c   : > { %v5171_v55 = vld [vmem:[#allocation6 + $0x21] sm:$0xff] }
 0x41d   : > { %v2541_v43 = vld [vmem:[#allocation6 + $0x20] sm:$0xff]  ;;  %v4253_v3 = vpack.i.bf16 %v5171_v55, %v5158_v32  ;;  %v2751_v47 = vpack.c.bf16 %v5171_v55, %v5158_v32  ;;  %v4268_v52 = vpack.i.bf16 %v2550_v51, %v5171_v55  ;;  %v4351_v32 = vld [vmem:[%s5378_s0 + $0x38] sm:$0xff]   ;;  %v4354_v55 = vld [vmem:[%s5378_s0 + $0x20] sm:$0xff]  }
 0x41e   : > { %v4248_v44 = vpack.i.bf16 %v2541_v43, %v2540_v56  ;;  %v2545_v46 = vld [vmem:[#allocation6 + $0x22] sm:$0xff]  ;;  %v4263_v48 = vpack.i.bf16 %v2548_v45, %v2541_v43  ;;  %2987 = vmatpush1.bf16.msra.mxu1 %v4351_v32  ;;  %v3678_v43 = vld [vmem:[%s5379_s11] ss:$0 sm:$0xff]  ;;  %s5382_s11 = sld [smem:[#allocation17_spill]] }
 0x41f   : > { %4254 = vrot.lane.b32.xlu1 %v4253_v3, %s4425_s16  ;;  %v4258_v49 = vpack.i.bf16 %v2545_v46, %v2539_v14  ;;  %v4273_v31 = vpack.i.bf16 %v2552_v50, %v2545_v46  ;;  %2988 = vmatprep.subr.bf16.mxu1 %v4422_v1  ;;  %v4356_v51 = vld [vmem:[%s5378_s0 + $0x10] sm:$0xff]  }
 0x420   : > { %4249 = vrot.lane.b32.xlu0 %v4248_v44, %s4431_s1  ;;  %v3679_v44 = vld [vmem:[%s5380_s22] ss:$0 sm:$0xff]  ;;  %s4435_s1 = smov 112   ;;  %s5383_s22 = sld [smem:[#allocation15_spill]] }
 0x422   : > { %2989 = vmatpush1.bf16.msra.mxu1 %v4352_v42 }
 0x423   : > { %4264 = vrot.lane.b32.xlu1 %v4263_v48, %s4428_s23  ;;  %2990 = vmatprep.subr.bf16.mxu1 %v4422_v1 }
 0x424   : > { %4259 = vrot.lane.b32.xlu0 %v4258_v49, %s4432_s2  ;;  %s5381_s2 = sld [smem:[#allocation19_spill]] }
 0x426   : > { %2991 = vmatpush1.bf16.msra.mxu1 %v4353_v40 }
 0x427   : > { %4274 = vrot.lane.b32.xlu1 %v4273_v31, %s4424_s15  ;;  %2992 = vmatprep.subr.bf16.mxu1 %v4422_v1 }
 0x428   : > { %4269 = vrot.lane.b32.xlu0 %v4268_v52, %s4430_s28  ;;  %s4434_s28 = smov 80  }
 0x42a   : > { %2993 = vmatpush1.bf16.msra.mxu1 %v4354_v55 }
 0x42b   : > { %2994 = vmatprep.subr.bf16.mxu1 %v4422_v1 }
 0x47a   : > { %v4245_v53 = vpop.permute.xlu1 %4244 }
 0x47b   : > { %v4240_v20 = vpop.permute.xlu0 %4239  ;;  %v4247_v57 = vunpack.i.h.bf16 %v4245_v53  ;;  %v4246_v63 = vunpack.i.l.bf16 %v4245_v53 }
 0x47c   : > { %v4242_v54 = vunpack.i.h.bf16 %v4240_v20  ;;  %v4241_v60 = vunpack.i.l.bf16 %v4240_v20 }
 0x47e   : > { %v2617_v0 = vsel %vm1737_vm6, %v2534_v61, %v4241_v60  ;;  %v2618_v25 = vsel %vm1737_vm6, %v2540_v56, %v4242_v54  ;;  %v4355_v56 = vld [vmem:[%s5378_s0 + $0x18] sm:$0xff]   ;;  %v4357_v54 = vld [vmem:[%s5378_s0 + $0x8] sm:$0xff]  }
 0x47f   : > { %v2619_v9 = vsel %vm2238_vm8, %v2617_v0, %v4246_v63  ;;  %v2620_v41 = vsel %vm2238_vm8, %v2618_v25, %v4247_v57  ;;  %2995 = vmatpush1.bf16.msra.mxu1 %v4355_v56  ;;  %v2822_v61 = vld [vmem:[#allocation7 + $0x2] sm:$0xff] }
 0x480   : > { %2996 = vmatprep.subr.bf16.mxu1 %v4422_v1  ;;  %v2820_v57 = vld [vmem:[#allocation7 + $0x1] sm:$0xff] }
 0x483   : > { %2997 = vmatpush1.bf16.msra.mxu1 %v4356_v51 }
 0x484   : > { %2998 = vmatprep.subr.bf16.mxu1 %v4422_v1 }
 0x487   : > { %2999 = vmatpush1.bf16.msra.mxu1 %v4357_v54  ;;  %v4360_v54 = vld [vmem:[%s5381_s2 + $0x20] sm:$0xff]  }
 0x488   : > { %3000 = vmatprep.subr.bf16.mxu1 %v4422_v1 }
 0x491   : > { %v4255_v29 = vpop.permute.xlu1 %4254 }
 0x492   : > { %v4250_v28 = vpop.permute.xlu0 %4249  ;;  %v4257_v5 = vunpack.i.h.bf16 %v4255_v29  ;;  %v4256_v8 = vunpack.i.l.bf16 %v4255_v29 }
 0x493   : > { %v4252_v59 = vunpack.i.h.bf16 %v4250_v28  ;;  %v4251_v6 = vunpack.i.l.bf16 %v4250_v28 }
 0x495   : > { %v2622_v35 = vsel %vm2247_vm10, %v2620_v41, %v4252_v59  ;;  %v2621_v36 = vsel %vm2247_vm10, %v2619_v9, %v4251_v6  ;;  %v4265_v12 = vpop.permute.xlu1 %4264  ;;  %v4358_v59 = vld [vmem:[%s5378_s0] sm:$0xff]  }
 0x496   : > { %v4260_v13 = vpop.permute.xlu0 %4259  ;;  %v4267_v17 = vunpack.i.h.bf16 %v4265_v12  ;;  %v4266_v22 = vunpack.i.l.bf16 %v4265_v12  ;;  %v2623_v23 = vsel %vm1057_vm2, %v2621_v36, %v4256_v8  ;;  %v2624_v24 = vsel %vm1057_vm2, %v2622_v35, %v4257_v5  ;;  %v2836_v6 = vld [vmem:[#allocation7 + $0x32] sm:$0xff]  ;;  %3001 = vmatpush1.bf16.msra.mxu1 %v4358_v59 }
 0x497   : > { %v4262_v62 = vunpack.i.h.bf16 %v4260_v13  ;;  %v4261_v15 = vunpack.i.l.bf16 %v4260_v13  ;;  %3016 = vmatprep.subr.bf16.mxu1 %v4422_v1  ;;  %v4359_v13 = vld [vmem:[%s5378_s0 + $0x40] sm:$0xff]  }
 0x499   : > { %v2625_v37 = vsel %vm2264_vm11, %v2623_v23, %v4261_v15  ;;  %v2626_v10 = vsel %vm2264_vm11, %v2624_v24, %v4262_v62  ;;  %v4275_v16 = vpop.permute.xlu1 %4274  ;;  %v2832_v62 = vld [vmem:[#allocation7 + $0x30] sm:$0xff] }
 0x49a   : > { %v4270_v58 = vpop.permute.xlu0 %4269  ;;  %v4277_v26 = vunpack.i.h.bf16 %v4275_v16  ;;  %v4276_v27 = vunpack.i.l.bf16 %v4275_v16  ;;  %v2627_v14 = vsel %vm2273_vm12, %v2625_v37, %v4266_v22  ;;  %v2628_v7 = vsel %vm2273_vm12, %v2626_v10, %v4267_v17  ;;  %3017 = vmatpush2.bf16.msra.mxu1 %v4359_v13  ;;  %v2834_v22 = vld [vmem:[#allocation7 + $0x31] sm:$0xff]  ;;  %v2818_v10 = vld [vmem:[#allocation7] sm:$0xff] }
 0x49b   : > { %v4272_v18 = vunpack.i.h.bf16 %v4270_v58  ;;  %v4271_v30 = vunpack.i.l.bf16 %v4270_v58  ;;  %3485 = vmatprep.subr.bf16.mxu1 %v4422_v1 }
 0x49d   : > { %v2629_v19 = vsel %vm2282_vm13, %v2627_v14, %v4271_v30  ;;  %v2630_v34 = vsel %vm2282_vm13, %v2628_v7, %v4272_v18 }
 0x49e   : > { %v2631_v38 = vsel %vm1359_vm4, %v2629_v19, %v4276_v27  ;;  %v2632_v21 = vsel %vm1359_vm4, %v2630_v34, %v4277_v26 }
 0x49f   : > { %v2633_v39 = vpack.c.bf16 %v2632_v21, %v2631_v38 }
 0x4a1   : > { %3883 = vmatmul.mubr.msk.bf16.vlgmr.msra.gmra.mxu0 %vm2339_vm14, %v2633_v39 }
 0x4a2   : > { %3887 = vmatpush3.bf16.msra.mxu0 %v2757_v2  ;;  %3888 = vmatprep.mubr.msk.bf16.mxu0 %vm4433_vm15, %v4423_v11 }
 0x4a3   : > { %3892 = vmatprep.subr.bf16.mxu0 %v4423_v11 }
 0x4a9   : > { %3889 = vmatmul.mubr.msk.bf16.vlgmr.msra.gmra.mxu0 %vm1737_vm6, %v2751_v47  ;;  %vm2906_vm6 = vcmask 916480  }
 0x4aa   : > { %3902 = vmatprep.mubr.msk.bf16.mxu0 %vm4433_vm15, %v4423_v11  ;;  %3893 = vmatpush3.bf16.msra.mxu0 %v4360_v54 }
 0x4ab   : > { %3894 = vmatprep.subr.bf16.mxu0 %v4423_v11 }
 0x561   : > { %v2710_v3 = vpop.f32.mrf.mxu0 }
 0x562   : > { %v2724_v4 = vmul.f32 %v3678_v43, %v2710_v3 }
 0x563   : > { %v3884_v45 = vpop.f32.mrf.mxu0 }
 0x564   : > { %v2733_v46 = vadd.f32 %v3679_v44, %v2724_v4 }
 0x565   : > { %v2713_v47 = vpop.f32.mrf.mxu0 }
 0x566   : > { %v2735_v48 = vmax.f32 %v2733_v46, 0.0  ;;  %v2725_v49 = vmul.f32 %v3678_v43, %v2713_v47 }
 0x567   : > { %v3885_v50 = vpop.f32.mrf.mxu0 }
 0x568   : > { %2747 = vst.msk [vmem:[#allocation7 + $0x11] sm:$0xff] %vm2238_vm8, %v2735_v48  ;;  %v2734_v31 = vadd.f32 %v3679_v44, %v2725_v49 }
 0x569   : > { %v5236_v52 = vpop.f32.mrf.mxu0 }
 0x56a   : > { %v2736_v20 = vmax.f32 %v2734_v31, 0.0 }
 0x56b   : > { %v3890_v53 = vpop.f32.mrf.mxu0 }
 0x56c   : > { %2748 = vst.msk [vmem:[#allocation7 + $0x21] sm:$0xff] %vm2238_vm8, %v2736_v20 }
 0x56d   : > { %v5241_v60 = vpop.f32.mrf.mxu0 }
 0x56f   : > { %v3891_v63 = vpop.f32.mrf.mxu0  ;;  %v2823_v0 = vld [vmem:[#allocation7 + $0x12] sm:$0xff] }
 0x570   : > { %v2821_v25 = vld [vmem:[#allocation7 + $0x11] sm:$0xff]  ;;  %v4283_v29 = vpack.i.bf16 %v2823_v0, %v2822_v61  ;;  %v4361_v61 = vld [vmem:[%s5381_s2 + $0x18] sm:$0xff]   ;;  %v3681_v63 = vld [vmem:[%s5382_s11] ss:$0 sm:$0xff]  ;;  %s5386_s11 = sld [smem:[#allocation22_spill]] }
 0x571   : > { %v4278_v28 = vpack.i.bf16 %v2821_v25, %v2820_v57  ;;  %v2824_v5 = vld [vmem:[#allocation7 + $0x10] sm:$0xff]  ;;  %3895 = vmatpush3.bf16.msra.mxu0 %v4361_v61  ;;  %v4362_v57 = vld [vmem:[%s5381_s2 + $0x10] sm:$0xff]  }
 0x572   : > { %4284 = vrot.lane.b32.xlu1 %v4283_v29, %s4425_s16  ;;  %3896 = vmatprep.subr.bf16.mxu0 %v4423_v11 }
 0x573   : > { %4279 = vrot.lane.b32.xlu0 %v4278_v28, %s4429_s26  ;;  %v2835_v8 = vld [vmem:[#allocation7 + $0x22] sm:$0xff] }
 0x574   : > { %v2827_v9 = vld [vmem:[#allocation7 + $0x21] sm:$0xff]  ;;  %v2910_v35 = vpack.c.bf16 %v2836_v6, %v2835_v8  ;;  %v4298_v17 = vpack.i.bf16 %v2835_v8, %v2823_v0  ;;  %v3693_v0 = vld [vmem:[%s5383_s22] ss:$0 sm:$0xff]  ;;  %s5389_s22 = sld [smem:[#allocation23_spill]] }
 0x575   : > { %v2825_v41 = vld [vmem:[#allocation7 + $0x20] sm:$0xff]  ;;  %v4293_v36 = vpack.i.bf16 %v2827_v9, %v2821_v25  ;;  %v4308_v23 = vpack.i.bf16 %v2834_v22, %v2827_v9  ;;  %3897 = vmatpush3.bf16.msra.mxu0 %v4362_v57  ;;  %v2807_v25 = vmul.f32 %v3681_v63, %v5236_v52  ;;  %v2808_v9 = vmul.f32 %v3681_v63, %v5241_v60 }
 0x576   : > { %v4288_v12 = vpack.i.bf16 %v2825_v41, %v2824_v5  ;;  %3692 = vmatprep.mubr.msk.bf16.mxu1 %vm2238_vm8, %v2910_v35  ;;  %v4303_v15 = vpack.i.bf16 %v2832_v62, %v2825_v41  ;;  %3898 = vmatprep.subr.bf16.mxu0 %v4423_v11  ;;  %v4374_v57 = vld [vmem:[%s5386_s11 + $0x40] sm:$0xff]  }
 0x577   : > { %4294 = vrot.lane.b32.xlu1 %v4293_v36, %s4424_s15 }
 0x578   : > { %4289 = vrot.lane.b32.xlu0 %v4288_v12, %s4428_s23 }
 0x57b   : > { %4304 = vrot.lane.b32.xlu1 %v4303_v15, %s4426_s18 }
 0x57c   : > { %4299 = vrot.lane.b32.xlu0 %v4298_v17, %s4434_s28  ;;  %s5384_s28 = sld [smem:[#allocation18_spill]] }
 0x580   : > { %4309 = vrot.lane.b32.xlu0 %v4308_v23, %s4435_s1  ;;  %s5385_s1 = sld [smem:[#allocation16_spill]] }
 0x582   : > { %v3682_v29 = vld [vmem:[%s5384_s28] ss:$0 sm:$0xff] }
 0x583   : > { %v2816_v8 = vadd.f32 %v3682_v29, %v2807_v25  ;;  %v2817_v62 = vadd.f32 %v3682_v29, %v2808_v9 }
 0x586   : > { %v3694_v59 = vld [vmem:[%s5385_s1] ss:$0 sm:$0xff] }
 0x5e4   : > { %v4285_v24 = vpop.permute.xlu1 %4284 }
 0x5e5   : > { %v4280_v37 = vpop.permute.xlu0 %4279  ;;  %v4287_v26 = vunpack.i.h.bf16 %v4285_v24  ;;  %v4286_v27 = vunpack.i.l.bf16 %v4285_v24 }
 0x5e6   : > { %v4282_v16 = vunpack.i.h.bf16 %v4280_v37  ;;  %v4281_v58 = vunpack.i.l.bf16 %v4280_v37 }
 0x5e8   : > { %v2893_v18 = vsel %vm2238_vm8, %v2818_v10, %v4281_v58  ;;  %v2894_v30 = vsel %vm2238_vm8, %v2824_v5, %v4282_v16 }
 0x5e9   : > { %v4295_v14 = vpop.permute.xlu1 %4294  ;;  %v2895_v21 = vsel %vm1057_vm2, %v2893_v18, %v4286_v27  ;;  %v2896_v39 = vsel %vm1057_vm2, %v2894_v30, %v4287_v26  ;;  %v4363_v26 = vld [vmem:[%s5381_s2 + $0x8] sm:$0xff]   ;;  %v4364_v30 = vld [vmem:[%s5381_s2] sm:$0xff]  }
 0x5ea   : > { %v4290_v7 = vpop.permute.xlu0 %4289  ;;  %v4297_v34 = vunpack.i.h.bf16 %v4295_v14  ;;  %v4296_v38 = vunpack.i.l.bf16 %v4295_v14  ;;  %3899 = vmatpush3.bf16.msra.mxu0 %v4363_v26 }
 0x5eb   : > { %v4292_v33 = vunpack.i.h.bf16 %v4290_v7  ;;  %v4291_v19 = vunpack.i.l.bf16 %v4290_v7  ;;  %3900 = vmatprep.subr.bf16.mxu0 %v4423_v11 }
 0x5ed   : > { %v2898_v2 = vsel %vm2273_vm12, %v2896_v39, %v4292_v33  ;;  %v2897_v32 = vsel %vm2273_vm12, %v2895_v21, %v4291_v19  ;;  %v4305_v42 = vpop.permute.xlu1 %4304 }
 0x5ee   : > { %v4300_v40 = vpop.permute.xlu0 %4299  ;;  %v4307_v43 = vunpack.i.h.bf16 %v4305_v42  ;;  %v4306_v3 = vunpack.i.l.bf16 %v4305_v42  ;;  %v2899_v44 = vsel %vm1359_vm4, %v2897_v32, %v4296_v38  ;;  %v2900_v4 = vsel %vm1359_vm4, %v2898_v2, %v4297_v34  ;;  %3901 = vmatpush3.bf16.msra.mxu0 %v4364_v30 }
 0x5ef   : > { %v4302_v55 = vunpack.i.h.bf16 %v4300_v40  ;;  %v4301_v56 = vunpack.i.l.bf16 %v4300_v40  ;;  %3313 = vmatprep.subr.bf16.mxu0 %v4422_v1 }
 0x5f1   : > { %v2902_v45 = vsel %vm2901_vm3, %v2899_v44, %v4301_v56  ;;  %v2903_v46 = vsel %vm2901_vm3, %v2900_v4, %v4302_v55  ;;  %v4367_v44 = vld [vmem:[%s5386_s11 + $0x28] sm:$0xff]   ;;  %v4368_v4 = vld [vmem:[%s5386_s11 + $0x20] sm:$0xff]  }
 0x5f2   : > { %v4310_v47 = vpop.permute.xlu0 %4309  ;;  %v2904_v50 = vsel %vm1368_vm5, %v2902_v45, %v4306_v3  ;;  %v2905_v51 = vsel %vm1368_vm5, %v2903_v46, %v4307_v43  ;;  %v4365_v43 = vld [vmem:[%s5386_s11 + $0x38] sm:$0xff]   ;;  %v4366_v3 = vld [vmem:[%s5386_s11 + $0x30] sm:$0xff]   ;;  %v4371_v46 = vld [vmem:[%s5386_s11 + $0x8] sm:$0xff]  }
 0x5f3   : > { %v4312_v48 = vunpack.i.h.bf16 %v4310_v47  ;;  %v4311_v49 = vunpack.i.l.bf16 %v4310_v47  ;;  %v4369_v45 = vld [vmem:[%s5386_s11 + $0x18] sm:$0xff]   ;;  %v4372_v47 = vld [vmem:[%s5386_s11] sm:$0xff]  }
 0x5f5   : > { %v2907_v31 = vsel %vm2906_vm6, %v2904_v50, %v4311_v49  ;;  %v2908_v20 = vsel %vm2906_vm6, %v2905_v51, %v4312_v48 }
 0x5f6   : > { %v2909_v53 = vpack.c.bf16 %v2908_v20, %v2907_v31  ;;  %v4373_v31 = vld [vmem:[%s5386_s11 + $0x48] sm:$0xff]  }
 0x5f8   : > { %3019 = vmatmul.mubr.bf16.vlgmr.msra.gmra.mxu1 %v2909_v53 }
 0x6b8   : > { %v3020_v28 = vpop.f32.mrf.mxu1 }
 0x6b9   : > { %v3034_v6 = vmul.f32 %v3693_v0, %v3020_v28 }
 0x6ba   : > { %v3022_v5 = vpop.f32.mrf.mxu1 }
 0x6bb   : > { %v3043_v41 = vadd.f32 %v3694_v59, %v3034_v6 }
 0x6bc   : > { %v3023_v35 = vpop.f32.mrf.mxu1 }
 0x6bd   : > { %v3045_v36 = vadd.f32 %v3043_v41, %v2816_v8  ;;  %v3035_v12 = vmul.f32 %v3693_v0, %v3023_v35 }
 0x6be   : > { %v3025_v13 = vpop.f32.mrf.mxu1 }
 0x6bf   : > { %v3047_v15 = vmax.f32 %v3045_v36, 0.0  ;;  %v3044_v17 = vadd.f32 %v3694_v59, %v3035_v12  ;;  %v4375_v13 = vld [vmem:[%s4579_s6 + $0x38] sm:$0xff]  }
 0x6c0   : > { %3486 = vmatpush1.bf16.msra.mxu1 %v4375_v13 }
 0x6c1   : > { %3058 = vst.msk [vmem:[#allocation8 + $0x11] sm:$0xff] %vm2238_vm8, %v3047_v15  ;;  %v3046_v52 = vadd.f32 %v3044_v17, %v2817_v62  ;;  %v4376_v62 = vld [vmem:[%s4579_s6 + $0x30] sm:$0xff]   ;;  %3487 = vmatprep.subr.bf16.mxu1 %v4422_v1  ;;  %v4377_v15 = vld [vmem:[%s4579_s6 + $0x28] sm:$0xff]   ;;  %v4378_v17 = vld [vmem:[%s4579_s6 + $0x20] sm:$0xff]  }
 0x6c3   : > { %v3048_v22 = vmax.f32 %v3046_v52, 0.0  ;;  %v4379_v52 = vld [vmem:[%s4579_s6 + $0x18] sm:$0xff]  }
 0x6c4   : > { %3488 = vmatpush1.bf16.msra.mxu1 %v4376_v62 }
 0x6c5   : > { %3059 = vst.msk [vmem:[#allocation8 + $0x21] sm:$0xff] %vm2238_vm8, %v3048_v22  ;;  %3489 = vmatprep.subr.bf16.mxu1 %v4422_v1  ;;  %v4380_v22 = vld [vmem:[%s4579_s6 + $0x10] sm:$0xff]  }
 0x6c8   : > { %v3060_v23 = vld [vmem:[#allocation8 + $0x11] sm:$0xff]  ;;  %3490 = vmatpush1.bf16.msra.mxu1 %v4377_v15 }
 0x6c9   : > { %3491 = vmatprep.subr.bf16.mxu1 %v4422_v1 }
 0x6cc   : > { %v3062_v24 = vld [vmem:[#allocation8 + $0x21] sm:$0xff]  ;;  %3492 = vmatpush1.bf16.msra.mxu1 %v4378_v17 }
 0x6cd   : > { %v3063_v37 = vmax.f32 %v3060_v23, %v3062_v24  ;;  %3493 = vmatprep.subr.bf16.mxu1 %v4422_v1  ;;  %v4381_v23 = vld [vmem:[%s4579_s6 + $0x8] sm:$0xff]   ;;  %v4382_v24 = vld [vmem:[%s4579_s6] sm:$0xff]  }
 0x6cf   : > { %v3065_v60 = vrot.slane %v3063_v37, 7  ;;  %v3068_v10 = vrot.slane %v3063_v37, 1 }
 0x6d0   : > { %3494 = vmatpush1.bf16.msra.mxu1 %v4379_v52 }
 0x6d1   : > { %v3067_v16 = vsel %vm978_vm0, -inf, %v3065_v60  ;;  %v3071_v58 = vsel %vm3070_vm9, %v3068_v10, -inf  ;;  %vm3205_vm0 = vcmask 257024   ;;  %3495 = vmatprep.subr.bf16.mxu1 %v4422_v1  ;;  %v3715_v10 = vld [vmem:[%s4574_s20] ss:$0 sm:$0xff] }
 0x6d2   : > { %v3072_v27 = vmax.f32 %v3067_v16, %v3071_v58  ;;  %3206 = vst.msk [vmem:[#allocation10 + $0x8] sm:$0xf] %vm3205_vm0, %v4423_v11  ;;  %3371 = vst.msk [vmem:[#allocation11 + $0x8] sm:$0xf] %vm3205_vm0, %v4423_v11  ;;  %v4370_v11 = vld [vmem:[%s5386_s11 + $0x10] sm:$0xff]   ;;  %v4383_v58 = vld [vmem:[%s4579_s6 + $0x48] sm:$0xff]  }
 0x6d4   : > { %v3073_v18 = vmax.f32 %v3063_v37, %v3072_v27  ;;  %3496 = vmatpush1.bf16.msra.mxu1 %v4380_v22  ;;  %v3714_v37 = vld [vmem:[%s5389_s22] ss:$0 sm:$0xff] }
 0x6d5   : > { %3497 = vmatprep.subr.bf16.mxu1 %v4422_v1 }
 0x6d6   : > { %3077 = vst.msk [vmem:[#allocation9 + $0x2] sm:$0xff] %vm2238_vm8, %v3073_v18 }
 0x6d8   : > { %3498 = vmatpush1.bf16.msra.mxu1 %v4381_v23 }
 0x6d9   : > { %3499 = vmatprep.subr.bf16.mxu1 %v4422_v1 }
 0x6dc   : > { %3500 = vmatpush1.bf16.msra.mxu1 %v4382_v24 }
 0x6dd   : > { %v3080_v14 = vld [vmem:[#allocation9 + $0x2] sm:$0xff]  ;;  %3513 = vmatprep.subr.bf16.mxu1 %v4422_v1 }
 0x6de   : > { %v3079_v7 = vld [vmem:[#allocation9 + $0x1] sm:$0xff]  ;;  %3088 = vrot.lane.b32.xlu0 %v3080_v14, %s4425_s16  ;;  %v4384_v14 = vld [vmem:[%s4579_s6 + $0x40] sm:$0xff]  }
 0x6df   : > { %3084 = vrot.lane.b32.xlu1 %v3079_v7, %s4429_s26  ;;  %v3082_v33 = vld [vmem:[#allocation9 + $0x4] sm:$0xff]  ;;  %s5388_s26 = sld [smem:[#allocation21_spill]] }
 0x6e0   : > { %v3081_v19 = vld [vmem:[#allocation9 + $0x3] sm:$0xff]  ;;  %3514 = vmatpush2.bf16.msra.mxu1 %v4383_v58 }
 0x6e1   : > { %v3078_v21 = vld [vmem:[#allocation9] sm:$0xff]  ;;  %3515 = vmatprep.subr.bf16.mxu1 %v4422_v1 }
 0x6e2   : > { %3096 = vrot.lane.b32.xlu0 %v3082_v33, %s4424_s15 }
 0x6e3   : > { %3092 = vrot.lane.b32.xlu1 %v3081_v19, %s4428_s23  ;;  %s5387_s23 = sld [smem:[#allocation20_spill]] }
 0x6e4   : > { %3516 = vmatpush2.bf16.msra.mxu1 %v4384_v14 }
 0x6e5   : > { %v3702_v50 = vld [vmem:[%s5388_s26] ss:$0 sm:$0xff] }
 0x6e9   : > { %v3701_v48 = vld [vmem:[%s5387_s23] ss:$0 sm:$0xff] }
 0x750   : > { %v3089_v34 = vpop.permute.xlu0 %3088 }
 0x751   : > { %v3085_v38 = vpop.permute.xlu1 %3084 }
 0x752   : > { %v3099_v39 = vsel %vm2238_vm8, %v3078_v21, %v3085_v38 }
 0x753   : > { %v3100_v42 = vsel %vm1057_vm2, %v3099_v39, %v3089_v34 }
 0x754   : > { %v3097_v2 = vpop.permute.xlu0 %3096 }
 0x755   : > { %v3093_v32 = vpop.permute.xlu1 %3092 }
 0x756   : > { %v3101_v40 = vsel %vm2273_vm12, %v3100_v42, %v3093_v32 }
 0x757   : > { %v3102_v55 = vsel %vm1359_vm4, %v3101_v40, %v3097_v2 }
 0x758   : > { %v3103_v56 = vpack.c.bf16 %v3102_v55, %v3102_v55 }
 0x75a   : > { %3903 = vmatmul.mubr.msk.bf16.vlgmr.msra.gmra.mxu0 %vm2901_vm3, %v3103_v56 }
 0x75b   : > { %3314 = vmatpush1.bf16.msra.mxu0 %v4365_v43  ;;  %v3716_v43 = vld [vmem:[%s4584_s27] ss:$0 sm:$0xff] }
 0x75c   : > { %3315 = vmatprep.subr.bf16.mxu0 %v4422_v1 }
 0x75f   : > { %3316 = vmatpush1.bf16.msra.mxu0 %v4366_v3 }
 0x760   : > { %3317 = vmatprep.subr.bf16.mxu0 %v4422_v1 }
 0x763   : > { %3318 = vmatpush1.bf16.msra.mxu0 %v4367_v44 }
 0x764   : > { %3319 = vmatprep.subr.bf16.mxu0 %v4422_v1 }
 0x767   : > { %3320 = vmatpush1.bf16.msra.mxu0 %v4368_v4 }
 0x768   : > { %3321 = vmatprep.subr.bf16.mxu0 %v4422_v1 }
 0x76b   : > { %3322 = vmatpush1.bf16.msra.mxu0 %v4369_v45 }
 0x76c   : > { %3323 = vmatprep.subr.bf16.mxu0 %v4422_v1 }
 0x76f   : > { %3324 = vmatpush1.bf16.msra.mxu0 %v4370_v11 }
 0x770   : > { %3325 = vmatprep.subr.bf16.mxu0 %v4422_v1 }
 0x773   : > { %3326 = vmatpush1.bf16.msra.mxu0 %v4371_v46 }
 0x774   : > { %3327 = vmatprep.subr.bf16.mxu0 %v4422_v1 }
 0x777   : > { %3328 = vmatpush1.bf16.msra.mxu0 %v4372_v47 }
 0x778   : > { %3341 = vmatprep.subr.bf16.mxu0 %v4422_v1 }
 0x77b   : > { %3342 = vmatpush2.bf16.msra.mxu0 %v4373_v31 }
 0x77c   : > { %3343 = vmatprep.subr.bf16.mxu0 %v4422_v1 }
 0x77f   : > { %3344 = vmatpush2.bf16.msra.mxu0 %v4374_v57 }
 0x81a   : > { %v3181_v49 = vpop.f32.mrf.mxu0 }
 0x81b   : > { %v3194_v51 = vmul.f32 %v3701_v48, %v3181_v49 }
 0x81c   : > { %v3904_v20 = vpop.f32.mrf.mxu0 }
 0x81d   : > { %v3202_v53 = vadd.f32 %v3702_v50, %v3194_v51 }
 0x81e   : > { %v3184_v54 = vpop.f32.mrf.mxu0 }
 0x81f   : > { %v3203_v61 = vmax.f32 %v3202_v53, 0.0 }
 0x820   : > { %v3905_v63 = vpop.f32.mrf.mxu0 }
 0x821   : > { %3207 = vst.msk [vmem:[#allocation10 + $0x2] sm:$0xff] %vm1057_vm2, %v3203_v61 }
 0x828   : > { %v3210_v0 = vld [vmem:[#allocation10 + $0x2] sm:$0xff] }
 0x829   : > { %v3209_v25 = vld [vmem:[#allocation10 + $0x1] sm:$0xff]  ;;  %3218 = vrot.lane.b32.xlu0 %v3210_v0, %s4424_s15 }
 0x82a   : > { %v3212_v29 = vld [vmem:[#allocation10 + $0x4] sm:$0xff]  ;;  %3214 = vrot.lane.b32.xlu1 %v3209_v25, %s4425_s16 }
 0x82b   : > { %v3229_v28 = vpack.c.bf16 %v3212_v29, %v3212_v29  ;;  %v3211_v59 = vld [vmem:[#allocation10 + $0x3] sm:$0xff] }
 0x82c   : > { %v3208_v5 = vld [vmem:[#allocation10] sm:$0xff] }
 0x82d   : > { %3713 = vmatprep.mubr.msk.bf16.mxu0 %vm1057_vm2, %v3229_v28 }
 0x82e   : > { %3222 = vrot.lane.b32.xlu1 %v3211_v59, %s4426_s18 }
 0x89b   : > { %v3219_v8 = vpop.permute.xlu0 %3218 }
 0x89c   : > { %v3215_v6 = vpop.permute.xlu1 %3214 }
 0x89d   : > { %v3225_v9 = vsel %vm1057_vm2, %v3208_v5, %v3215_v6 }
 0x89e   : > { %v3226_v35 = vsel %vm1359_vm4, %v3225_v9, %v3219_v8 }
 0x8a0   : > { %v3223_v41 = vpop.permute.xlu1 %3222 }
 0x8a1   : > { %v3227_v36 = vsel %vm1368_vm5, %v3226_v35, %v3223_v41 }
 0x8a2   : > { %v3228_v12 = vpack.c.bf16 %v3227_v36, %v3227_v36 }
 0x8a4   : > { %3346 = vmatmul.mubr.bf16.vlgmr.msra.gmra.mxu0 %v3228_v12 }
 0x964   : > { %v3347_v60 = vpop.f32.mrf.mxu0 }
 0x965   : > { %v3360_v16 = vmul.f32 %v3714_v37, %v3347_v60 }
 0x966   : > { %v3349_v26 = vpop.f32.mrf.mxu0 }
 0x967   : > { %v3368_v27 = vadd.f32 %v3715_v10, %v3360_v16 }
 0x968   : > { %v3350_v18 = vpop.f32.mrf.mxu0 }
 0x969   : > { %v3369_v30 = vmax.f32 %v3368_v27, 0.0 }
 0x96a   : > { %v3351_v7 = vpop.f32.mrf.mxu0 }
 0x96b   : > { %3372 = vst.msk [vmem:[#allocation11 + $0x2] sm:$0xff] %vm1057_vm2, %v3369_v30 }
 0x972   : > { %v3375_v33 = vld [vmem:[#allocation11 + $0x2] sm:$0xff] }
 0x973   : > { %v3374_v19 = vld [vmem:[#allocation11 + $0x1] sm:$0xff]  ;;  %3383 = vrot.lane.b32.xlu1 %v3375_v33, %s4424_s15  ;;  %s3615_s15 = sshll.u32 %s5391_s10, 3 }
 0x974   : > { %v3377_v34 = vld [vmem:[#allocation11 + $0x4] sm:$0xff]  ;;  %3379 = vrot.lane.b32.xlu0 %v3374_v19, %s4425_s16  ;;  %s900_s16 = scalar_lea.vmem %s4589_s4, %s3615_s15 }
 0x975   : > { %v3394_v38 = vpack.c.bf16 %v3377_v34, %v3377_v34  ;;  %v3376_v1 = vld [vmem:[#allocation11 + $0x3] sm:$0xff] }
 0x976   : > { %v3373_v39 = vld [vmem:[#allocation11] sm:$0xff] }
 0x977   : > { %3727 = vmatprep.mubr.msk.bf16.mxu1 %vm1057_vm2, %v3394_v38 }
 0x978   : > { %3387 = vrot.lane.b32.xlu0 %v3376_v1, %s4426_s18 }
 0x9e5   : > { %v3384_v2 = vpop.permute.xlu1 %3383 }
 0x9e6   : > { %v3380_v21 = vpop.permute.xlu0 %3379 }
 0x9e7   : > { %v3390_v32 = vsel %vm1057_vm2, %v3373_v39, %v3380_v21 }
 0x9e8   : > { %v3391_v40 = vsel %vm1359_vm4, %v3390_v32, %v3384_v2 }
 0x9ea   : > { %v3388_v42 = vpop.permute.xlu0 %3387 }
 0x9eb   : > { %v3392_v55 = vsel %vm1368_vm5, %v3391_v40, %v3388_v42 }
 0x9ec   : > { %v3393_v56 = vpack.c.bf16 %v3392_v55, %v3392_v55 }
 0x9ee   : > { %3518 = vmatmul.mubr.bf16.vlgmr.msra.gmra.mxu1 %v3393_v56 }
 0xaae   : > { %v3519_v3 = vpop.f32.mrf.mxu1 }
 0xaaf   : > { %v3520_v44 = vadd.f32 %v3716_v43, %v3519_v3 }
 0xab0   : > { %v3521_v4 = vpop.f32.mrf.mxu1 }
 0xab1   : > { %3525 = vst [vmem:[%s900_s16] sm:$0xff] %v3520_v44 }
 0xab2   : > { %v3522_v45 = vpop.f32.mrf.mxu1 }
 0xab4   : > { %v3523_v11 = vpop.f32.mrf.mxu1 }
 0xab5 PF: > { %s69_s7 = sadd.s32 1, %s4391_s7  }
 0xab6   : > { %p66_p4 = scmp.ge.s32.totalorder %s69_s7, 4  }
 0xab8   :  { %68 = sbr.rel (!%p66_p4) target bundleno = 48 (0x30), region = 213 }

</bundles_post_ra>
